<compile_context>
chip_gen: v7x
topology: tpu7x:2x2x1
jax: 0.10.0
libtpu: 0.0.40
codegen_flags: <defaults>
</compile_context>

<pallas_src>
import functools

import jax
import jax.numpy as jnp
from jax.experimental import pallas as pl
from jax.experimental.pallas import tpu as pltpu


# ----------------------------------------------------------------------------
# Pallas kernel: PointRNNCell  (split-weight 1x1 conv + max over nsample)
# ----------------------------------------------------------------------------
def _make_cell_kernel(has_feat, S):
    def kernel(*refs):
        if has_feat:
            (p2g_ref, s2g_ref, xyz_ref, feat_ref,
             wd_ref, wx_ref, ws_ref, b_ref, out_ref, acc_ref) = refs
        else:
            (p2g_ref, s2g_ref, xyz_ref,
             wd_ref, ws_ref, b_ref, out_ref, acc_ref) = refs

        xyz = xyz_ref[0]                                   # (T, 3) f32
        # Hoist weight loads out of the nsample loop (loaded once per tile).
        wd = wd_ref[...]                                   # (3, Cout)  f32
        ws = ws_ref[...]                                   # (Cs, Cout) bf16

        # max over the nsample axis of (disp @ Wd + S2 @ Ws); accumulator kept
        # in a VMEM scratch (no vreg blowup for large point tiles).
        for s in range(S):
            disp = p2g_ref[0, s] - xyz                     # (T, 3) f32 (exact)
            y = jnp.dot(disp, wd, preferred_element_type=jnp.float32)
            y = y + jnp.dot(s2g_ref[0, s], ws,
                            preferred_element_type=jnp.float32)
            if s == 0:
                acc_ref[...] = y
            else:
                acc_ref[...] = jnp.maximum(acc_ref[...], y)

        # s-invariant part, added once (bias + feature term hoisted out of the
        # max loop: max_s(a_s + inv) == max_s(a_s) + inv).
        inv = b_ref[...]
        if has_feat:
            inv = inv + jnp.dot(feat_ref[0], wx_ref[...],
                                preferred_element_type=jnp.float32)
        out_ref[0] = acc_ref[...] + inv

    return kernel


def _pick_tile_n(N, S, Cs, Cf, Cout):
    """Largest point-tile whose double-buffered VMEM footprint stays under a
    16 MiB budget (the pallas_call raises the scoped VMEM limit accordingly,
    still well under physical VMEM on v5e/v6e/v7x)."""
    budget = 16 * 1024 * 1024

    def step_bytes(t):
        ins = S * t * (3 * 4 + Cs * 2) + t * (3 * 4 + Cf * 2)
        outs = t * Cout * 4
        return 2 * (ins + outs) + t * Cout * 4             # dbl-buf + scratch

    if step_bytes(N) <= budget:
        return N
    for t in (4096, 2048, 1024, 512, 256, 128, 64, 32):
        if t < N and step_bytes(t) <= budget:
            return t
    return 32


def cell_conv_max(p2_grouped, s2_grouped, xyz, feat, wd, wx, ws, bias):
    """p2_grouped: (B,S,N,3) f32, s2_grouped: (B,S,N,Cs) bf16, xyz: (B,N,3) f32,
    feat: (B,N,Cf) bf16 or None  ->  (B, N, Cout) f32."""
    B, S, N, _ = p2_grouped.shape
    Cs = ws.shape[0]
    Cout = ws.shape[1]
    Cf = 0 if feat is None else wx.shape[0]
    has_feat = feat is not None

    tn = _pick_tile_n(N, S, Cs, Cf, Cout)
    grid = (B, pl.cdiv(N, tn))

    in_specs = [
        pl.BlockSpec((1, S, tn, 3), lambda i, j: (i, 0, j, 0)),
        pl.BlockSpec((1, S, tn, Cs), lambda i, j: (i, 0, j, 0)),
        pl.BlockSpec((1, tn, 3), lambda i, j: (i, j, 0)),
    ]
    args = [p2_grouped, s2_grouped, xyz]
    if has_feat:
        in_specs.append(pl.BlockSpec((1, tn, Cf), lambda i, j: (i, j, 0)))
        args.append(feat)
    in_specs.append(pl.BlockSpec((3, Cout), lambda i, j: (0, 0)))
    args.append(wd)
    if has_feat:
        in_specs.append(pl.BlockSpec((Cf, Cout), lambda i, j: (0, 0)))
        args.append(wx)
    in_specs += [
        pl.BlockSpec((Cs, Cout), lambda i, j: (0, 0)),
        pl.BlockSpec((1, Cout), lambda i, j: (0, 0)),
    ]
    args += [ws, bias.reshape(1, Cout)]

    return pl.pallas_call(
        _make_cell_kernel(has_feat, S),
        out_shape=jax.ShapeDtypeStruct((B, N, Cout), jnp.float32),
        grid=grid,
        in_specs=in_specs,
        out_specs=pl.BlockSpec((1, tn, Cout), lambda i, j: (i, j, 0)),
        scratch_shapes=[pltpu.VMEM((tn, Cout), jnp.float32)],
        compiler_params=pltpu.CompilerParams(
            dimension_semantics=("parallel", "parallel"),
            vmem_limit_bytes=40 * 1024 * 1024),
    )(*args)


# ----------------------------------------------------------------------------
# Pallas kernel: final MLP head  (448 -> 64 -> 3), rows = B*N collapsed & tiled
# ----------------------------------------------------------------------------
def _mlp_head_kernel(x_ref, w1_ref, b1_ref, w2_ref, b2_ref, out_ref):
    x = x_ref[...].astype(jnp.bfloat16)
    h = jnp.dot(x, w1_ref[...], preferred_element_type=jnp.float32) + b1_ref[...]
    h = jnp.maximum(h, 0.0)
    y = jnp.dot(h.astype(jnp.bfloat16), w2_ref[...],
                preferred_element_type=jnp.float32) + b2_ref[...]
    out_ref[...] = y


def mlp_head(x, p1, p2):
    """x: (B, N, 448) -> (B, N, 3)."""
    B, N, Cin = x.shape
    H = p1["w"].shape[1]
    Cout = p2["w"].shape[1]
    R = B * N
    xr = x.reshape(R, Cin)                                 # free reshape
    tr = R if R <= 2048 else 2048

    out = pl.pallas_call(
        _mlp_head_kernel,
        out_shape=jax.ShapeDtypeStruct((R, Cout), jnp.float32),
        grid=(pl.cdiv(R, tr),),
        in_specs=[
            pl.BlockSpec((tr, Cin), lambda r: (r, 0)),
            pl.BlockSpec((Cin, H), lambda r: (0, 0)),
            pl.BlockSpec((1, H), lambda r: (0, 0)),
            pl.BlockSpec((H, Cout), lambda r: (0, 0)),
            pl.BlockSpec((1, Cout), lambda r: (0, 0)),
        ],
        out_specs=pl.BlockSpec((tr, Cout), lambda r: (r, 0)),
        compiler_params=pltpu.CompilerParams(dimension_semantics=("parallel",)),
    )(xr, p1["w"].astype(jnp.bfloat16), p1["b"].reshape(1, H),
      p2["w"].astype(jnp.bfloat16), p2["b"].reshape(1, Cout))
    return out.reshape(B, N, Cout)


# ----------------------------------------------------------------------------
# Plain-JAX glue (data-dependent sampling / gathering ops)
# ----------------------------------------------------------------------------
def furthest_point_sample(xyz, npoint):
    """xyz: (B, N, 3) -> int32 indices (B, npoint). Greedy FPS starting at idx 0."""
    B, N, _ = xyz.shape

    def body(i, state):
        idxs, dists, last = state
        last_pt = jax.vmap(lambda p, k: p[k])(xyz, last)            # (B, 3)
        d = jnp.sum((xyz - last_pt[:, None, :]) ** 2, axis=-1)      # (B, N)
        dists = jnp.minimum(dists, d)
        nxt = jnp.argmax(dists, axis=-1).astype(jnp.int32)
        idxs = idxs.at[:, i].set(nxt)
        return idxs, dists, nxt

    idxs = jnp.zeros((B, npoint), jnp.int32)
    dists = jnp.full((B, N), 1e10, jnp.float32)
    last = jnp.zeros((B,), jnp.int32)
    idxs, _, _ = jax.lax.fori_loop(1, npoint, body, (idxs, dists, last))
    return idxs


def gather_points(pts, idx):
    """pts: (B, N, C), idx: (B, M) -> (B, M, C)."""
    return jax.vmap(lambda p, i: p[i])(pts, idx)


def group_points(pts, idx):
    """pts: (B, N, C), idx: (B, ...) -> (B, ..., C) (row gather, any idx rank)."""
    return jax.vmap(lambda p, i: p[i])(pts, idx)


def ball_query(radius, nsample, xyz, new_xyz):
    """For each new_xyz point, first `nsample` xyz indices within radius
    (pad with the first found index). xyz: (B,N,3), new_xyz: (B,M,3) -> (B,M,nsample)."""
    B, N, _ = xyz.shape
    d2 = jnp.sum((new_xyz[:, :, None, :] - xyz[:, None, :, :]) ** 2, axis=-1)
    mask = d2 < radius * radius
    ar = jnp.broadcast_to(jnp.arange(N, dtype=jnp.int32), d2.shape)
    cand = jnp.where(mask, ar, N)
    cand = jnp.sort(cand, axis=-1)[:, :, :nsample]
    first = cand[:, :, :1]
    first = jnp.where(first == N, 0, first)
    idx = jnp.where(cand == N, first, cand)
    return idx.astype(jnp.int32)


def three_nn(unknown, known):
    """3 nearest neighbours (squared distances, as in pointnet2)."""
    d2 = jnp.sum((unknown[:, :, None, :] - known[:, None, :, :]) ** 2, axis=-1)
    neg, idx = jax.lax.top_k(-d2, 3)
    return -neg, idx.astype(jnp.int32)


def fp_module(unknown, known, unknown_feats, known_feats):
    """PointnetFPModule with mlp=[128] -> SharedMLP has no layers (identity):
    inverse-(squared)-distance interpolation + channel concat only."""
    dist2, idx = three_nn(unknown, known)
    dist_recip = 1.0 / (dist2 + 1e-8)
    norm = jnp.sum(dist_recip, axis=-1, keepdims=True)
    weight = dist_recip / norm                                       # (B, n, 3)
    kf = jax.vmap(lambda f, i: f[i])(known_feats, idx)               # (B, n, 3, C)
    interp = jnp.sum(kf * weight[..., None], axis=2)                 # (B, n, C)
    if unknown_feats is None:
        return interp
    return jnp.concatenate([interp, unknown_feats], axis=-1)


def query_group_max(radius, nsample, xyz, new_xyz, feats):
    """QueryAndGroup(use_xyz=False) + max over nsample (tiny, stays in JAX)."""
    idx = ball_query(radius, nsample, xyz, new_xyz)                  # (B, M, S)
    grouped = group_points(feats, idx)                               # (B, M, S, C)
    return jnp.max(grouped, axis=2)                                  # (B, M, C)


def pointrnn_cell(params, radius, nsample, xyz, feat, state):
    """PointRNNCell. xyz: (B,N,3) f32, feat: (B,N,Cf) f32 | None."""
    B, N, _ = xyz.shape
    w, bias = params["w"], params["b"]
    Cout = w.shape[1]
    Cf = w.shape[0] - 3 - Cout                                       # feat channels
    if state is None:
        state = (xyz, jnp.zeros((B, N, Cout), jnp.float32))
    P2, S2 = state

    idx = ball_query(radius, nsample, P2, xyz)                       # (B, N, S)
    idx_t = jnp.transpose(idx, (0, 2, 1))                            # (B, S, N) tiny
    # Gather directly into (B, S, N, C) layout -> no HBM transpose of big tensors,
    # and per-sample slices are contiguous inside the kernel.
    P2g = group_points(P2, idx_t)                                    # (B, S, N, 3) f32
    S2g = group_points(S2.astype(jnp.bfloat16), idx_t)               # (B, S, N, Cout) bf16

    # split the 1x1-conv weight by input-channel blocks [disp | X1 | S2]
    wd = w[:3]                                                       # f32 (positions)
    wx = w[3:3 + Cf].astype(jnp.bfloat16) if Cf > 0 else None
    ws = w[3 + Cf:].astype(jnp.bfloat16)
    feat_bf = feat.astype(jnp.bfloat16) if feat is not None else None

    S1 = cell_conv_max(P2g, S2g, xyz, feat_bf, wd, wx, ws, bias)     # Pallas kernel
    return (xyz, S1)


# ----------------------------------------------------------------------------
# Parameters
# ----------------------------------------------------------------------------
def _linear(key, cin, cout):
    kw, kb = jax.random.split(key)
    scale = cin ** -0.5
    return {
        "w": jax.random.normal(kw, (cin, cout), jnp.float32) * scale,
        "b": jax.random.normal(kb, (cout,), jnp.float32) * 0.01,
    }


def init_params(key):
    ks = jax.random.split(key, 8)
    return {
        "en1": _linear(ks[0], 3 + 0 + 64, 64),
        "en2": _linear(ks[1], 3 + 64 + 128, 128),
        "en3": _linear(ks[2], 3 + 128 + 256, 256),
        "de1": _linear(ks[3], 3 + 0 + 64, 64),
        "de2": _linear(ks[4], 3 + 64 + 128, 128),
        "de3": _linear(ks[5], 3 + 128 + 256, 256),
        "mlp1": _linear(ks[6], 448, 64),
        "mlp2": _linear(ks[7], 64, 3),
    }


# ----------------------------------------------------------------------------
# Full PointRNN forward
# ----------------------------------------------------------------------------
@functools.partial(jax.jit, static_argnames=("radius", "num_samples", "subsampling"))
def point_rnn_forward(params, xyzs, radius=4.0, num_samples=4, subsampling=2):
    B, L, N, _ = xyzs.shape
    frames = [xyzs[:, t] for t in range(L)]

    r1 = 1.0 * radius + 1e-6
    r2 = 2.0 * radius + 1e-6
    r3 = 3.0 * radius + 1e-6
    rg2 = 2.0 * radius / 4.0 + 1e-6
    rg3 = 4.0 * radius / 4.0 + 1e-6
    ns1, ns2, ns3 = 3 * num_samples, 2 * num_samples, 1 * num_samples
    n1 = N // subsampling
    n2 = n1 // subsampling
    n3 = n2 // subsampling

    def step(frame, names, states1, states2, states3):
        c1, c2, c3 = names
        idx1 = furthest_point_sample(frame, n1)
        xyz1 = gather_points(frame, idx1)
        states1 = pointrnn_cell(params[c1], r1, ns1, xyz1, None, states1)
        s_xyz1, s_feat1 = states1

        idx2 = furthest_point_sample(s_xyz1, n2)
        xyz2 = gather_points(s_xyz1, idx2)
        feat2 = query_group_max(rg2, num_samples, s_xyz1, xyz2, s_feat1)
        states2 = pointrnn_cell(params[c2], r2, ns2, xyz2, feat2, states2)
        s_xyz2, s_feat2 = states2

        idx3 = furthest_point_sample(s_xyz2, n3)
        xyz3 = gather_points(s_xyz2, idx3)
        feat3 = query_group_max(rg3, num_samples, s_xyz2, xyz3, s_feat2)
        states3 = pointrnn_cell(params[c3], r3, ns3, xyz3, feat3, states3)
        return states1, states2, states3

    states1 = states2 = states3 = None
    for t in range(L // 2):
        states1, states2, states3 = step(
            frames[t], ("en1", "en2", "en3"), states1, states2, states3)

    predicted_frames = []
    input_frame = frames[L // 2 - 1]
    for t in range(L // 2, L):
        states1, states2, states3 = step(
            input_frame, ("de1", "de2", "de3"), states1, states2, states3)
        s_xyz1, s_feat1 = states1
        s_xyz2, s_feat2 = states2
        s_xyz3, s_feat3 = states3

        l3_feat = fp_module(s_xyz2, s_xyz3, s_feat2, s_feat3)        # (B, n2, 384)
        l2_feat = fp_module(s_xyz1, s_xyz2, s_feat1, l3_feat)        # (B, n1, 448)
        l1_feat = fp_module(input_frame, s_xyz1, None, l2_feat)      # (B, N, 448)

        motion = mlp_head(l1_feat, params["mlp1"], params["mlp2"])   # Pallas kernel
        input_frame = input_frame + motion
        predicted_frames.append(input_frame)

    return jnp.stack(predicted_frames, axis=1)                       # (B, L//2, N, 3)


# ----------------------------------------------------------------------------
if __name__ == "__main__":
    key = jax.random.PRNGKey(0)
    k_param, k_data = jax.random.split(key)

    B, L, N = 2, 4, 32   # point sequence: (batch, seq, num_points, 3)
    params = init_params(k_param)
    xyzs = jax.random.uniform(k_data, (B, L, N, 3), jnp.float32)

    out = point_rnn_forward(params, xyzs)
    out = jax.block_until_ready(out)
    assert out.shape == (B, L // 2, N, 3), out.shape
    assert bool(jnp.all(jnp.isfinite(out)))
    print("KERNEL_OK")
</pallas_src>

<mosaic_0001>
module attributes {stable_mosaic.version = 11 : i64} {
  func.func @kernel(%arg0: i32, %arg1: i32, %arg2: memref<1x12x16x3xf32, #tpu.memory_space<vmem>>, %arg3: memref<1x12x16x64xbf16, #tpu.memory_space<vmem>>, %arg4: memref<1x16x3xf32, #tpu.memory_space<vmem>>, %arg5: memref<3x64xf32, #tpu.memory_space<vmem>>, %arg6: memref<64x64xbf16, #tpu.memory_space<vmem>>, %arg7: memref<1x64xf32, #tpu.memory_space<vmem>>, %arg8: memref<1x16x64xf32, #tpu.memory_space<vmem>>, %arg9: memref<16x64xf32, #tpu.memory_space<vmem>>) attributes {dimension_semantics = [#tpu.dimension_semantics<parallel>, #tpu.dimension_semantics<parallel>], iteration_bounds = array<i64: 2, 1>, scalar_prefetch = 0 : i64, scratch_operands = 1 : i64, tpu.core_type = #tpu.core_type<tc>, window_params = [{transform_indices = @transform_0, window_bounds = array<i64: 1, 12, 16, 3>}, {transform_indices = @transform_1, window_bounds = array<i64: 1, 12, 16, 64>}, {transform_indices = @transform_2, window_bounds = array<i64: 1, 16, 3>}, {pipeline_mode = #tpu.pipeline_mode<synchronous>, transform_indices = @transform_3, window_bounds = array<i64: 3, 64>}, {pipeline_mode = #tpu.pipeline_mode<synchronous>, transform_indices = @transform_4, window_bounds = array<i64: 64, 64>}, {pipeline_mode = #tpu.pipeline_mode<synchronous>, transform_indices = @transform_5, window_bounds = array<i64: 1, 64>}, {transform_indices = @transform_6, window_bounds = array<i64: 1, 16, 64>}]} {
    %c0 = arith.constant 0 : index
    %c0_0 = arith.constant 0 : index
    %c0_1 = arith.constant 0 : index
    %0 = vector.load %arg4[%c0, %c0_0, %c0_1] : memref<1x16x3xf32, #tpu.memory_space<vmem>>, vector<1x16x3xf32>
    %1 = vector.shape_cast %0 : vector<1x16x3xf32> to vector<16x3xf32>
    %c0_2 = arith.constant 0 : index
    %c0_3 = arith.constant 0 : index
    %2 = vector.load %arg5[%c0_2, %c0_3] : memref<3x64xf32, #tpu.memory_space<vmem>>, vector<3x64xf32>
    %c0_4 = arith.constant 0 : index
    %c0_5 = arith.constant 0 : index
    %3 = vector.load %arg6[%c0_4, %c0_5] : memref<64x64xbf16, #tpu.memory_space<vmem>>, vector<64x64xbf16>
    %c0_6 = arith.constant 0 : index
    %c0_7 = arith.constant 0 : index
    %c0_8 = arith.constant 0 : index
    %c0_9 = arith.constant 0 : index
    %4 = vector.load %arg2[%c0_6, %c0_7, %c0_8, %c0_9] : memref<1x12x16x3xf32, #tpu.memory_space<vmem>>, vector<1x1x16x3xf32>
    %5 = vector.shape_cast %4 : vector<1x1x16x3xf32> to vector<16x3xf32>
    %6 = arith.subf %5, %1 : vector<16x3xf32>
    %cst = arith.constant dense<0.000000e+00> : vector<16x64xf32>
    %7 = tpu.matmul %6, %2, %cst {dimension_numbers = #tpu.dot_dimension_numbers<[1], [0], [0], [1], [0, 0, 1, 1], [], []>} : vector<16x3xf32>, vector<3x64xf32>, vector<16x64xf32> -> vector<16x64xf32>
    %c0_10 = arith.constant 0 : index
    %c0_11 = arith.constant 0 : index
    %c0_12 = arith.constant 0 : index
    %c0_13 = arith.constant 0 : index
    %8 = vector.load %arg3[%c0_10, %c0_11, %c0_12, %c0_13] : memref<1x12x16x64xbf16, #tpu.memory_space<vmem>>, vector<1x1x16x64xbf16>
    %9 = vector.shape_cast %8 : vector<1x1x16x64xbf16> to vector<16x64xbf16>
    %cst_14 = arith.constant dense<0.000000e+00> : vector<16x64xf32>
    %10 = tpu.matmul %9, %3, %cst_14 {dimension_numbers = #tpu.dot_dimension_numbers<[1], [0], [0], [1], [0, 0, 1, 1], [], []>} : vector<16x64xbf16>, vector<64x64xbf16>, vector<16x64xf32> -> vector<16x64xf32>
    %11 = arith.addf %7, %10 : vector<16x64xf32>
    %c0_15 = arith.constant 0 : index
    %c0_16 = arith.constant 0 : index
    %12 = vector.load %arg9[%c0_15, %c0_16] : memref<16x64xf32, #tpu.memory_space<vmem>>, vector<16x64xf32>
    tpu.vector_store %arg9[%c0_15, %c0_16], %11 {strides = array<i32>} : memref<16x64xf32, #tpu.memory_space<vmem>>, vector<16x64xf32>,
    %c0_17 = arith.constant 0 : index
    %c1 = arith.constant 1 : index
    %c0_18 = arith.constant 0 : index
    %c0_19 = arith.constant 0 : index
    %13 = vector.load %arg2[%c0_17, %c1, %c0_18, %c0_19] : memref<1x12x16x3xf32, #tpu.memory_space<vmem>>, vector<1x1x16x3xf32>
    %14 = vector.shape_cast %13 : vector<1x1x16x3xf32> to vector<16x3xf32>
    %15 = arith.subf %14, %1 : vector<16x3xf32>
    %cst_20 = arith.constant dense<0.000000e+00> : vector<16x64xf32>
    %16 = tpu.matmul %15, %2, %cst_20 {dimension_numbers = #tpu.dot_dimension_numbers<[1], [0], [0], [1], [0, 0, 1, 1], [], []>} : vector<16x3xf32>, vector<3x64xf32>, vector<16x64xf32> -> vector<16x64xf32>
    %c0_21 = arith.constant 0 : index
    %c1_22 = arith.constant 1 : index
    %c0_23 = arith.constant 0 : index
    %c0_24 = arith.constant 0 : index
    %17 = vector.load %arg3[%c0_21, %c1_22, %c0_23, %c0_24] : memref<1x12x16x64xbf16, #tpu.memory_space<vmem>>, vector<1x1x16x64xbf16>
    %18 = vector.shape_cast %17 : vector<1x1x16x64xbf16> to vector<16x64xbf16>
    %cst_25 = arith.constant dense<0.000000e+00> : vector<16x64xf32>
    %19 = tpu.matmul %18, %3, %cst_25 {dimension_numbers = #tpu.dot_dimension_numbers<[1], [0], [0], [1], [0, 0, 1, 1], [], []>} : vector<16x64xbf16>, vector<64x64xbf16>, vector<16x64xf32> -> vector<16x64xf32>
    %20 = arith.addf %16, %19 : vector<16x64xf32>
    %c0_26 = arith.constant 0 : index
    %c0_27 = arith.constant 0 : index
    %21 = vector.load %arg9[%c0_26, %c0_27] : memref<16x64xf32, #tpu.memory_space<vmem>>, vector<16x64xf32>
    %22 = arith.maximumf %21, %20 : vector<16x64xf32>
    %c0_28 = arith.constant 0 : index
    %c0_29 = arith.constant 0 : index
    %23 = vector.load %arg9[%c0_28, %c0_29] : memref<16x64xf32, #tpu.memory_space<vmem>>, vector<16x64xf32>
    tpu.vector_store %arg9[%c0_28, %c0_29], %22 {strides = array<i32>} : memref<16x64xf32, #tpu.memory_space<vmem>>, vector<16x64xf32>,
    %c0_30 = arith.constant 0 : index
    %c2 = arith.constant 2 : index
    %c0_31 = arith.constant 0 : index
    %c0_32 = arith.constant 0 : index
    %24 = vector.load %arg2[%c0_30, %c2, %c0_31, %c0_32] : memref<1x12x16x3xf32, #tpu.memory_space<vmem>>, vector<1x1x16x3xf32>
    %25 = vector.shape_cast %24 : vector<1x1x16x3xf32> to vector<16x3xf32>
    %26 = arith.subf %25, %1 : vector<16x3xf32>
    %cst_33 = arith.constant dense<0.000000e+00> : vector<16x64xf32>
    %27 = tpu.matmul %26, %2, %cst_33 {dimension_numbers = #tpu.dot_dimension_numbers<[1], [0], [0], [1], [0, 0, 1, 1], [], []>} : vector<16x3xf32>, vector<3x64xf32>, vector<16x64xf32> -> vector<16x64xf32>
    %c0_34 = arith.constant 0 : index
    %c2_35 = arith.constant 2 : index
    %c0_36 = arith.constant 0 : index
    %c0_37 = arith.constant 0 : index
    %28 = vector.load %arg3[%c0_34, %c2_35, %c0_36, %c0_37] : memref<1x12x16x64xbf16, #tpu.memory_space<vmem>>, vector<1x1x16x64xbf16>
    %29 = vector.shape_cast %28 : vector<1x1x16x64xbf16> to vector<16x64xbf16>
    %cst_38 = arith.constant dense<0.000000e+00> : vector<16x64xf32>
    %30 = tpu.matmul %29, %3, %cst_38 {dimension_numbers = #tpu.dot_dimension_numbers<[1], [0], [0], [1], [0, 0, 1, 1], [], []>} : vector<16x64xbf16>, vector<64x64xbf16>, vector<16x64xf32> -> vector<16x64xf32>
    %31 = arith.addf %27, %30 : vector<16x64xf32>
    %c0_39 = arith.constant 0 : index
    %c0_40 = arith.constant 0 : index
    %32 = vector.load %arg9[%c0_39, %c0_40] : memref<16x64xf32, #tpu.memory_space<vmem>>, vector<16x64xf32>
    %33 = arith.maximumf %32, %31 : vector<16x64xf32>
    %c0_41 = arith.constant 0 : index
    %c0_42 = arith.constant 0 : index
    %34 = vector.load %arg9[%c0_41, %c0_42] : memref<16x64xf32, #tpu.memory_space<vmem>>, vector<16x64xf32>
    tpu.vector_store %arg9[%c0_41, %c0_42], %33 {strides = array<i32>} : memref<16x64xf32, #tpu.memory_space<vmem>>, vector<16x64xf32>,
    %c0_43 = arith.constant 0 : index
    %c3 = arith.constant 3 : index
    %c0_44 = arith.constant 0 : index
    %c0_45 = arith.constant 0 : index
    %35 = vector.load %arg2[%c0_43, %c3, %c0_44, %c0_45] : memref<1x12x16x3xf32, #tpu.memory_space<vmem>>, vector<1x1x16x3xf32>
    %36 = vector.shape_cast %35 : vector<1x1x16x3xf32> to vector<16x3xf32>
    %37 = arith.subf %36, %1 : vector<16x3xf32>
    %cst_46 = arith.constant dense<0.000000e+00> : vector<16x64xf32>
    %38 = tpu.matmul %37, %2, %cst_46 {dimension_numbers = #tpu.dot_dimension_numbers<[1], [0], [0], [1], [0, 0, 1, 1], [], []>} : vector<16x3xf32>, vector<3x64xf32>, vector<16x64xf32> -> vector<16x64xf32>
    %c0_47 = arith.constant 0 : index
    %c3_48 = arith.constant 3 : index
    %c0_49 = arith.constant 0 : index
    %c0_50 = arith.constant 0 : index
    %39 = vector.load %arg3[%c0_47, %c3_48, %c0_49, %c0_50] : memref<1x12x16x64xbf16, #tpu.memory_space<vmem>>, vector<1x1x16x64xbf16>
    %40 = vector.shape_cast %39 : vector<1x1x16x64xbf16> to vector<16x64xbf16>
    %cst_51 = arith.constant dense<0.000000e+00> : vector<16x64xf32>
    %41 = tpu.matmul %40, %3, %cst_51 {dimension_numbers = #tpu.dot_dimension_numbers<[1], [0], [0], [1], [0, 0, 1, 1], [], []>} : vector<16x64xbf16>, vector<64x64xbf16>, vector<16x64xf32> -> vector<16x64xf32>
    %42 = arith.addf %38, %41 : vector<16x64xf32>
    %c0_52 = arith.constant 0 : index
    %c0_53 = arith.constant 0 : index
    %43 = vector.load %arg9[%c0_52, %c0_53] : memref<16x64xf32, #tpu.memory_space<vmem>>, vector<16x64xf32>
    %44 = arith.maximumf %43, %42 : vector<16x64xf32>
    %c0_54 = arith.constant 0 : index
    %c0_55 = arith.constant 0 : index
    %45 = vector.load %arg9[%c0_54, %c0_55] : memref<16x64xf32, #tpu.memory_space<vmem>>, vector<16x64xf32>
    tpu.vector_store %arg9[%c0_54, %c0_55], %44 {strides = array<i32>} : memref<16x64xf32, #tpu.memory_space<vmem>>, vector<16x64xf32>,
    %c0_56 = arith.constant 0 : index
    %c4 = arith.constant 4 : index
    %c0_57 = arith.constant 0 : index
    %c0_58 = arith.constant 0 : index
    %46 = vector.load %arg2[%c0_56, %c4, %c0_57, %c0_58] : memref<1x12x16x3xf32, #tpu.memory_space<vmem>>, vector<1x1x16x3xf32>
    %47 = vector.shape_cast %46 : vector<1x1x16x3xf32> to vector<16x3xf32>
    %48 = arith.subf %47, %1 : vector<16x3xf32>
    %cst_59 = arith.constant dense<0.000000e+00> : vector<16x64xf32>
    %49 = tpu.matmul %48, %2, %cst_59 {dimension_numbers = #tpu.dot_dimension_numbers<[1], [0], [0], [1], [0, 0, 1, 1], [], []>} : vector<16x3xf32>, vector<3x64xf32>, vector<16x64xf32> -> vector<16x64xf32>
    %c0_60 = arith.constant 0 : index
    %c4_61 = arith.constant 4 : index
    %c0_62 = arith.constant 0 : index
    %c0_63 = arith.constant 0 : index
    %50 = vector.load %arg3[%c0_60, %c4_61, %c0_62, %c0_63] : memref<1x12x16x64xbf16, #tpu.memory_space<vmem>>, vector<1x1x16x64xbf16>
    %51 = vector.shape_cast %50 : vector<1x1x16x64xbf16> to vector<16x64xbf16>
    %cst_64 = arith.constant dense<0.000000e+00> : vector<16x64xf32>
    %52 = tpu.matmul %51, %3, %cst_64 {dimension_numbers = #tpu.dot_dimension_numbers<[1], [0], [0], [1], [0, 0, 1, 1], [], []>} : vector<16x64xbf16>, vector<64x64xbf16>, vector<16x64xf32> -> vector<16x64xf32>
    %53 = arith.addf %49, %52 : vector<16x64xf32>
    %c0_65 = arith.constant 0 : index
    %c0_66 = arith.constant 0 : index
    %54 = vector.load %arg9[%c0_65, %c0_66] : memref<16x64xf32, #tpu.memory_space<vmem>>, vector<16x64xf32>
    %55 = arith.maximumf %54, %53 : vector<16x64xf32>
    %c0_67 = arith.constant 0 : index
    %c0_68 = arith.constant 0 : index
    %56 = vector.load %arg9[%c0_67, %c0_68] : memref<16x64xf32, #tpu.memory_space<vmem>>, vector<16x64xf32>
    tpu.vector_store %arg9[%c0_67, %c0_68], %55 {strides = array<i32>} : memref<16x64xf32, #tpu.memory_space<vmem>>, vector<16x64xf32>,
    %c0_69 = arith.constant 0 : index
    %c5 = arith.constant 5 : index
    %c0_70 = arith.constant 0 : index
    %c0_71 = arith.constant 0 : index
    %57 = vector.load %arg2[%c0_69, %c5, %c0_70, %c0_71] : memref<1x12x16x3xf32, #tpu.memory_space<vmem>>, vector<1x1x16x3xf32>
    %58 = vector.shape_cast %57 : vector<1x1x16x3xf32> to vector<16x3xf32>
    %59 = arith.subf %58, %1 : vector<16x3xf32>
    %cst_72 = arith.constant dense<0.000000e+00> : vector<16x64xf32>
    %60 = tpu.matmul %59, %2, %cst_72 {dimension_numbers = #tpu.dot_dimension_numbers<[1], [0], [0], [1], [0, 0, 1, 1], [], []>} : vector<16x3xf32>, vector<3x64xf32>, vector<16x64xf32> -> vector<16x64xf32>
    %c0_73 = arith.constant 0 : index
    %c5_74 = arith.constant 5 : index
    %c0_75 = arith.constant 0 : index
    %c0_76 = arith.constant 0 : index
    %61 = vector.load %arg3[%c0_73, %c5_74, %c0_75, %c0_76] : memref<1x12x16x64xbf16, #tpu.memory_space<vmem>>, vector<1x1x16x64xbf16>
    %62 = vector.shape_cast %61 : vector<1x1x16x64xbf16> to vector<16x64xbf16>
    %cst_77 = arith.constant dense<0.000000e+00> : vector<16x64xf32>
    %63 = tpu.matmul %62, %3, %cst_77 {dimension_numbers = #tpu.dot_dimension_numbers<[1], [0], [0], [1], [0, 0, 1, 1], [], []>} : vector<16x64xbf16>, vector<64x64xbf16>, vector<16x64xf32> -> vector<16x64xf32>
    %64 = arith.addf %60, %63 : vector<16x64xf32>
    %c0_78 = arith.constant 0 : index
    %c0_79 = arith.constant 0 : index
    %65 = vector.load %arg9[%c0_78, %c0_79] : memref<16x64xf32, #tpu.memory_space<vmem>>, vector<16x64xf32>
    %66 = arith.maximumf %65, %64 : vector<16x64xf32>
    %c0_80 = arith.constant 0 : index
    %c0_81 = arith.constant 0 : index
    %67 = vector.load %arg9[%c0_80, %c0_81] : memref<16x64xf32, #tpu.memory_space<vmem>>, vector<16x64xf32>
    tpu.vector_store %arg9[%c0_80, %c0_81], %66 {strides = array<i32>} : memref<16x64xf32, #tpu.memory_space<vmem>>, vector<16x64xf32>,
    %c0_82 = arith.constant 0 : index
    %c6 = arith.constant 6 : index
    %c0_83 = arith.constant 0 : index
    %c0_84 = arith.constant 0 : index
    %68 = vector.load %arg2[%c0_82, %c6, %c0_83, %c0_84] : memref<1x12x16x3xf32, #tpu.memory_space<vmem>>, vector<1x1x16x3xf32>
    %69 = vector.shape_cast %68 : vector<1x1x16x3xf32> to vector<16x3xf32>
    %70 = arith.subf %69, %1 : vector<16x3xf32>
    %cst_85 = arith.constant dense<0.000000e+00> : vector<16x64xf32>
    %71 = tpu.matmul %70, %2, %cst_85 {dimension_numbers = #tpu.dot_dimension_numbers<[1], [0], [0], [1], [0, 0, 1, 1], [], []>} : vector<16x3xf32>, vector<3x64xf32>, vector<16x64xf32> -> vector<16x64xf32>
    %c0_86 = arith.constant 0 : index
    %c6_87 = arith.constant 6 : index
    %c0_88 = arith.constant 0 : index
    %c0_89 = arith.constant 0 : index
    %72 = vector.load %arg3[%c0_86, %c6_87, %c0_88, %c0_89] : memref<1x12x16x64xbf16, #tpu.memory_space<vmem>>, vector<1x1x16x64xbf16>
    %73 = vector.shape_cast %72 : vector<1x1x16x64xbf16> to vector<16x64xbf16>
    %cst_90 = arith.constant dense<0.000000e+00> : vector<16x64xf32>
    %74 = tpu.matmul %73, %3, %cst_90 {dimension_numbers = #tpu.dot_dimension_numbers<[1], [0], [0], [1], [0, 0, 1, 1], [], []>} : vector<16x64xbf16>, vector<64x64xbf16>, vector<16x64xf32> -> vector<16x64xf32>
    %75 = arith.addf %71, %74 : vector<16x64xf32>
    %c0_91 = arith.constant 0 : index
    %c0_92 = arith.constant 0 : index
    %76 = vector.load %arg9[%c0_91, %c0_92] : memref<16x64xf32, #tpu.memory_space<vmem>>, vector<16x64xf32>
    %77 = arith.maximumf %76, %75 : vector<16x64xf32>
    %c0_93 = arith.constant 0 : index
    %c0_94 = arith.constant 0 : index
    %78 = vector.load %arg9[%c0_93, %c0_94] : memref<16x64xf32, #tpu.memory_space<vmem>>, vector<16x64xf32>
    tpu.vector_store %arg9[%c0_93, %c0_94], %77 {strides = array<i32>} : memref<16x64xf32, #tpu.memory_space<vmem>>, vector<16x64xf32>,
    %c0_95 = arith.constant 0 : index
    %c7 = arith.constant 7 : index
    %c0_96 = arith.constant 0 : index
    %c0_97 = arith.constant 0 : index
    %79 = vector.load %arg2[%c0_95, %c7, %c0_96, %c0_97] : memref<1x12x16x3xf32, #tpu.memory_space<vmem>>, vector<1x1x16x3xf32>
    %80 = vector.shape_cast %79 : vector<1x1x16x3xf32> to vector<16x3xf32>
    %81 = arith.subf %80, %1 : vector<16x3xf32>
    %cst_98 = arith.constant dense<0.000000e+00> : vector<16x64xf32>
    %82 = tpu.matmul %81, %2, %cst_98 {dimension_numbers = #tpu.dot_dimension_numbers<[1], [0], [0], [1], [0, 0, 1, 1], [], []>} : vector<16x3xf32>, vector<3x64xf32>, vector<16x64xf32> -> vector<16x64xf32>
    %c0_99 = arith.constant 0 : index
    %c7_100 = arith.constant 7 : index
    %c0_101 = arith.constant 0 : index
    %c0_102 = arith.constant 0 : index
    %83 = vector.load %arg3[%c0_99, %c7_100, %c0_101, %c0_102] : memref<1x12x16x64xbf16, #tpu.memory_space<vmem>>, vector<1x1x16x64xbf16>
    %84 = vector.shape_cast %83 : vector<1x1x16x64xbf16> to vector<16x64xbf16>
    %cst_103 = arith.constant dense<0.000000e+00> : vector<16x64xf32>
    %85 = tpu.matmul %84, %3, %cst_103 {dimension_numbers = #tpu.dot_dimension_numbers<[1], [0], [0], [1], [0, 0, 1, 1], [], []>} : vector<16x64xbf16>, vector<64x64xbf16>, vector<16x64xf32> -> vector<16x64xf32>
    %86 = arith.addf %82, %85 : vector<16x64xf32>
    %c0_104 = arith.constant 0 : index
    %c0_105 = arith.constant 0 : index
    %87 = vector.load %arg9[%c0_104, %c0_105] : memref<16x64xf32, #tpu.memory_space<vmem>>, vector<16x64xf32>
    %88 = arith.maximumf %87, %86 : vector<16x64xf32>
    %c0_106 = arith.constant 0 : index
    %c0_107 = arith.constant 0 : index
    %89 = vector.load %arg9[%c0_106, %c0_107] : memref<16x64xf32, #tpu.memory_space<vmem>>, vector<16x64xf32>
    tpu.vector_store %arg9[%c0_106, %c0_107], %88 {strides = array<i32>} : memref<16x64xf32, #tpu.memory_space<vmem>>, vector<16x64xf32>,
    %c0_108 = arith.constant 0 : index
    %c8 = arith.constant 8 : index
    %c0_109 = arith.constant 0 : index
    %c0_110 = arith.constant 0 : index
    %90 = vector.load %arg2[%c0_108, %c8, %c0_109, %c0_110] : memref<1x12x16x3xf32, #tpu.memory_space<vmem>>, vector<1x1x16x3xf32>
    %91 = vector.shape_cast %90 : vector<1x1x16x3xf32> to vector<16x3xf32>
    %92 = arith.subf %91, %1 : vector<16x3xf32>
    %cst_111 = arith.constant dense<0.000000e+00> : vector<16x64xf32>
    %93 = tpu.matmul %92, %2, %cst_111 {dimension_numbers = #tpu.dot_dimension_numbers<[1], [0], [0], [1], [0, 0, 1, 1], [], []>} : vector<16x3xf32>, vector<3x64xf32>, vector<16x64xf32> -> vector<16x64xf32>
    %c0_112 = arith.constant 0 : index
    %c8_113 = arith.constant 8 : index
    %c0_114 = arith.constant 0 : index
    %c0_115 = arith.constant 0 : index
    %94 = vector.load %arg3[%c0_112, %c8_113, %c0_114, %c0_115] : memref<1x12x16x64xbf16, #tpu.memory_space<vmem>>, vector<1x1x16x64xbf16>
    %95 = vector.shape_cast %94 : vector<1x1x16x64xbf16> to vector<16x64xbf16>
    %cst_116 = arith.constant dense<0.000000e+00> : vector<16x64xf32>
    %96 = tpu.matmul %95, %3, %cst_116 {dimension_numbers = #tpu.dot_dimension_numbers<[1], [0], [0], [1], [0, 0, 1, 1], [], []>} : vector<16x64xbf16>, vector<64x64xbf16>, vector<16x64xf32> -> vector<16x64xf32>
    %97 = arith.addf %93, %96 : vector<16x64xf32>
    %c0_117 = arith.constant 0 : index
    %c0_118 = arith.constant 0 : index
    %98 = vector.load %arg9[%c0_117, %c0_118] : memref<16x64xf32, #tpu.memory_space<vmem>>, vector<16x64xf32>
    %99 = arith.maximumf %98, %97 : vector<16x64xf32>
    %c0_119 = arith.constant 0 : index
    %c0_120 = arith.constant 0 : index
    %100 = vector.load %arg9[%c0_119, %c0_120] : memref<16x64xf32, #tpu.memory_space<vmem>>, vector<16x64xf32>
    tpu.vector_store %arg9[%c0_119, %c0_120], %99 {strides = array<i32>} : memref<16x64xf32, #tpu.memory_space<vmem>>, vector<16x64xf32>,
    %c0_121 = arith.constant 0 : index
    %c9 = arith.constant 9 : index
    %c0_122 = arith.constant 0 : index
    %c0_123 = arith.constant 0 : index
    %101 = vector.load %arg2[%c0_121, %c9, %c0_122, %c0_123] : memref<1x12x16x3xf32, #tpu.memory_space<vmem>>, vector<1x1x16x3xf32>
    %102 = vector.shape_cast %101 : vector<1x1x16x3xf32> to vector<16x3xf32>
    %103 = arith.subf %102, %1 : vector<16x3xf32>
    %cst_124 = arith.constant dense<0.000000e+00> : vector<16x64xf32>
    %104 = tpu.matmul %103, %2, %cst_124 {dimension_numbers = #tpu.dot_dimension_numbers<[1], [0], [0], [1], [0, 0, 1, 1], [], []>} : vector<16x3xf32>, vector<3x64xf32>, vector<16x64xf32> -> vector<16x64xf32>
    %c0_125 = arith.constant 0 : index
    %c9_126 = arith.constant 9 : index
    %c0_127 = arith.constant 0 : index
    %c0_128 = arith.constant 0 : index
    %105 = vector.load %arg3[%c0_125, %c9_126, %c0_127, %c0_128] : memref<1x12x16x64xbf16, #tpu.memory_space<vmem>>, vector<1x1x16x64xbf16>
    %106 = vector.shape_cast %105 : vector<1x1x16x64xbf16> to vector<16x64xbf16>
    %cst_129 = arith.constant dense<0.000000e+00> : vector<16x64xf32>
    %107 = tpu.matmul %106, %3, %cst_129 {dimension_numbers = #tpu.dot_dimension_numbers<[1], [0], [0], [1], [0, 0, 1, 1], [], []>} : vector<16x64xbf16>, vector<64x64xbf16>, vector<16x64xf32> -> vector<16x64xf32>
    %108 = arith.addf %104, %107 : vector<16x64xf32>
    %c0_130 = arith.constant 0 : index
    %c0_131 = arith.constant 0 : index
    %109 = vector.load %arg9[%c0_130, %c0_131] : memref<16x64xf32, #tpu.memory_space<vmem>>, vector<16x64xf32>
    %110 = arith.maximumf %109, %108 : vector<16x64xf32>
    %c0_132 = arith.constant 0 : index
    %c0_133 = arith.constant 0 : index
    %111 = vector.load %arg9[%c0_132, %c0_133] : memref<16x64xf32, #tpu.memory_space<vmem>>, vector<16x64xf32>
    tpu.vector_store %arg9[%c0_132, %c0_133], %110 {strides = array<i32>} : memref<16x64xf32, #tpu.memory_space<vmem>>, vector<16x64xf32>,
    %c0_134 = arith.constant 0 : index
    %c10 = arith.constant 10 : index
    %c0_135 = arith.constant 0 : index
    %c0_136 = arith.constant 0 : index
    %112 = vector.load %arg2[%c0_134, %c10, %c0_135, %c0_136] : memref<1x12x16x3xf32, #tpu.memory_space<vmem>>, vector<1x1x16x3xf32>
    %113 = vector.shape_cast %112 : vector<1x1x16x3xf32> to vector<16x3xf32>
    %114 = arith.subf %113, %1 : vector<16x3xf32>
    %cst_137 = arith.constant dense<0.000000e+00> : vector<16x64xf32>
    %115 = tpu.matmul %114, %2, %cst_137 {dimension_numbers = #tpu.dot_dimension_numbers<[1], [0], [0], [1], [0, 0, 1, 1], [], []>} : vector<16x3xf32>, vector<3x64xf32>, vector<16x64xf32> -> vector<16x64xf32>
    %c0_138 = arith.constant 0 : index
    %c10_139 = arith.constant 10 : index
    %c0_140 = arith.constant 0 : index
    %c0_141 = arith.constant 0 : index
    %116 = vector.load %arg3[%c0_138, %c10_139, %c0_140, %c0_141] : memref<1x12x16x64xbf16, #tpu.memory_space<vmem>>, vector<1x1x16x64xbf16>
    %117 = vector.shape_cast %116 : vector<1x1x16x64xbf16> to vector<16x64xbf16>
    %cst_142 = arith.constant dense<0.000000e+00> : vector<16x64xf32>
    %118 = tpu.matmul %117, %3, %cst_142 {dimension_numbers = #tpu.dot_dimension_numbers<[1], [0], [0], [1], [0, 0, 1, 1], [], []>} : vector<16x64xbf16>, vector<64x64xbf16>, vector<16x64xf32> -> vector<16x64xf32>
    %119 = arith.addf %115, %118 : vector<16x64xf32>
    %c0_143 = arith.constant 0 : index
    %c0_144 = arith.constant 0 : index
    %120 = vector.load %arg9[%c0_143, %c0_144] : memref<16x64xf32, #tpu.memory_space<vmem>>, vector<16x64xf32>
    %121 = arith.maximumf %120, %119 : vector<16x64xf32>
    %c0_145 = arith.constant 0 : index
    %c0_146 = arith.constant 0 : index
    %122 = vector.load %arg9[%c0_145, %c0_146] : memref<16x64xf32, #tpu.memory_space<vmem>>, vector<16x64xf32>
    tpu.vector_store %arg9[%c0_145, %c0_146], %121 {strides = array<i32>} : memref<16x64xf32, #tpu.memory_space<vmem>>, vector<16x64xf32>,
    %c0_147 = arith.constant 0 : index
    %c11 = arith.constant 11 : index
    %c0_148 = arith.constant 0 : index
    %c0_149 = arith.constant 0 : index
    %123 = vector.load %arg2[%c0_147, %c11, %c0_148, %c0_149] : memref<1x12x16x3xf32, #tpu.memory_space<vmem>>, vector<1x1x16x3xf32>
    %124 = vector.shape_cast %123 : vector<1x1x16x3xf32> to vector<16x3xf32>
    %125 = arith.subf %124, %1 : vector<16x3xf32>
    %cst_150 = arith.constant dense<0.000000e+00> : vector<16x64xf32>
    %126 = tpu.matmul %125, %2, %cst_150 {dimension_numbers = #tpu.dot_dimension_numbers<[1], [0], [0], [1], [0, 0, 1, 1], [], []>} : vector<16x3xf32>, vector<3x64xf32>, vector<16x64xf32> -> vector<16x64xf32>
    %c0_151 = arith.constant 0 : index
    %c11_152 = arith.constant 11 : index
    %c0_153 = arith.constant 0 : index
    %c0_154 = arith.constant 0 : index
    %127 = vector.load %arg3[%c0_151, %c11_152, %c0_153, %c0_154] : memref<1x12x16x64xbf16, #tpu.memory_space<vmem>>, vector<1x1x16x64xbf16>
    %128 = vector.shape_cast %127 : vector<1x1x16x64xbf16> to vector<16x64xbf16>
    %cst_155 = arith.constant dense<0.000000e+00> : vector<16x64xf32>
    %129 = tpu.matmul %128, %3, %cst_155 {dimension_numbers = #tpu.dot_dimension_numbers<[1], [0], [0], [1], [0, 0, 1, 1], [], []>} : vector<16x64xbf16>, vector<64x64xbf16>, vector<16x64xf32> -> vector<16x64xf32>
    %130 = arith.addf %126, %129 : vector<16x64xf32>
    %c0_156 = arith.constant 0 : index
    %c0_157 = arith.constant 0 : index
    %131 = vector.load %arg9[%c0_156, %c0_157] : memref<16x64xf32, #tpu.memory_space<vmem>>, vector<16x64xf32>
    %132 = arith.maximumf %131, %130 : vector<16x64xf32>
    %c0_158 = arith.constant 0 : index
    %c0_159 = arith.constant 0 : index
    %133 = vector.load %arg9[%c0_158, %c0_159] : memref<16x64xf32, #tpu.memory_space<vmem>>, vector<16x64xf32>
    tpu.vector_store %arg9[%c0_158, %c0_159], %132 {strides = array<i32>} : memref<16x64xf32, #tpu.memory_space<vmem>>, vector<16x64xf32>,
    %c0_160 = arith.constant 0 : index
    %c0_161 = arith.constant 0 : index
    %134 = vector.load %arg7[%c0_160, %c0_161] : memref<1x64xf32, #tpu.memory_space<vmem>>, vector<1x64xf32>
    %c0_162 = arith.constant 0 : index
    %c0_163 = arith.constant 0 : index
    %135 = vector.load %arg9[%c0_162, %c0_163] : memref<16x64xf32, #tpu.memory_space<vmem>>, vector<16x64xf32>
    %136 = vector.broadcast %134 : vector<1x64xf32> to vector<16x64xf32>
    %137 = arith.addf %135, %136 : vector<16x64xf32>
    %c0_164 = arith.constant 0 : index
    %c0_165 = arith.constant 0 : index
    %c0_166 = arith.constant 0 : index
    %138 = vector.load %arg8[%c0_164, %c0_165, %c0_166] : memref<1x16x64xf32, #tpu.memory_space<vmem>>, vector<1x16x64xf32>
    %139 = vector.shape_cast %138 : vector<1x16x64xf32> to vector<16x64xf32>
    %140 = vector.shape_cast %137 : vector<16x64xf32> to vector<1x16x64xf32>
    tpu.vector_store %arg8[%c0_164, %c0_165, %c0_166], %140 {strides = array<i32>} : memref<1x16x64xf32, #tpu.memory_space<vmem>>, vector<1x16x64xf32>,
    return
  }
  func.func @transform_0(%arg0: i32, %arg1: i32) -> (i32, i32, i32, i32) {
    %c0_i32 = arith.constant 0 : i32
    %c0_i32_0 = arith.constant 0 : i32
    %c0_i32_1 = arith.constant 0 : i32
    return %arg0, %c0_i32, %arg1, %c0_i32_0 : i32, i32, i32, i32
  }
  func.func @transform_1(%arg0: i32, %arg1: i32) -> (i32, i32, i32, i32) {
    %c0_i32 = arith.constant 0 : i32
    %c0_i32_0 = arith.constant 0 : i32
    %c0_i32_1 = arith.constant 0 : i32
    return %arg0, %c0_i32, %arg1, %c0_i32_0 : i32, i32, i32, i32
  }
  func.func @transform_2(%arg0: i32, %arg1: i32) -> (i32, i32, i32) {
    %c0_i32 = arith.constant 0 : i32
    %c0_i32_0 = arith.constant 0 : i32
    return %arg0, %arg1, %c0_i32 : i32, i32, i32
  }
  func.func @transform_3(%arg0: i32, %arg1: i32) -> (i32, i32) {
    %c0_i32 = arith.constant 0 : i32
    %c0_i32_0 = arith.constant 0 : i32
    %c0_i32_1 = arith.constant 0 : i32
    return %c0_i32, %c0_i32_0 : i32, i32
  }
  func.func @transform_4(%arg0: i32, %arg1: i32) -> (i32, i32) {
    %c0_i32 = arith.constant 0 : i32
    %c0_i32_0 = arith.constant 0 : i32
    %c0_i32_1 = arith.constant 0 : i32
    return %c0_i32, %c0_i32_0 : i32, i32
  }
  func.func @transform_5(%arg0: i32, %arg1: i32) -> (i32, i32) {
    %c0_i32 = arith.constant 0 : i32
    %c0_i32_0 = arith.constant 0 : i32
    %c0_i32_1 = arith.constant 0 : i32
    return %c0_i32, %c0_i32_0 : i32, i32
  }
  func.func @transform_6(%arg0: i32, %arg1: i32) -> (i32, i32, i32) {
    %c0_i32 = arith.constant 0 : i32
    %c0_i32_0 = arith.constant 0 : i32
    return %arg0, %arg1, %c0_i32 : i32, i32, i32
  }
}

module attributes {stable_mosaic.version = 11 : i64} {
  func.func @kernel(%arg0: i32, %arg1: i32, %arg2: memref<1x8x8x3xf32, #tpu.memory_space<vmem>>, %arg3: memref<1x8x8x128xbf16, #tpu.memory_space<vmem>>, %arg4: memref<1x8x3xf32, #tpu.memory_space<vmem>>, %arg5: memref<1x8x64xbf16, #tpu.memory_space<vmem>>, %arg6: memref<3x128xf32, #tpu.memory_space<vmem>>, %arg7: memref<64x128xbf16, #tpu.memory_space<vmem>>, %arg8: memref<128x128xbf16, #tpu.memory_space<vmem>>, %arg9: memref<1x128xf32, #tpu.memory_space<vmem>>, %arg10: memref<1x8x128xf32, #tpu.memory_space<vmem>>, %arg11: memref<8x128xf32, #tpu.memory_space<vmem>>) attributes {dimension_semantics = [#tpu.dimension_semantics<parallel>, #tpu.dimension_semantics<parallel>], iteration_bounds = array<i64: 2, 1>, scalar_prefetch = 0 : i64, scratch_operands = 1 : i64, tpu.core_type = #tpu.core_type<tc>, window_params = [{transform_indices = @transform_0, window_bounds = array<i64: 1, 8, 8, 3>}, {transform_indices = @transform_1, window_bounds = array<i64: 1, 8, 8, 128>}, {transform_indices = @transform_2, window_bounds = array<i64: 1, 8, 3>}, {transform_indices = @transform_3, window_bounds = array<i64: 1, 8, 64>}, {pipeline_mode = #tpu.pipeline_mode<synchronous>, transform_indices = @transform_4, window_bounds = array<i64: 3, 128>}, {pipeline_mode = #tpu.pipeline_mode<synchronous>, transform_indices = @transform_5, window_bounds = array<i64: 64, 128>}, {pipeline_mode = #tpu.pipeline_mode<synchronous>, transform_indices = @transform_6, window_bounds = array<i64: 128, 128>}, {pipeline_mode = #tpu.pipeline_mode<synchronous>, transform_indices = @transform_7, window_bounds = array<i64: 1, 128>}, {transform_indices = @transform_8, window_bounds = array<i64: 1, 8, 128>}]} {
    %c0 = arith.constant 0 : index
    %c0_0 = arith.constant 0 : index
    %c0_1 = arith.constant 0 : index
    %0 = vector.load %arg4[%c0, %c0_0, %c0_1] : memref<1x8x3xf32, #tpu.memory_space<vmem>>, vector<1x8x3xf32>
    %1 = vector.shape_cast %0 : vector<1x8x3xf32> to vector<8x3xf32>
    %c0_2 = arith.constant 0 : index
    %c0_3 = arith.constant 0 : index
    %2 = vector.load %arg6[%c0_2, %c0_3] : memref<3x128xf32, #tpu.memory_space<vmem>>, vector<3x128xf32>
    %c0_4 = arith.constant 0 : index
    %c0_5 = arith.constant 0 : index
    %3 = vector.load %arg8[%c0_4, %c0_5] : memref<128x128xbf16, #tpu.memory_space<vmem>>, vector<128x128xbf16>
    %c0_6 = arith.constant 0 : index
    %c0_7 = arith.constant 0 : index
    %c0_8 = arith.constant 0 : index
    %c0_9 = arith.constant 0 : index
    %4 = vector.load %arg2[%c0_6, %c0_7, %c0_8, %c0_9] : memref<1x8x8x3xf32, #tpu.memory_space<vmem>>, vector<1x1x8x3xf32>
    %5 = vector.shape_cast %4 : vector<1x1x8x3xf32> to vector<8x3xf32>
    %6 = arith.subf %5, %1 : vector<8x3xf32>
    %cst = arith.constant dense<0.000000e+00> : vector<8x128xf32>
    %7 = tpu.matmul %6, %2, %cst {dimension_numbers = #tpu.dot_dimension_numbers<[1], [0], [0], [1], [0, 0, 1, 1], [], []>} : vector<8x3xf32>, vector<3x128xf32>, vector<8x128xf32> -> vector<8x128xf32>
    %c0_10 = arith.constant 0 : index
    %c0_11 = arith.constant 0 : index
    %c0_12 = arith.constant 0 : index
    %c0_13 = arith.constant 0 : index
    %8 = vector.load %arg3[%c0_10, %c0_11, %c0_12, %c0_13] : memref<1x8x8x128xbf16, #tpu.memory_space<vmem>>, vector<1x1x8x128xbf16>
    %9 = vector.shape_cast %8 : vector<1x1x8x128xbf16> to vector<8x128xbf16>
    %cst_14 = arith.constant dense<0.000000e+00> : vector<8x128xf32>
    %10 = tpu.matmul %9, %3, %cst_14 {dimension_numbers = #tpu.dot_dimension_numbers<[1], [0], [0], [1], [0, 0, 1, 1], [], []>} : vector<8x128xbf16>, vector<128x128xbf16>, vector<8x128xf32> -> vector<8x128xf32>
    %11 = arith.addf %7, %10 : vector<8x128xf32>
    %c0_15 = arith.constant 0 : index
    %c0_16 = arith.constant 0 : index
    %12 = vector.load %arg11[%c0_15, %c0_16] : memref<8x128xf32, #tpu.memory_space<vmem>>, vector<8x128xf32>
    tpu.vector_store %arg11[%c0_15, %c0_16], %11 {strides = array<i32>} : memref<8x128xf32, #tpu.memory_space<vmem>>, vector<8x128xf32>,
    %c0_17 = arith.constant 0 : index
    %c1 = arith.constant 1 : index
    %c0_18 = arith.constant 0 : index
    %c0_19 = arith.constant 0 : index
    %13 = vector.load %arg2[%c0_17, %c1, %c0_18, %c0_19] : memref<1x8x8x3xf32, #tpu.memory_space<vmem>>, vector<1x1x8x3xf32>
    %14 = vector.shape_cast %13 : vector<1x1x8x3xf32> to vector<8x3xf32>
    %15 = arith.subf %14, %1 : vector<8x3xf32>
    %cst_20 = arith.constant dense<0.000000e+00> : vector<8x128xf32>
    %16 = tpu.matmul %15, %2, %cst_20 {dimension_numbers = #tpu.dot_dimension_numbers<[1], [0], [0], [1], [0, 0, 1, 1], [], []>} : vector<8x3xf32>, vector<3x128xf32>, vector<8x128xf32> -> vector<8x128xf32>
    %c0_21 = arith.constant 0 : index
    %c1_22 = arith.constant 1 : index
    %c0_23 = arith.constant 0 : index
    %c0_24 = arith.constant 0 : index
    %17 = vector.load %arg3[%c0_21, %c1_22, %c0_23, %c0_24] : memref<1x8x8x128xbf16, #tpu.memory_space<vmem>>, vector<1x1x8x128xbf16>
    %18 = vector.shape_cast %17 : vector<1x1x8x128xbf16> to vector<8x128xbf16>
    %cst_25 = arith.constant dense<0.000000e+00> : vector<8x128xf32>
    %19 = tpu.matmul %18, %3, %cst_25 {dimension_numbers = #tpu.dot_dimension_numbers<[1], [0], [0], [1], [0, 0, 1, 1], [], []>} : vector<8x128xbf16>, vector<128x128xbf16>, vector<8x128xf32> -> vector<8x128xf32>
    %20 = arith.addf %16, %19 : vector<8x128xf32>
    %c0_26 = arith.constant 0 : index
    %c0_27 = arith.constant 0 : index
    %21 = vector.load %arg11[%c0_26, %c0_27] : memref<8x128xf32, #tpu.memory_space<vmem>>, vector<8x128xf32>
    %22 = arith.maximumf %21, %20 : vector<8x128xf32>
    %c0_28 = arith.constant 0 : index
    %c0_29 = arith.constant 0 : index
    %23 = vector.load %arg11[%c0_28, %c0_29] : memref<8x128xf32, #tpu.memory_space<vmem>>, vector<8x128xf32>
    tpu.vector_store %arg11[%c0_28, %c0_29], %22 {strides = array<i32>} : memref<8x128xf32, #tpu.memory_space<vmem>>, vector<8x128xf32>,
    %c0_30 = arith.constant 0 : index
    %c2 = arith.constant 2 : index
    %c0_31 = arith.constant 0 : index
    %c0_32 = arith.constant 0 : index
    %24 = vector.load %arg2[%c0_30, %c2, %c0_31, %c0_32] : memref<1x8x8x3xf32, #tpu.memory_space<vmem>>, vector<1x1x8x3xf32>
    %25 = vector.shape_cast %24 : vector<1x1x8x3xf32> to vector<8x3xf32>
    %26 = arith.subf %25, %1 : vector<8x3xf32>
    %cst_33 = arith.constant dense<0.000000e+00> : vector<8x128xf32>
    %27 = tpu.matmul %26, %2, %cst_33 {dimension_numbers = #tpu.dot_dimension_numbers<[1], [0], [0], [1], [0, 0, 1, 1], [], []>} : vector<8x3xf32>, vector<3x128xf32>, vector<8x128xf32> -> vector<8x128xf32>
    %c0_34 = arith.constant 0 : index
    %c2_35 = arith.constant 2 : index
    %c0_36 = arith.constant 0 : index
    %c0_37 = arith.constant 0 : index
    %28 = vector.load %arg3[%c0_34, %c2_35, %c0_36, %c0_37] : memref<1x8x8x128xbf16, #tpu.memory_space<vmem>>, vector<1x1x8x128xbf16>
    %29 = vector.shape_cast %28 : vector<1x1x8x128xbf16> to vector<8x128xbf16>
    %cst_38 = arith.constant dense<0.000000e+00> : vector<8x128xf32>
    %30 = tpu.matmul %29, %3, %cst_38 {dimension_numbers = #tpu.dot_dimension_numbers<[1], [0], [0], [1], [0, 0, 1, 1], [], []>} : vector<8x128xbf16>, vector<128x128xbf16>, vector<8x128xf32> -> vector<8x128xf32>
    %31 = arith.addf %27, %30 : vector<8x128xf32>
    %c0_39 = arith.constant 0 : index
    %c0_40 = arith.constant 0 : index
    %32 = vector.load %arg11[%c0_39, %c0_40] : memref<8x128xf32, #tpu.memory_space<vmem>>, vector<8x128xf32>
    %33 = arith.maximumf %32, %31 : vector<8x128xf32>
    %c0_41 = arith.constant 0 : index
    %c0_42 = arith.constant 0 : index
    %34 = vector.load %arg11[%c0_41, %c0_42] : memref<8x128xf32, #tpu.memory_space<vmem>>, vector<8x128xf32>
    tpu.vector_store %arg11[%c0_41, %c0_42], %33 {strides = array<i32>} : memref<8x128xf32, #tpu.memory_space<vmem>>, vector<8x128xf32>,
    %c0_43 = arith.constant 0 : index
    %c3 = arith.constant 3 : index
    %c0_44 = arith.constant 0 : index
    %c0_45 = arith.constant 0 : index
    %35 = vector.load %arg2[%c0_43, %c3, %c0_44, %c0_45] : memref<1x8x8x3xf32, #tpu.memory_space<vmem>>, vector<1x1x8x3xf32>
    %36 = vector.shape_cast %35 : vector<1x1x8x3xf32> to vector<8x3xf32>
    %37 = arith.subf %36, %1 : vector<8x3xf32>
    %cst_46 = arith.constant dense<0.000000e+00> : vector<8x128xf32>
    %38 = tpu.matmul %37, %2, %cst_46 {dimension_numbers = #tpu.dot_dimension_numbers<[1], [0], [0], [1], [0, 0, 1, 1], [], []>} : vector<8x3xf32>, vector<3x128xf32>, vector<8x128xf32> -> vector<8x128xf32>
    %c0_47 = arith.constant 0 : index
    %c3_48 = arith.constant 3 : index
    %c0_49 = arith.constant 0 : index
    %c0_50 = arith.constant 0 : index
    %39 = vector.load %arg3[%c0_47, %c3_48, %c0_49, %c0_50] : memref<1x8x8x128xbf16, #tpu.memory_space<vmem>>, vector<1x1x8x128xbf16>
    %40 = vector.shape_cast %39 : vector<1x1x8x128xbf16> to vector<8x128xbf16>
    %cst_51 = arith.constant dense<0.000000e+00> : vector<8x128xf32>
    %41 = tpu.matmul %40, %3, %cst_51 {dimension_numbers = #tpu.dot_dimension_numbers<[1], [0], [0], [1], [0, 0, 1, 1], [], []>} : vector<8x128xbf16>, vector<128x128xbf16>, vector<8x128xf32> -> vector<8x128xf32>
    %42 = arith.addf %38, %41 : vector<8x128xf32>
    %c0_52 = arith.constant 0 : index
    %c0_53 = arith.constant 0 : index
    %43 = vector.load %arg11[%c0_52, %c0_53] : memref<8x128xf32, #tpu.memory_space<vmem>>, vector<8x128xf32>
    %44 = arith.maximumf %43, %42 : vector<8x128xf32>
    %c0_54 = arith.constant 0 : index
    %c0_55 = arith.constant 0 : index
    %45 = vector.load %arg11[%c0_54, %c0_55] : memref<8x128xf32, #tpu.memory_space<vmem>>, vector<8x128xf32>
    tpu.vector_store %arg11[%c0_54, %c0_55], %44 {strides = array<i32>} : memref<8x128xf32, #tpu.memory_space<vmem>>, vector<8x128xf32>,
    %c0_56 = arith.constant 0 : index
    %c4 = arith.constant 4 : index
    %c0_57 = arith.constant 0 : index
    %c0_58 = arith.constant 0 : index
    %46 = vector.load %arg2[%c0_56, %c4, %c0_57, %c0_58] : memref<1x8x8x3xf32, #tpu.memory_space<vmem>>, vector<1x1x8x3xf32>
    %47 = vector.shape_cast %46 : vector<1x1x8x3xf32> to vector<8x3xf32>
    %48 = arith.subf %47, %1 : vector<8x3xf32>
    %cst_59 = arith.constant dense<0.000000e+00> : vector<8x128xf32>
    %49 = tpu.matmul %48, %2, %cst_59 {dimension_numbers = #tpu.dot_dimension_numbers<[1], [0], [0], [1], [0, 0, 1, 1], [], []>} : vector<8x3xf32>, vector<3x128xf32>, vector<8x128xf32> -> vector<8x128xf32>
    %c0_60 = arith.constant 0 : index
    %c4_61 = arith.constant 4 : index
    %c0_62 = arith.constant 0 : index
    %c0_63 = arith.constant 0 : index
    %50 = vector.load %arg3[%c0_60, %c4_61, %c0_62, %c0_63] : memref<1x8x8x128xbf16, #tpu.memory_space<vmem>>, vector<1x1x8x128xbf16>
    %51 = vector.shape_cast %50 : vector<1x1x8x128xbf16> to vector<8x128xbf16>
    %cst_64 = arith.constant dense<0.000000e+00> : vector<8x128xf32>
    %52 = tpu.matmul %51, %3, %cst_64 {dimension_numbers = #tpu.dot_dimension_numbers<[1], [0], [0], [1], [0, 0, 1, 1], [], []>} : vector<8x128xbf16>, vector<128x128xbf16>, vector<8x128xf32> -> vector<8x128xf32>
    %53 = arith.addf %49, %52 : vector<8x128xf32>
    %c0_65 = arith.constant 0 : index
    %c0_66 = arith.constant 0 : index
    %54 = vector.load %arg11[%c0_65, %c0_66] : memref<8x128xf32, #tpu.memory_space<vmem>>, vector<8x128xf32>
    %55 = arith.maximumf %54, %53 : vector<8x128xf32>
    %c0_67 = arith.constant 0 : index
    %c0_68 = arith.constant 0 : index
    %56 = vector.load %arg11[%c0_67, %c0_68] : memref<8x128xf32, #tpu.memory_space<vmem>>, vector<8x128xf32>
    tpu.vector_store %arg11[%c0_67, %c0_68], %55 {strides = array<i32>} : memref<8x128xf32, #tpu.memory_space<vmem>>, vector<8x128xf32>,
    %c0_69 = arith.constant 0 : index
    %c5 = arith.constant 5 : index
    %c0_70 = arith.constant 0 : index
    %c0_71 = arith.constant 0 : index
    %57 = vector.load %arg2[%c0_69, %c5, %c0_70, %c0_71] : memref<1x8x8x3xf32, #tpu.memory_space<vmem>>, vector<1x1x8x3xf32>
    %58 = vector.shape_cast %57 : vector<1x1x8x3xf32> to vector<8x3xf32>
    %59 = arith.subf %58, %1 : vector<8x3xf32>
    %cst_72 = arith.constant dense<0.000000e+00> : vector<8x128xf32>
    %60 = tpu.matmul %59, %2, %cst_72 {dimension_numbers = #tpu.dot_dimension_numbers<[1], [0], [0], [1], [0, 0, 1, 1], [], []>} : vector<8x3xf32>, vector<3x128xf32>, vector<8x128xf32> -> vector<8x128xf32>
    %c0_73 = arith.constant 0 : index
    %c5_74 = arith.constant 5 : index
    %c0_75 = arith.constant 0 : index
    %c0_76 = arith.constant 0 : index
    %61 = vector.load %arg3[%c0_73, %c5_74, %c0_75, %c0_76] : memref<1x8x8x128xbf16, #tpu.memory_space<vmem>>, vector<1x1x8x128xbf16>
    %62 = vector.shape_cast %61 : vector<1x1x8x128xbf16> to vector<8x128xbf16>
    %cst_77 = arith.constant dense<0.000000e+00> : vector<8x128xf32>
    %63 = tpu.matmul %62, %3, %cst_77 {dimension_numbers = #tpu.dot_dimension_numbers<[1], [0], [0], [1], [0, 0, 1, 1], [], []>} : vector<8x128xbf16>, vector<128x128xbf16>, vector<8x128xf32> -> vector<8x128xf32>
    %64 = arith.addf %60, %63 : vector<8x128xf32>
    %c0_78 = arith.constant 0 : index
    %c0_79 = arith.constant 0 : index
    %65 = vector.load %arg11[%c0_78, %c0_79] : memref<8x128xf32, #tpu.memory_space<vmem>>, vector<8x128xf32>
    %66 = arith.maximumf %65, %64 : vector<8x128xf32>
    %c0_80 = arith.constant 0 : index
    %c0_81 = arith.constant 0 : index
    %67 = vector.load %arg11[%c0_80, %c0_81] : memref<8x128xf32, #tpu.memory_space<vmem>>, vector<8x128xf32>
    tpu.vector_store %arg11[%c0_80, %c0_81], %66 {strides = array<i32>} : memref<8x128xf32, #tpu.memory_space<vmem>>, vector<8x128xf32>,
    %c0_82 = arith.constant 0 : index
    %c6 = arith.constant 6 : index
    %c0_83 = arith.constant 0 : index
    %c0_84 = arith.constant 0 : index
    %68 = vector.load %arg2[%c0_82, %c6, %c0_83, %c0_84] : memref<1x8x8x3xf32, #tpu.memory_space<vmem>>, vector<1x1x8x3xf32>
    %69 = vector.shape_cast %68 : vector<1x1x8x3xf32> to vector<8x3xf32>
    %70 = arith.subf %69, %1 : vector<8x3xf32>
    %cst_85 = arith.constant dense<0.000000e+00> : vector<8x128xf32>
    %71 = tpu.matmul %70, %2, %cst_85 {dimension_numbers = #tpu.dot_dimension_numbers<[1], [0], [0], [1], [0, 0, 1, 1], [], []>} : vector<8x3xf32>, vector<3x128xf32>, vector<8x128xf32> -> vector<8x128xf32>
    %c0_86 = arith.constant 0 : index
    %c6_87 = arith.constant 6 : index
    %c0_88 = arith.constant 0 : index
    %c0_89 = arith.constant 0 : index
    %72 = vector.load %arg3[%c0_86, %c6_87, %c0_88, %c0_89] : memref<1x8x8x128xbf16, #tpu.memory_space<vmem>>, vector<1x1x8x128xbf16>
    %73 = vector.shape_cast %72 : vector<1x1x8x128xbf16> to vector<8x128xbf16>
    %cst_90 = arith.constant dense<0.000000e+00> : vector<8x128xf32>
    %74 = tpu.matmul %73, %3, %cst_90 {dimension_numbers = #tpu.dot_dimension_numbers<[1], [0], [0], [1], [0, 0, 1, 1], [], []>} : vector<8x128xbf16>, vector<128x128xbf16>, vector<8x128xf32> -> vector<8x128xf32>
    %75 = arith.addf %71, %74 : vector<8x128xf32>
    %c0_91 = arith.constant 0 : index
    %c0_92 = arith.constant 0 : index
    %76 = vector.load %arg11[%c0_91, %c0_92] : memref<8x128xf32, #tpu.memory_space<vmem>>, vector<8x128xf32>
    %77 = arith.maximumf %76, %75 : vector<8x128xf32>
    %c0_93 = arith.constant 0 : index
    %c0_94 = arith.constant 0 : index
    %78 = vector.load %arg11[%c0_93, %c0_94] : memref<8x128xf32, #tpu.memory_space<vmem>>, vector<8x128xf32>
    tpu.vector_store %arg11[%c0_93, %c0_94], %77 {strides = array<i32>} : memref<8x128xf32, #tpu.memory_space<vmem>>, vector<8x128xf32>,
    %c0_95 = arith.constant 0 : index
    %c7 = arith.constant 7 : index
    %c0_96 = arith.constant 0 : index
    %c0_97 = arith.constant 0 : index
    %79 = vector.load %arg2[%c0_95, %c7, %c0_96, %c0_97] : memref<1x8x8x3xf32, #tpu.memory_space<vmem>>, vector<1x1x8x3xf32>
    %80 = vector.shape_cast %79 : vector<1x1x8x3xf32> to vector<8x3xf32>
    %81 = arith.subf %80, %1 : vector<8x3xf32>
    %cst_98 = arith.constant dense<0.000000e+00> : vector<8x128xf32>
    %82 = tpu.matmul %81, %2, %cst_98 {dimension_numbers = #tpu.dot_dimension_numbers<[1], [0], [0], [1], [0, 0, 1, 1], [], []>} : vector<8x3xf32>, vector<3x128xf32>, vector<8x128xf32> -> vector<8x128xf32>
    %c0_99 = arith.constant 0 : index
    %c7_100 = arith.constant 7 : index
    %c0_101 = arith.constant 0 : index
    %c0_102 = arith.constant 0 : index
    %83 = vector.load %arg3[%c0_99, %c7_100, %c0_101, %c0_102] : memref<1x8x8x128xbf16, #tpu.memory_space<vmem>>, vector<1x1x8x128xbf16>
    %84 = vector.shape_cast %83 : vector<1x1x8x128xbf16> to vector<8x128xbf16>
    %cst_103 = arith.constant dense<0.000000e+00> : vector<8x128xf32>
    %85 = tpu.matmul %84, %3, %cst_103 {dimension_numbers = #tpu.dot_dimension_numbers<[1], [0], [0], [1], [0, 0, 1, 1], [], []>} : vector<8x128xbf16>, vector<128x128xbf16>, vector<8x128xf32> -> vector<8x128xf32>
    %86 = arith.addf %82, %85 : vector<8x128xf32>
    %c0_104 = arith.constant 0 : index
    %c0_105 = arith.constant 0 : index
    %87 = vector.load %arg11[%c0_104, %c0_105] : memref<8x128xf32, #tpu.memory_space<vmem>>, vector<8x128xf32>
    %88 = arith.maximumf %87, %86 : vector<8x128xf32>
    %c0_106 = arith.constant 0 : index
    %c0_107 = arith.constant 0 : index
    %89 = vector.load %arg11[%c0_106, %c0_107] : memref<8x128xf32, #tpu.memory_space<vmem>>, vector<8x128xf32>
    tpu.vector_store %arg11[%c0_106, %c0_107], %88 {strides = array<i32>} : memref<8x128xf32, #tpu.memory_space<vmem>>, vector<8x128xf32>,
    %c0_108 = arith.constant 0 : index
    %c0_109 = arith.constant 0 : index
    %90 = vector.load %arg9[%c0_108, %c0_109] : memref<1x128xf32, #tpu.memory_space<vmem>>, vector<1x128xf32>
    %c0_110 = arith.constant 0 : index
    %c0_111 = arith.constant 0 : index
    %c0_112 = arith.constant 0 : index
    %91 = vector.load %arg5[%c0_110, %c0_111, %c0_112] : memref<1x8x64xbf16, #tpu.memory_space<vmem>>, vector<1x8x64xbf16>
    %92 = vector.shape_cast %91 : vector<1x8x64xbf16> to vector<8x64xbf16>
    %c0_113 = arith.constant 0 : index
    %c0_114 = arith.constant 0 : index
    %93 = vector.load %arg7[%c0_113, %c0_114] : memref<64x128xbf16, #tpu.memory_space<vmem>>, vector<64x128xbf16>
    %cst_115 = arith.constant dense<0.000000e+00> : vector<8x128xf32>
    %94 = tpu.matmul %92, %93, %cst_115 {dimension_numbers = #tpu.dot_dimension_numbers<[1], [0], [0], [1], [0, 0, 1, 1], [], []>} : vector<8x64xbf16>, vector<64x128xbf16>, vector<8x128xf32> -> vector<8x128xf32>
    %95 = vector.broadcast %90 : vector<1x128xf32> to vector<8x128xf32>
    %96 = arith.addf %95, %94 : vector<8x128xf32>
    %c0_116 = arith.constant 0 : index
    %c0_117 = arith.constant 0 : index
    %97 = vector.load %arg11[%c0_116, %c0_117] : memref<8x128xf32, #tpu.memory_space<vmem>>, vector<8x128xf32>
    %98 = arith.addf %97, %96 : vector<8x128xf32>
    %c0_118 = arith.constant 0 : index
    %c0_119 = arith.constant 0 : index
    %c0_120 = arith.constant 0 : index
    %99 = vector.load %arg10[%c0_118, %c0_119, %c0_120] : memref<1x8x128xf32, #tpu.memory_space<vmem>>, vector<1x8x128xf32>
    %100 = vector.shape_cast %99 : vector<1x8x128xf32> to vector<8x128xf32>
    %101 = vector.shape_cast %98 : vector<8x128xf32> to vector<1x8x128xf32>
    tpu.vector_store %arg10[%c0_118, %c0_119, %c0_120], %101 {strides = array<i32>} : memref<1x8x128xf32, #tpu.memory_space<vmem>>, vector<1x8x128xf32>,
    return
  }
  func.func @transform_0(%arg0: i32, %arg1: i32) -> (i32, i32, i32, i32) {
    %c0_i32 = arith.constant 0 : i32
    %c0_i32_0 = arith.constant 0 : i32
    %c0_i32_1 = arith.constant 0 : i32
    return %arg0, %c0_i32, %arg1, %c0_i32_0 : i32, i32, i32, i32
  }
  func.func @transform_1(%arg0: i32, %arg1: i32) -> (i32, i32, i32, i32) {
    %c0_i32 = arith.constant 0 : i32
    %c0_i32_0 = arith.constant 0 : i32
    %c0_i32_1 = arith.constant 0 : i32
    return %arg0, %c0_i32, %arg1, %c0_i32_0 : i32, i32, i32, i32
  }
  func.func @transform_2(%arg0: i32, %arg1: i32) -> (i32, i32, i32) {
    %c0_i32 = arith.constant 0 : i32
    %c0_i32_0 = arith.constant 0 : i32
    return %arg0, %arg1, %c0_i32 : i32, i32, i32
  }
  func.func @transform_3(%arg0: i32, %arg1: i32) -> (i32, i32, i32) {
    %c0_i32 = arith.constant 0 : i32
    %c0_i32_0 = arith.constant 0 : i32
    return %arg0, %arg1, %c0_i32 : i32, i32, i32
  }
  func.func @transform_4(%arg0: i32, %arg1: i32) -> (i32, i32) {
    %c0_i32 = arith.constant 0 : i32
    %c0_i32_0 = arith.constant 0 : i32
    %c0_i32_1 = arith.constant 0 : i32
    return %c0_i32, %c0_i32_0 : i32, i32
  }
  func.func @transform_5(%arg0: i32, %arg1: i32) -> (i32, i32) {
    %c0_i32 = arith.constant 0 : i32
    %c0_i32_0 = arith.constant 0 : i32
    %c0_i32_1 = arith.constant 0 : i32
    return %c0_i32, %c0_i32_0 : i32, i32
  }
  func.func @transform_6(%arg0: i32, %arg1: i32) -> (i32, i32) {
    %c0_i32 = arith.constant 0 : i32
    %c0_i32_0 = arith.constant 0 : i32
    %c0_i32_1 = arith.constant 0 : i32
    return %c0_i32, %c0_i32_0 : i32, i32
  }
  func.func @transform_7(%arg0: i32, %arg1: i32) -> (i32, i32) {
    %c0_i32 = arith.constant 0 : i32
    %c0_i32_0 = arith.constant 0 : i32
    %c0_i32_1 = arith.constant 0 : i32
    return %c0_i32, %c0_i32_0 : i32, i32
  }
  func.func @transform_8(%arg0: i32, %arg1: i32) -> (i32, i32, i32) {
    %c0_i32 = arith.constant 0 : i32
    %c0_i32_0 = arith.constant 0 : i32
    return %arg0, %arg1, %c0_i32 : i32, i32, i32
  }
}

module attributes {stable_mosaic.version = 11 : i64} {
  func.func @kernel(%arg0: i32, %arg1: i32, %arg2: memref<1x4x4x3xf32, #tpu.memory_space<vmem>>, %arg3: memref<1x4x4x256xbf16, #tpu.memory_space<vmem>>, %arg4: memref<1x4x3xf32, #tpu.memory_space<vmem>>, %arg5: memref<1x4x128xbf16, #tpu.memory_space<vmem>>, %arg6: memref<3x256xf32, #tpu.memory_space<vmem>>, %arg7: memref<128x256xbf16, #tpu.memory_space<vmem>>, %arg8: memref<256x256xbf16, #tpu.memory_space<vmem>>, %arg9: memref<1x256xf32, #tpu.memory_space<vmem>>, %arg10: memref<1x4x256xf32, #tpu.memory_space<vmem>>, %arg11: memref<4x256xf32, #tpu.memory_space<vmem>>) attributes {dimension_semantics = [#tpu.dimension_semantics<parallel>, #tpu.dimension_semantics<parallel>], iteration_bounds = array<i64: 2, 1>, scalar_prefetch = 0 : i64, scratch_operands = 1 : i64, tpu.core_type = #tpu.core_type<tc>, window_params = [{transform_indices = @transform_0, window_bounds = array<i64: 1, 4, 4, 3>}, {transform_indices = @transform_1, window_bounds = array<i64: 1, 4, 4, 256>}, {transform_indices = @transform_2, window_bounds = array<i64: 1, 4, 3>}, {transform_indices = @transform_3, window_bounds = array<i64: 1, 4, 128>}, {pipeline_mode = #tpu.pipeline_mode<synchronous>, transform_indices = @transform_4, window_bounds = array<i64: 3, 256>}, {pipeline_mode = #tpu.pipeline_mode<synchronous>, transform_indices = @transform_5, window_bounds = array<i64: 128, 256>}, {pipeline_mode = #tpu.pipeline_mode<synchronous>, transform_indices = @transform_6, window_bounds = array<i64: 256, 256>}, {pipeline_mode = #tpu.pipeline_mode<synchronous>, transform_indices = @transform_7, window_bounds = array<i64: 1, 256>}, {transform_indices = @transform_8, window_bounds = array<i64: 1, 4, 256>}]} {
    %c0 = arith.constant 0 : index
    %c0_0 = arith.constant 0 : index
    %c0_1 = arith.constant 0 : index
    %0 = vector.load %arg4[%c0, %c0_0, %c0_1] : memref<1x4x3xf32, #tpu.memory_space<vmem>>, vector<1x4x3xf32>
    %1 = vector.shape_cast %0 : vector<1x4x3xf32> to vector<4x3xf32>
    %c0_2 = arith.constant 0 : index
    %c0_3 = arith.constant 0 : index
    %2 = vector.load %arg6[%c0_2, %c0_3] : memref<3x256xf32, #tpu.memory_space<vmem>>, vector<3x256xf32>
    %c0_4 = arith.constant 0 : index
    %c0_5 = arith.constant 0 : index
    %3 = vector.load %arg8[%c0_4, %c0_5] : memref<256x256xbf16, #tpu.memory_space<vmem>>, vector<256x256xbf16>
    %c0_6 = arith.constant 0 : index
    %c0_7 = arith.constant 0 : index
    %c0_8 = arith.constant 0 : index
    %c0_9 = arith.constant 0 : index
    %4 = vector.load %arg2[%c0_6, %c0_7, %c0_8, %c0_9] : memref<1x4x4x3xf32, #tpu.memory_space<vmem>>, vector<1x1x4x3xf32>
    %5 = vector.shape_cast %4 : vector<1x1x4x3xf32> to vector<4x3xf32>
    %6 = arith.subf %5, %1 : vector<4x3xf32>
    %cst = arith.constant dense<0.000000e+00> : vector<4x256xf32>
    %7 = tpu.matmul %6, %2, %cst {dimension_numbers = #tpu.dot_dimension_numbers<[1], [0], [0], [1], [0, 0, 1, 1], [], []>} : vector<4x3xf32>, vector<3x256xf32>, vector<4x256xf32> -> vector<4x256xf32>
    %c0_10 = arith.constant 0 : index
    %c0_11 = arith.constant 0 : index
    %c0_12 = arith.constant 0 : index
    %c0_13 = arith.constant 0 : index
    %8 = vector.load %arg3[%c0_10, %c0_11, %c0_12, %c0_13] : memref<1x4x4x256xbf16, #tpu.memory_space<vmem>>, vector<1x1x4x256xbf16>
    %9 = vector.shape_cast %8 : vector<1x1x4x256xbf16> to vector<4x256xbf16>
    %cst_14 = arith.constant dense<0.000000e+00> : vector<4x256xf32>
    %10 = tpu.matmul %9, %3, %cst_14 {dimension_numbers = #tpu.dot_dimension_numbers<[1], [0], [0], [1], [0, 0, 1, 1], [], []>} : vector<4x256xbf16>, vector<256x256xbf16>, vector<4x256xf32> -> vector<4x256xf32>
    %11 = arith.addf %7, %10 : vector<4x256xf32>
    %c0_15 = arith.constant 0 : index
    %c0_16 = arith.constant 0 : index
    %12 = vector.load %arg11[%c0_15, %c0_16] : memref<4x256xf32, #tpu.memory_space<vmem>>, vector<4x256xf32>
    tpu.vector_store %arg11[%c0_15, %c0_16], %11 {strides = array<i32>} : memref<4x256xf32, #tpu.memory_space<vmem>>, vector<4x256xf32>,
    %c0_17 = arith.constant 0 : index
    %c1 = arith.constant 1 : index
    %c0_18 = arith.constant 0 : index
    %c0_19 = arith.constant 0 : index
    %13 = vector.load %arg2[%c0_17, %c1, %c0_18, %c0_19] : memref<1x4x4x3xf32, #tpu.memory_space<vmem>>, vector<1x1x4x3xf32>
    %14 = vector.shape_cast %13 : vector<1x1x4x3xf32> to vector<4x3xf32>
    %15 = arith.subf %14, %1 : vector<4x3xf32>
    %cst_20 = arith.constant dense<0.000000e+00> : vector<4x256xf32>
    %16 = tpu.matmul %15, %2, %cst_20 {dimension_numbers = #tpu.dot_dimension_numbers<[1], [0], [0], [1], [0, 0, 1, 1], [], []>} : vector<4x3xf32>, vector<3x256xf32>, vector<4x256xf32> -> vector<4x256xf32>
    %c0_21 = arith.constant 0 : index
    %c1_22 = arith.constant 1 : index
    %c0_23 = arith.constant 0 : index
    %c0_24 = arith.constant 0 : index
    %17 = vector.load %arg3[%c0_21, %c1_22, %c0_23, %c0_24] : memref<1x4x4x256xbf16, #tpu.memory_space<vmem>>, vector<1x1x4x256xbf16>
    %18 = vector.shape_cast %17 : vector<1x1x4x256xbf16> to vector<4x256xbf16>
    %cst_25 = arith.constant dense<0.000000e+00> : vector<4x256xf32>
    %19 = tpu.matmul %18, %3, %cst_25 {dimension_numbers = #tpu.dot_dimension_numbers<[1], [0], [0], [1], [0, 0, 1, 1], [], []>} : vector<4x256xbf16>, vector<256x256xbf16>, vector<4x256xf32> -> vector<4x256xf32>
    %20 = arith.addf %16, %19 : vector<4x256xf32>
    %c0_26 = arith.constant 0 : index
    %c0_27 = arith.constant 0 : index
    %21 = vector.load %arg11[%c0_26, %c0_27] : memref<4x256xf32, #tpu.memory_space<vmem>>, vector<4x256xf32>
    %22 = arith.maximumf %21, %20 : vector<4x256xf32>
    %c0_28 = arith.constant 0 : index
    %c0_29 = arith.constant 0 : index
    %23 = vector.load %arg11[%c0_28, %c0_29] : memref<4x256xf32, #tpu.memory_space<vmem>>, vector<4x256xf32>
    tpu.vector_store %arg11[%c0_28, %c0_29], %22 {strides = array<i32>} : memref<4x256xf32, #tpu.memory_space<vmem>>, vector<4x256xf32>,
    %c0_30 = arith.constant 0 : index
    %c2 = arith.constant 2 : index
    %c0_31 = arith.constant 0 : index
    %c0_32 = arith.constant 0 : index
    %24 = vector.load %arg2[%c0_30, %c2, %c0_31, %c0_32] : memref<1x4x4x3xf32, #tpu.memory_space<vmem>>, vector<1x1x4x3xf32>
    %25 = vector.shape_cast %24 : vector<1x1x4x3xf32> to vector<4x3xf32>
    %26 = arith.subf %25, %1 : vector<4x3xf32>
    %cst_33 = arith.constant dense<0.000000e+00> : vector<4x256xf32>
    %27 = tpu.matmul %26, %2, %cst_33 {dimension_numbers = #tpu.dot_dimension_numbers<[1], [0], [0], [1], [0, 0, 1, 1], [], []>} : vector<4x3xf32>, vector<3x256xf32>, vector<4x256xf32> -> vector<4x256xf32>
    %c0_34 = arith.constant 0 : index
    %c2_35 = arith.constant 2 : index
    %c0_36 = arith.constant 0 : index
    %c0_37 = arith.constant 0 : index
    %28 = vector.load %arg3[%c0_34, %c2_35, %c0_36, %c0_37] : memref<1x4x4x256xbf16, #tpu.memory_space<vmem>>, vector<1x1x4x256xbf16>
    %29 = vector.shape_cast %28 : vector<1x1x4x256xbf16> to vector<4x256xbf16>
    %cst_38 = arith.constant dense<0.000000e+00> : vector<4x256xf32>
    %30 = tpu.matmul %29, %3, %cst_38 {dimension_numbers = #tpu.dot_dimension_numbers<[1], [0], [0], [1], [0, 0, 1, 1], [], []>} : vector<4x256xbf16>, vector<256x256xbf16>, vector<4x256xf32> -> vector<4x256xf32>
    %31 = arith.addf %27, %30 : vector<4x256xf32>
    %c0_39 = arith.constant 0 : index
    %c0_40 = arith.constant 0 : index
    %32 = vector.load %arg11[%c0_39, %c0_40] : memref<4x256xf32, #tpu.memory_space<vmem>>, vector<4x256xf32>
    %33 = arith.maximumf %32, %31 : vector<4x256xf32>
    %c0_41 = arith.constant 0 : index
    %c0_42 = arith.constant 0 : index
    %34 = vector.load %arg11[%c0_41, %c0_42] : memref<4x256xf32, #tpu.memory_space<vmem>>, vector<4x256xf32>
    tpu.vector_store %arg11[%c0_41, %c0_42], %33 {strides = array<i32>} : memref<4x256xf32, #tpu.memory_space<vmem>>, vector<4x256xf32>,
    %c0_43 = arith.constant 0 : index
    %c3 = arith.constant 3 : index
    %c0_44 = arith.constant 0 : index
    %c0_45 = arith.constant 0 : index
    %35 = vector.load %arg2[%c0_43, %c3, %c0_44, %c0_45] : memref<1x4x4x3xf32, #tpu.memory_space<vmem>>, vector<1x1x4x3xf32>
    %36 = vector.shape_cast %35 : vector<1x1x4x3xf32> to vector<4x3xf32>
    %37 = arith.subf %36, %1 : vector<4x3xf32>
    %cst_46 = arith.constant dense<0.000000e+00> : vector<4x256xf32>
    %38 = tpu.matmul %37, %2, %cst_46 {dimension_numbers = #tpu.dot_dimension_numbers<[1], [0], [0], [1], [0, 0, 1, 1], [], []>} : vector<4x3xf32>, vector<3x256xf32>, vector<4x256xf32> -> vector<4x256xf32>
    %c0_47 = arith.constant 0 : index
    %c3_48 = arith.constant 3 : index
    %c0_49 = arith.constant 0 : index
    %c0_50 = arith.constant 0 : index
    %39 = vector.load %arg3[%c0_47, %c3_48, %c0_49, %c0_50] : memref<1x4x4x256xbf16, #tpu.memory_space<vmem>>, vector<1x1x4x256xbf16>
    %40 = vector.shape_cast %39 : vector<1x1x4x256xbf16> to vector<4x256xbf16>
    %cst_51 = arith.constant dense<0.000000e+00> : vector<4x256xf32>
    %41 = tpu.matmul %40, %3, %cst_51 {dimension_numbers = #tpu.dot_dimension_numbers<[1], [0], [0], [1], [0, 0, 1, 1], [], []>} : vector<4x256xbf16>, vector<256x256xbf16>, vector<4x256xf32> -> vector<4x256xf32>
    %42 = arith.addf %38, %41 : vector<4x256xf32>
    %c0_52 = arith.constant 0 : index
    %c0_53 = arith.constant 0 : index
    %43 = vector.load %arg11[%c0_52, %c0_53] : memref<4x256xf32, #tpu.memory_space<vmem>>, vector<4x256xf32>
    %44 = arith.maximumf %43, %42 : vector<4x256xf32>
    %c0_54 = arith.constant 0 : index
    %c0_55 = arith.constant 0 : index
    %45 = vector.load %arg11[%c0_54, %c0_55] : memref<4x256xf32, #tpu.memory_space<vmem>>, vector<4x256xf32>
    tpu.vector_store %arg11[%c0_54, %c0_55], %44 {strides = array<i32>} : memref<4x256xf32, #tpu.memory_space<vmem>>, vector<4x256xf32>,
    %c0_56 = arith.constant 0 : index
    %c0_57 = arith.constant 0 : index
    %46 = vector.load %arg9[%c0_56, %c0_57] : memref<1x256xf32, #tpu.memory_space<vmem>>, vector<1x256xf32>
    %c0_58 = arith.constant 0 : index
    %c0_59 = arith.constant 0 : index
    %c0_60 = arith.constant 0 : index
    %47 = vector.load %arg5[%c0_58, %c0_59, %c0_60] : memref<1x4x128xbf16, #tpu.memory_space<vmem>>, vector<1x4x128xbf16>
    %48 = vector.shape_cast %47 : vector<1x4x128xbf16> to vector<4x128xbf16>
    %c0_61 = arith.constant 0 : index
    %c0_62 = arith.constant 0 : index
    %49 = vector.load %arg7[%c0_61, %c0_62] : memref<128x256xbf16, #tpu.memory_space<vmem>>, vector<128x256xbf16>
    %cst_63 = arith.constant dense<0.000000e+00> : vector<4x256xf32>
    %50 = tpu.matmul %48, %49, %cst_63 {dimension_numbers = #tpu.dot_dimension_numbers<[1], [0], [0], [1], [0, 0, 1, 1], [], []>} : vector<4x128xbf16>, vector<128x256xbf16>, vector<4x256xf32> -> vector<4x256xf32>
    %51 = vector.broadcast %46 : vector<1x256xf32> to vector<4x256xf32>
    %52 = arith.addf %51, %50 : vector<4x256xf32>
    %c0_64 = arith.constant 0 : index
    %c0_65 = arith.constant 0 : index
    %53 = vector.load %arg11[%c0_64, %c0_65] : memref<4x256xf32, #tpu.memory_space<vmem>>, vector<4x256xf32>
    %54 = arith.addf %53, %52 : vector<4x256xf32>
    %c0_66 = arith.constant 0 : index
    %c0_67 = arith.constant 0 : index
    %c0_68 = arith.constant 0 : index
    %55 = vector.load %arg10[%c0_66, %c0_67, %c0_68] : memref<1x4x256xf32, #tpu.memory_space<vmem>>, vector<1x4x256xf32>
    %56 = vector.shape_cast %55 : vector<1x4x256xf32> to vector<4x256xf32>
    %57 = vector.shape_cast %54 : vector<4x256xf32> to vector<1x4x256xf32>
    tpu.vector_store %arg10[%c0_66, %c0_67, %c0_68], %57 {strides = array<i32>} : memref<1x4x256xf32, #tpu.memory_space<vmem>>, vector<1x4x256xf32>,
    return
  }
  func.func @transform_0(%arg0: i32, %arg1: i32) -> (i32, i32, i32, i32) {
    %c0_i32 = arith.constant 0 : i32
    %c0_i32_0 = arith.constant 0 : i32
    %c0_i32_1 = arith.constant 0 : i32
    return %arg0, %c0_i32, %arg1, %c0_i32_0 : i32, i32, i32, i32
  }
  func.func @transform_1(%arg0: i32, %arg1: i32) -> (i32, i32, i32, i32) {
    %c0_i32 = arith.constant 0 : i32
    %c0_i32_0 = arith.constant 0 : i32
    %c0_i32_1 = arith.constant 0 : i32
    return %arg0, %c0_i32, %arg1, %c0_i32_0 : i32, i32, i32, i32
  }
  func.func @transform_2(%arg0: i32, %arg1: i32) -> (i32, i32, i32) {
    %c0_i32 = arith.constant 0 : i32
    %c0_i32_0 = arith.constant 0 : i32
    return %arg0, %arg1, %c0_i32 : i32, i32, i32
  }
  func.func @transform_3(%arg0: i32, %arg1: i32) -> (i32, i32, i32) {
    %c0_i32 = arith.constant 0 : i32
    %c0_i32_0 = arith.constant 0 : i32
    return %arg0, %arg1, %c0_i32 : i32, i32, i32
  }
  func.func @transform_4(%arg0: i32, %arg1: i32) -> (i32, i32) {
    %c0_i32 = arith.constant 0 : i32
    %c0_i32_0 = arith.constant 0 : i32
    %c0_i32_1 = arith.constant 0 : i32
    return %c0_i32, %c0_i32_0 : i32, i32
  }
  func.func @transform_5(%arg0: i32, %arg1: i32) -> (i32, i32) {
    %c0_i32 = arith.constant 0 : i32
    %c0_i32_0 = arith.constant 0 : i32
    %c0_i32_1 = arith.constant 0 : i32
    return %c0_i32, %c0_i32_0 : i32, i32
  }
  func.func @transform_6(%arg0: i32, %arg1: i32) -> (i32, i32) {
    %c0_i32 = arith.constant 0 : i32
    %c0_i32_0 = arith.constant 0 : i32
    %c0_i32_1 = arith.constant 0 : i32
    return %c0_i32, %c0_i32_0 : i32, i32
  }
  func.func @transform_7(%arg0: i32, %arg1: i32) -> (i32, i32) {
    %c0_i32 = arith.constant 0 : i32
    %c0_i32_0 = arith.constant 0 : i32
    %c0_i32_1 = arith.constant 0 : i32
    return %c0_i32, %c0_i32_0 : i32, i32
  }
  func.func @transform_8(%arg0: i32, %arg1: i32) -> (i32, i32, i32) {
    %c0_i32 = arith.constant 0 : i32
    %c0_i32_0 = arith.constant 0 : i32
    return %arg0, %arg1, %c0_i32 : i32, i32, i32
  }
}

module attributes {stable_mosaic.version = 11 : i64} {
  func.func @_mlp_head_kernel(%arg0: i32, %arg1: memref<64x448xf32, #tpu.memory_space<vmem>>, %arg2: memref<448x64xbf16, #tpu.memory_space<vmem>>, %arg3: memref<1x64xf32, #tpu.memory_space<vmem>>, %arg4: memref<64x3xbf16, #tpu.memory_space<vmem>>, %arg5: memref<1x3xf32, #tpu.memory_space<vmem>>, %arg6: memref<64x3xf32, #tpu.memory_space<vmem>>) attributes {dimension_semantics = [#tpu.dimension_semantics<parallel>], iteration_bounds = array<i64: 1>, scalar_prefetch = 0 : i64, scratch_operands = 0 : i64, tpu.core_type = #tpu.core_type<tc>, window_params = [{transform_indices = @transform_0, window_bounds = array<i64: 64, 448>}, {pipeline_mode = #tpu.pipeline_mode<synchronous>, transform_indices = @transform_1, window_bounds = array<i64: 448, 64>}, {pipeline_mode = #tpu.pipeline_mode<synchronous>, transform_indices = @transform_2, window_bounds = array<i64: 1, 64>}, {pipeline_mode = #tpu.pipeline_mode<synchronous>, transform_indices = @transform_3, window_bounds = array<i64: 64, 3>}, {pipeline_mode = #tpu.pipeline_mode<synchronous>, transform_indices = @transform_4, window_bounds = array<i64: 1, 3>}, {transform_indices = @transform_5, window_bounds = array<i64: 64, 3>}]} {
    %c0 = arith.constant 0 : index
    %c0_0 = arith.constant 0 : index
    %0 = vector.load %arg1[%c0, %c0_0] : memref<64x448xf32, #tpu.memory_space<vmem>>, vector<64x448xf32>
    %1 = arith.truncf %0 : vector<64x448xf32> to vector<64x448xbf16>
    %c0_1 = arith.constant 0 : index
    %c0_2 = arith.constant 0 : index
    %2 = vector.load %arg2[%c0_1, %c0_2] : memref<448x64xbf16, #tpu.memory_space<vmem>>, vector<448x64xbf16>
    %cst = arith.constant dense<0.000000e+00> : vector<64x64xf32>
    %3 = tpu.matmul %1, %2, %cst {dimension_numbers = #tpu.dot_dimension_numbers<[1], [0], [0], [1], [0, 0, 1, 1], [], []>} : vector<64x448xbf16>, vector<448x64xbf16>, vector<64x64xf32> -> vector<64x64xf32>
    %c0_3 = arith.constant 0 : index
    %c0_4 = arith.constant 0 : index
    %4 = vector.load %arg3[%c0_3, %c0_4] : memref<1x64xf32, #tpu.memory_space<vmem>>, vector<1x64xf32>
    %5 = vector.broadcast %4 : vector<1x64xf32> to vector<64x64xf32>
    %6 = arith.addf %3, %5 : vector<64x64xf32>
    %cst_5 = arith.constant 0.000000e+00 : f32
    %7 = vector.broadcast %cst_5 : f32 to vector<64x64xf32>
    %8 = arith.maximumf %6, %7 : vector<64x64xf32>
    %9 = arith.truncf %8 : vector<64x64xf32> to vector<64x64xbf16>
    %c0_6 = arith.constant 0 : index
    %c0_7 = arith.constant 0 : index
    %10 = vector.load %arg4[%c0_6, %c0_7] : memref<64x3xbf16, #tpu.memory_space<vmem>>, vector<64x3xbf16>
    %cst_8 = arith.constant dense<0.000000e+00> : vector<64x3xf32>
    %11 = tpu.matmul %9, %10, %cst_8 {dimension_numbers = #tpu.dot_dimension_numbers<[1], [0], [0], [1], [0, 0, 1, 1], [], []>} : vector<64x64xbf16>, vector<64x3xbf16>, vector<64x3xf32> -> vector<64x3xf32>
    %c0_9 = arith.constant 0 : index
    %c0_10 = arith.constant 0 : index
    %12 = vector.load %arg5[%c0_9, %c0_10] : memref<1x3xf32, #tpu.memory_space<vmem>>, vector<1x3xf32>
    %13 = vector.broadcast %12 : vector<1x3xf32> to vector<64x3xf32>
    %14 = arith.addf %11, %13 : vector<64x3xf32>
    %c0_11 = arith.constant 0 : index
    %c0_12 = arith.constant 0 : index
    %15 = vector.load %arg6[%c0_11, %c0_12] : memref<64x3xf32, #tpu.memory_space<vmem>>, vector<64x3xf32>
    tpu.vector_store %arg6[%c0_11, %c0_12], %14 {strides = array<i32>} : memref<64x3xf32, #tpu.memory_space<vmem>>, vector<64x3xf32>,
    return
  }
  func.func @transform_0(%arg0: i32) -> (i32, i32) {
    %c0_i32 = arith.constant 0 : i32
    %c0_i32_0 = arith.constant 0 : i32
    return %arg0, %c0_i32 : i32, i32
  }
  func.func @transform_1(%arg0: i32) -> (i32, i32) {
    %c0_i32 = arith.constant 0 : i32
    %c0_i32_0 = arith.constant 0 : i32
    %c0_i32_1 = arith.constant 0 : i32
    return %c0_i32, %c0_i32_0 : i32, i32
  }
  func.func @transform_2(%arg0: i32) -> (i32, i32) {
    %c0_i32 = arith.constant 0 : i32
    %c0_i32_0 = arith.constant 0 : i32
    %c0_i32_1 = arith.constant 0 : i32
    return %c0_i32, %c0_i32_0 : i32, i32
  }
  func.func @transform_3(%arg0: i32) -> (i32, i32) {
    %c0_i32 = arith.constant 0 : i32
    %c0_i32_0 = arith.constant 0 : i32
    %c0_i32_1 = arith.constant 0 : i32
    return %c0_i32, %c0_i32_0 : i32, i32
  }
  func.func @transform_4(%arg0: i32) -> (i32, i32) {
    %c0_i32 = arith.constant 0 : i32
    %c0_i32_0 = arith.constant 0 : i32
    %c0_i32_1 = arith.constant 0 : i32
    return %c0_i32, %c0_i32_0 : i32, i32
  }
  func.func @transform_5(%arg0: i32) -> (i32, i32) {
    %c0_i32 = arith.constant 0 : i32
    %c0_i32_0 = arith.constant 0 : i32
    return %arg0, %c0_i32 : i32, i32
  }
}

</mosaic_0001>

<bundles_post_ra>
// kernel: custom-call.115
= control target key start
LH: loop header
LB: loop body
LE: loop exit
PB: predicated region body
PF: predicated region fallthrough
CT: control target
= control target key end

     0   :  { %s6_s0 = inlined_call_operand.vmem [shape: f32[2,32], index: 0, kind: output, shape index: {}]  }

// kernel: custom-call.113
= control target key start
LH: loop header
LB: loop body
LE: loop exit
PB: predicated region body
PF: predicated region fallthrough
CT: control target
= control target key end

     0   :  { %s6_s0 = inlined_call_operand.vmem [shape: f32[2,16], index: 0, kind: output, shape index: {}]  }

// kernel: point_rnn_forward.14
= control target key start
LH: loop header
LB: loop body
LE: loop exit
PB: predicated region body
PF: predicated region fallthrough
CT: control target
= control target key end

     0   :  { %s2792_s21 = smov 0   ;;  %s2794_s22 = smov 0   ;;  %s3232_s0 = inlined_call_operand.vmem [shape: f32[2,12,16,3], index: 0, kind: input, shape index: {}]   ;;  %s3233_s1 = inlined_call_operand.vmem [shape: bf16[2,12,16,64], index: 1, kind: input, shape index: {}]   ;;  %s3234_s2 = inlined_call_operand.vmem [shape: f32[2,16,3], index: 2, kind: input, shape index: {}]   ;;  %s3235_s3 = inlined_call_operand.vmem [shape: f32[3,64], index: 3, kind: input, shape index: {}]   ;;  %s3236_s4 = inlined_call_operand.vmem [shape: bf16[64,64], index: 4, kind: input, shape index: {}]   ;;  %s3237_s5 = inlined_call_operand.vmem [shape: f32[1,64], index: 5, kind: input, shape index: {}]   ;;  %s3238_s6 = inlined_call_operand.vmem [shape: f32[2,16,64], index: 6, kind: output, shape index: {}]  }
   0x1   :  { %s2796_s23 = smov 0  }
   0x2 LB: > { %s28_s24 = sadd.s32 1, %s2749_s22  ;;  %p2267_p0 = scmp.ge.s32.totalorder %s2753_s23, 1  ;;  %s2753_s23 = sphi %s2796_s23, %s16_s23   ;;  %s2749_s22 = sphi %s2794_s22, %s3240_s22   ;;  %s2745_s21 = sphi %s2792_s21, %s3239_s21  }
   0x3   : > { %p30_p1 = scmp.ge.s32.totalorder %s28_s24, 2  ;;  %p267_p2 = scmp.lt.s32.totalorder %s2753_s23, 3 }
   0x5   : > { %s3242_s24 = smov (%p30_p1, %s28_s24), 0  ;;  %p268_p3 = pnand %p2267_p0, %p267_p2 }
   0x6   : > { %v2813_v0 = vld [vmem:[%s3236_s4] sm:$0xff] (!%p268_p3)   ;;  %v2755_v1 = vmov (!%p268_p3), 0.0   ;;  %vm462_vm0 = vcmask (!%p268_p3), 1042432   ;;  %v2820_v2 = vld [vmem:[%s3236_s4 + $0x8] sm:$0xff] (!%p268_p3)   ;;  %p324_p4 = scmp.lt.s32.totalorder (!%p268_p3), %s2745_s21, 1  ;;  %vm2756_vm1 = vmmov (!%p268_p3), 0  }
   0x7   : > { %271 = sbr.rel (%p268_p3) target bundleno = 393 (0x189), region = 44  ;;  %2483 = vmatprep.subr.bf16.mxu0 (!%p268_p3), %v2755_v1  ;;  %v2825_v3 = vld [vmem:[%s3235_s3] sm:$0x7] (!%p268_p3)  ;;  %2491 = vmatprep.mubr.msk.bf16.mxu0 (!%p268_p3), %vm2756_vm1, %v2755_v1  ;;  %v2843_v4 = vld [vmem:[%s3236_s4 + $0x10] sm:$0xff] (!%p268_p3)   ;;  %vm455_vm2 = vcmask (!%p268_p3), 23552   ;;  %v2874_v11 = vld [vmem:[%s3236_s4 + $0x18] sm:$0xff] (!%p268_p3)  }
   0x8   : > { %2484 = vmatpush3.bf16.msra.mxu0 (!%p268_p3), %v2813_v0  ;;  %2495 = vmatprep.subr.msk.mxu1 (!%p268_p3), %vm462_vm0, %v2825_v3  ;;  %vm410_vm3 = vcmask (!%p268_p3), 523264  }
   0x9   : > { %2485 = vmatprep.subr.bf16.mxu0 (!%p268_p3), %v2755_v1  ;;  %2496 = vmatpush3.msk.msra.mxu1 (!%p268_p3), %vm462_vm0, %v2825_v3 }
   0xa   : > { %2500 = vmatprep.subr.bf16.mxu1 (!%p268_p3), %v2755_v1 }
   0xc   : > { %2486 = vmatpush3.bf16.msra.mxu0 (!%p268_p3), %v2820_v2 }
   0xd   : > { %2487 = vmatprep.subr.bf16.mxu0 (!%p268_p3), %v2755_v1 }
   0xe   : > { %s3244_s21 = smov (!%p324_p4, %s2745_s21), 1 }
   0xf   : > { %s2687_s7 = smul.u32 192, %s3244_s21  ;;  %s2385_s8 = sshll.u32 %s3244_s21, 4 }
  0x10   : > { %s2688_s11 = smul.u32 96, %s3244_s21  ;;  %s351_s14 = scalar_lea.vmem %s3234_s2, %s2385_s8  ;;  %2488 = vmatpush3.bf16.msra.mxu0 %v2843_v4 }
  0x11   : > { %s2855_s17 = scalar_lea.vmem %s3232_s0, %s2687_s7  ;;  %v2857_v5 = vld [vmem:[%s351_s14] sm:$0xff]  ;;  %v2859_v6 = vld [vmem:[%s351_s14 + $0x8] sm:$0xff]  ;;  %2489 = vmatprep.subr.bf16.mxu0 %v2755_v1  ;;  %s361_s7 = scalar_lea.vmem %s3238_s6, %s2385_s8 }
  0x12   : > { %s2864_s20 = scalar_lea.vmem %s3233_s1, %s2688_s11  ;;  %v375_v7 = vld [vmem:[%s2855_s17] sm:$0xff]  ;;  %v376_v8 = vld [vmem:[%s2855_s17 + $0x8] sm:$0xff]  ;;  %v2283_v12 = vld [vmem:[%s2855_s17 + $0x10] sm:$0xff] }
  0x13   : > { %v377_v9 = vsub.f32 %v375_v7, %v2857_v5  ;;  %v378_v10 = vsub.f32 %v376_v8, %v2859_v6  ;;  %v2719_v13 = vld [vmem:[%s2864_s20] sm:$0xff]   ;;  %v546_v14 = vsub.f32 %v2283_v12, %v2857_v5  ;;  %v2284_v15 = vld [vmem:[%s2855_s17 + $0x18] sm:$0xff]  ;;  %v2904_v19 = vld [vmem:[%s2855_s17 + $0x70] sm:$0xff] }
  0x14   : > { %2490 = vmatpush3.bf16.msra.mxu0 %v2874_v11  ;;  %v2895_v16 = vld [vmem:[%s2855_s17 + $0x58] sm:$0xff]  ;;  %v547_v18 = vsub.f32 %v2284_v15, %v2859_v6  ;;  %v1410_v20 = vsub.f32 %v2904_v19, %v2857_v5  ;;  %v2913_v22 = vld [vmem:[%s2855_s17 + $0x80] sm:$0xff]  ;;  %v2916_v23 = vld [vmem:[%s2855_s17 + $0x88] sm:$0xff] }
  0x15   : > { %2497 = vmatprep.mubr.msk.f32.mxu1 %vm455_vm2, %v377_v9  ;;  %2512 = vmatprep.subr.msk.mxu0 %vm462_vm0, %v2825_v3  ;;  %v1123_v17 = vsub.f32 %v2895_v16, %v2859_v6  ;;  %v2910_v21 = vld [vmem:[%s2855_s17 + $0x78] sm:$0xff]  ;;  %v1554_v25 = vsub.f32 %v2913_v22, %v2857_v5  ;;  %v1555_v26 = vsub.f32 %v2916_v23, %v2859_v6  ;;  %v2720_v27 = vld [vmem:[%s2864_s20 + $0x8] sm:$0xff]   ;;  %v2928_v28 = vld [vmem:[%s2855_s17 + $0x90] sm:$0xff] }
  0x16   : > { %2498 = vmatmul.mubr.msk.f32.vlgmr.msra.gmra.mrb[0].mxu1 %vm455_vm2, %v378_v10  ;;  %v1411_v24 = vsub.f32 %v2910_v21, %v2859_v6  ;;  %v2931_v29 = vld [vmem:[%s2855_s17 + $0x98] sm:$0xff]  ;;  %v2934_v30 = vld [vmem:[%s2855_s17 + $0xa0] sm:$0xff]  ;;  %v1698_v31 = vsub.f32 %v2928_v28, %v2857_v5  ;;  %v2945_v34 = vld [vmem:[%s2855_s17 + $0xa8] sm:$0xff] }
  0x17   : > { %2501 = vmatpush3.bf16.msra.mxu1 %v2813_v0  ;;  %2508 = vmatprep.mubr.msk.bf16.mxu1 %vm2756_vm1, %v2755_v1  ;;  %v1699_v32 = vsub.f32 %v2931_v29, %v2859_v6  ;;  %v1842_v33 = vsub.f32 %v2934_v30, %v2857_v5  ;;  %v1843_v35 = vsub.f32 %v2945_v34, %v2859_v6  ;;  %v2954_v36 = vld [vmem:[%s2855_s17 + $0xb0] sm:$0xff]  ;;  %v2957_v37 = vld [vmem:[%s2855_s17 + $0xb8] sm:$0xff]  ;;  %v2310_v40 = vld [vmem:[%s2855_s17 + $0x40] sm:$0xff] }
  0x18   : > { %2502 = vmatprep.subr.bf16.mxu1 %v2755_v1  ;;  %2492 = vmatmul.mubr.msk.bf16.vlgmr.msra.gmra.mrb[0].mxu0 %vm410_vm3, %v2719_v13  ;;  %v1986_v38 = vsub.f32 %v2954_v36, %v2857_v5  ;;  %v1987_v39 = vsub.f32 %v2957_v37, %v2859_v6  ;;  %v2722_v41 = vld [vmem:[%s2864_s20 + $0x18] sm:$0xff]   ;;  %v2292_v42 = vld [vmem:[%s2855_s17 + $0x20] sm:$0xff]  ;;  %v978_v43 = vsub.f32 %v2310_v40, %v2857_v5  ;;  %v2721_v44 = vld [vmem:[%s2864_s20 + $0x10] sm:$0xff]  }
  0x19   : > { %2513 = vmatpush3.msk.msra.mxu0 %vm462_vm0, %v2825_v3  ;;  %2514 = vmatprep.mubr.msk.f32.mxu0 %vm455_vm2, %v546_v14  ;;  %v690_v45 = vsub.f32 %v2292_v42, %v2857_v5  ;;  %v2311_v46 = vld [vmem:[%s2855_s17 + $0x48] sm:$0xff]  ;;  %v2301_v49 = vld [vmem:[%s2855_s17 + $0x30] sm:$0xff]  ;;  %v2302_v52 = vld [vmem:[%s2855_s17 + $0x38] sm:$0xff] }
  0x1a   : > { %2534 = vmatprep.subr.bf16.mxu0 %v2755_v1  ;;  %v2293_v47 = vld [vmem:[%s2855_s17 + $0x28] sm:$0xff]  ;;  %v979_v48 = vsub.f32 %v2311_v46, %v2859_v6  ;;  %v834_v51 = vsub.f32 %v2301_v49, %v2857_v5  ;;  %v835_v53 = vsub.f32 %v2302_v52, %v2859_v6  ;;  %v2328_v54 = vld [vmem:[%s2855_s17 + $0x60] sm:$0xff]  ;;  %v2319_v57 = vld [vmem:[%s2855_s17 + $0x50] sm:$0xff] }
  0x1b   : > { %2503 = vmatpush3.bf16.msra.mxu1 %v2820_v2  ;;  %v691_v50 = vsub.f32 %v2293_v47, %v2859_v6  ;;  %v2724_v55 = vld [vmem:[%s2864_s20 + $0x28] sm:$0xff]   ;;  %v1266_v56 = vsub.f32 %v2328_v54, %v2857_v5  ;;  %v2723_v59 = vld [vmem:[%s2864_s20 + $0x20] sm:$0xff]   ;;  %v1122_v60 = vsub.f32 %v2319_v57, %v2857_v5  ;;  %v2726_v62 = vld [vmem:[%s2864_s20 + $0x38] sm:$0xff]  }
  0x1c   : > { %2504 = vmatprep.subr.bf16.mxu1 %v2755_v1  ;;  %v2329_v58 = vld [vmem:[%s2855_s17 + $0x68] sm:$0xff]  ;;  %v2725_v63 = vld [vmem:[%s2864_s20 + $0x30] sm:$0xff]   ;;  %v2727_v8 = vld [vmem:[%s2864_s20 + $0x40] sm:$0xff]  }
  0x1d   : > { %v1267_v61 = vsub.f32 %v2329_v58, %v2859_v6  ;;  %v2728_v7 = vld [vmem:[%s2864_s20 + $0x48] sm:$0xff]   ;;  %v2730_v9 = vld [vmem:[%s2864_s20 + $0x58] sm:$0xff]  }
  0x1f   : > { %2505 = vmatpush3.bf16.msra.mxu1 %v2843_v4 }
  0x20   : > { %2506 = vmatprep.subr.bf16.mxu1 %v2755_v1  ;;  %2515 = vmatmul.mubr.msk.f32.vlgmr.msra.gmra.mrb[4].mxu0 %vm455_vm2, %v547_v18 }
  0x21   : > { %2535 = vmatpush3.bf16.msra.mxu0 %v2813_v0  ;;  %2542 = vmatprep.mubr.msk.bf16.mxu0 %vm2756_vm1, %v2755_v1 }
  0x22   : > { %2536 = vmatprep.subr.bf16.mxu0 %v2755_v1 }
  0x23   : > { %2507 = vmatpush3.bf16.msra.mxu1 %v2874_v11 }
  0x24   : > { %2517 = vmatprep.subr.bf16.mxu1 %v2755_v1 }
  0x25   : > { %2537 = vmatpush3.bf16.msra.mxu0 %v2820_v2 }
  0x26   : > { %2509 = vmatmul.mubr.msk.bf16.vlgmr.msra.gmra.mrb[4].mxu1 %vm410_vm3, %v2720_v27  ;;  %2538 = vmatprep.subr.bf16.mxu0 %v2755_v1 }
  0x27   : > { %2518 = vmatpush3.bf16.msra.mxu1 %v2813_v0  ;;  %2525 = vmatprep.mubr.msk.bf16.mxu1 %vm2756_vm1, %v2755_v1 }
  0x28   : > { %2519 = vmatprep.subr.bf16.mxu1 %v2755_v1 }
  0x29   : > { %2539 = vmatpush3.bf16.msra.mxu0 %v2843_v4 }
  0x2a   : > { %2540 = vmatprep.subr.bf16.mxu0 %v2755_v1 }
  0x2b   : > { %2520 = vmatpush3.bf16.msra.mxu1 %v2820_v2 }
  0x2c   : > { %2521 = vmatprep.subr.bf16.mxu1 %v2755_v1 }
  0x2d   : > { %2541 = vmatpush3.bf16.msra.mxu0 %v2874_v11 }
  0x2e   : > { %2563 = vmatprep.subr.msk.mxu0 %vm462_vm0, %v2825_v3 }
  0x2f   : > { %2522 = vmatpush3.bf16.msra.mxu1 %v2843_v4 }
  0x30   : > { %2523 = vmatprep.subr.bf16.mxu1 %v2755_v1  ;;  %2543 = vmatmul.mubr.msk.bf16.vlgmr.msra.gmra.mrb[8].mxu0 %vm410_vm3, %v2722_v41 }
  0x31   : > { %2564 = vmatpush3.msk.msra.mxu0 %vm462_vm0, %v2825_v3  ;;  %2565 = vmatprep.mubr.msk.f32.mxu0 %vm455_vm2, %v978_v43 }
  0x32   : > { %2568 = vmatprep.subr.bf16.mxu0 %v2755_v1 }
  0x33   : > { %2524 = vmatpush3.bf16.msra.mxu1 %v2874_v11 }
  0x34   : > { %2529 = vmatprep.subr.msk.mxu1 %vm462_vm0, %v2825_v3 }
  0x36   : > { %2526 = vmatmul.mubr.msk.bf16.vlgmr.msra.gmra.mrb[8].mxu1 %vm410_vm3, %v2721_v44 }
  0x37   : > { %2530 = vmatpush3.msk.msra.mxu1 %vm462_vm0, %v2825_v3  ;;  %2531 = vmatprep.mubr.msk.f32.mxu1 %vm455_vm2, %v690_v45 }
  0x38   : > { %2546 = vmatprep.subr.msk.mxu1 %vm462_vm0, %v2825_v3  ;;  %2566 = vmatmul.mubr.msk.f32.vlgmr.msra.gmra.mrb[6].mxu0 %vm455_vm2, %v979_v48 }
  0x39   : > { %2569 = vmatpush3.bf16.msra.mxu0 %v2813_v0  ;;  %2576 = vmatprep.mubr.msk.bf16.mxu0 %vm2756_vm1, %v2755_v1 }
  0x3a   : > { %2570 = vmatprep.subr.bf16.mxu0 %v2755_v1 }
  0x3d   : > { %2571 = vmatpush3.bf16.msra.mxu0 %v2820_v2 }
  0x3e   : > { %2532 = vmatmul.mubr.msk.f32.vlgmr.msra.gmra.mrb[2].mxu1 %vm455_vm2, %v691_v50  ;;  %2572 = vmatprep.subr.bf16.mxu0 %v2755_v1 }
  0x3f   : > { %2547 = vmatpush3.msk.msra.mxu1 %vm462_vm0, %v2825_v3  ;;  %2548 = vmatprep.mubr.msk.f32.mxu1 %vm455_vm2, %v834_v51 }
  0x40   : > { %2551 = vmatprep.subr.bf16.mxu1 %v2755_v1 }
  0x41   : > { %2573 = vmatpush3.bf16.msra.mxu0 %v2843_v4 }
  0x42   : > { %2549 = vmatmul.mubr.msk.f32.vlgmr.msra.gmra.mrb[12].mxu1 %vm455_vm2, %v835_v53  ;;  %2574 = vmatprep.subr.bf16.mxu0 %v2755_v1 }
  0x43   : > { %2552 = vmatpush3.bf16.msra.mxu1 %v2813_v0  ;;  %2559 = vmatprep.mubr.msk.bf16.mxu1 %vm2756_vm1, %v2755_v1 }
  0x44   : > { %2553 = vmatprep.subr.bf16.mxu1 %v2755_v1 }
  0x45   : > { %2575 = vmatpush3.bf16.msra.mxu0 %v2874_v11 }
  0x46   : > { %2597 = vmatprep.subr.msk.mxu0 %vm462_vm0, %v2825_v3 }
  0x47   : > { %2554 = vmatpush3.bf16.msra.mxu1 %v2820_v2 }
  0x48   : > { %2555 = vmatprep.subr.bf16.mxu1 %v2755_v1  ;;  %2577 = vmatmul.mubr.msk.bf16.vlgmr.msra.gmra.mrb[12].mxu0 %vm410_vm3, %v2724_v55 }
  0x49   : > { %2598 = vmatpush3.msk.msra.mxu0 %vm462_vm0, %v2825_v3  ;;  %2599 = vmatprep.mubr.msk.f32.mxu0 %vm455_vm2, %v1266_v56 }
  0x4a   : > { %2602 = vmatprep.subr.bf16.mxu0 %v2755_v1 }
  0x4b   : > { %2556 = vmatpush3.bf16.msra.mxu1 %v2843_v4 }
  0x4c   : > { %2557 = vmatprep.subr.bf16.mxu1 %v2755_v1 }
  0x4f   : > { %2558 = vmatpush3.bf16.msra.mxu1 %v2874_v11 }
  0x50   : > { %2580 = vmatprep.subr.msk.mxu1 %vm462_vm0, %v2825_v3  ;;  %2600 = vmatmul.mubr.msk.f32.vlgmr.msra.gmra.mrb[16].mxu0 %vm455_vm2, %v1267_v61 }
  0x51   : > { %2603 = vmatpush3.bf16.msra.mxu0 %v2813_v0  ;;  %2610 = vmatprep.mubr.msk.bf16.mxu0 %vm2756_vm1, %v2755_v1 }
  0x52   : > { %2560 = vmatmul.mubr.msk.bf16.vlgmr.msra.gmra.mrb[16].mxu1 %vm410_vm3, %v2723_v59  ;;  %2604 = vmatprep.subr.bf16.mxu0 %v2755_v1 }
  0x53   : > { %2581 = vmatpush3.msk.msra.mxu1 %vm462_vm0, %v2825_v3  ;;  %2582 = vmatprep.mubr.msk.f32.mxu1 %vm455_vm2, %v1122_v60 }
  0x54   : > { %2585 = vmatprep.subr.bf16.mxu1 %v2755_v1 }
  0x55   : > { %2605 = vmatpush3.bf16.msra.mxu0 %v2820_v2 }
  0x56   : > { %2606 = vmatprep.subr.bf16.mxu0 %v2755_v1 }
  0x59   : > { %2607 = vmatpush3.bf16.msra.mxu0 %v2843_v4 }
  0x5a   : > { %2583 = vmatmul.mubr.msk.f32.vlgmr.msra.gmra.mrb[14].mxu1 %vm455_vm2, %v1123_v17  ;;  %2608 = vmatprep.subr.bf16.mxu0 %v2755_v1 }
  0x5b   : > { %2586 = vmatpush3.bf16.msra.mxu1 %v2813_v0  ;;  %2593 = vmatprep.mubr.msk.bf16.mxu1 %vm2756_vm1, %v2755_v1 }
  0x5c   : > { %2587 = vmatprep.subr.bf16.mxu1 %v2755_v1 }
  0x5d   : > { %2609 = vmatpush3.bf16.msra.mxu0 %v2874_v11 }
  0x5e   : > { %2631 = vmatprep.subr.msk.mxu0 %vm462_vm0, %v2825_v3 }
  0x5f   : > { %2588 = vmatpush3.bf16.msra.mxu1 %v2820_v2 }
  0x60   : > { %2589 = vmatprep.subr.bf16.mxu1 %v2755_v1  ;;  %2611 = vmatmul.mubr.msk.bf16.vlgmr.msra.gmra.mrb[20].mxu0 %vm410_vm3, %v2726_v62 }
  0x61   : > { %2632 = vmatpush3.msk.msra.mxu0 %vm462_vm0, %v2825_v3  ;;  %2633 = vmatprep.mubr.msk.f32.mxu0 %vm455_vm2, %v1554_v25 }
  0x62   : > { %2636 = vmatprep.subr.bf16.mxu0 %v2755_v1 }
  0x63   : > { %2590 = vmatpush3.bf16.msra.mxu1 %v2843_v4 }
  0x64   : > { %2591 = vmatprep.subr.bf16.mxu1 %v2755_v1 }
  0x67   : > { %2592 = vmatpush3.bf16.msra.mxu1 %v2874_v11 }
  0x68   : > { %2614 = vmatprep.subr.msk.mxu1 %vm462_vm0, %v2825_v3  ;;  %2634 = vmatmul.mubr.msk.f32.vlgmr.msra.gmra.mrb[18].mxu0 %vm455_vm2, %v1555_v26 }
  0x69   : > { %2637 = vmatpush3.bf16.msra.mxu0 %v2813_v0  ;;  %2644 = vmatprep.mubr.msk.bf16.mxu0 %vm2756_vm1, %v2755_v1 }
  0x6a   : > { %2594 = vmatmul.mubr.msk.bf16.vlgmr.msra.gmra.mrb[20].mxu1 %vm410_vm3, %v2725_v63  ;;  %2638 = vmatprep.subr.bf16.mxu0 %v2755_v1 }
  0x6b   : > { %2615 = vmatpush3.msk.msra.mxu1 %vm462_vm0, %v2825_v3  ;;  %2616 = vmatprep.mubr.msk.f32.mxu1 %vm455_vm2, %v1410_v20 }
  0x6c   : > { %2619 = vmatprep.subr.bf16.mxu1 %v2755_v1 }
  0x6d   : > { %2639 = vmatpush3.bf16.msra.mxu0 %v2820_v2 }
  0x6e   : > { %2640 = vmatprep.subr.bf16.mxu0 %v2755_v1 }
  0x71   : > { %2641 = vmatpush3.bf16.msra.mxu0 %v2843_v4 }
  0x72   : > { %2617 = vmatmul.mubr.msk.f32.vlgmr.msra.gmra.mrb[24].mxu1 %vm455_vm2, %v1411_v24  ;;  %2642 = vmatprep.subr.bf16.mxu0 %v2755_v1 }
  0x73   : > { %2620 = vmatpush3.bf16.msra.mxu1 %v2813_v0  ;;  %2627 = vmatprep.mubr.msk.bf16.mxu1 %vm2756_vm1, %v2755_v1 }
  0x74   : > { %2621 = vmatprep.subr.bf16.mxu1 %v2755_v1 }
  0x75   : > { %2643 = vmatpush3.bf16.msra.mxu0 %v2874_v11 }
  0x76   : > { %2665 = vmatprep.subr.msk.mxu0 %vm462_vm0, %v2825_v3 }
  0x77   : > { %2622 = vmatpush3.bf16.msra.mxu1 %v2820_v2 }
  0x78   : > { %2623 = vmatprep.subr.bf16.mxu1 %v2755_v1  ;;  %2645 = vmatmul.mubr.msk.bf16.vlgmr.msra.gmra.mrb[24].mxu0 %vm410_vm3, %v2728_v7 }
  0x79   : > { %2666 = vmatpush3.msk.msra.mxu0 %vm462_vm0, %v2825_v3  ;;  %2667 = vmatprep.mubr.msk.f32.mxu0 %vm455_vm2, %v1842_v33 }
  0x7a   : > { %2670 = vmatprep.subr.bf16.mxu0 %v2755_v1 }
  0x7b   : > { %2624 = vmatpush3.bf16.msra.mxu1 %v2843_v4 }
  0x7c   : > { %2625 = vmatprep.subr.bf16.mxu1 %v2755_v1 }
  0x7f   : > { %2626 = vmatpush3.bf16.msra.mxu1 %v2874_v11 }
  0x80   : > { %2648 = vmatprep.subr.msk.mxu1 %vm462_vm0, %v2825_v3  ;;  %2668 = vmatmul.mubr.msk.f32.vlgmr.msra.gmra.mrb[28].mxu0 %vm455_vm2, %v1843_v35 }
  0x81   : > { %2671 = vmatpush3.bf16.msra.mxu0 %v2813_v0  ;;  %2678 = vmatprep.mubr.msk.bf16.mxu0 %vm2756_vm1, %v2755_v1 }
  0x82   : > { %2628 = vmatmul.mubr.msk.bf16.vlgmr.msra.gmra.mrb[28].mxu1 %vm410_vm3, %v2727_v8  ;;  %2672 = vmatprep.subr.bf16.mxu0 %v2755_v1 }
  0x83   : > { %2649 = vmatpush3.msk.msra.mxu1 %vm462_vm0, %v2825_v3  ;;  %2650 = vmatprep.mubr.msk.f32.mxu1 %vm455_vm2, %v1698_v31 }
  0x84   : > { %2653 = vmatprep.subr.bf16.mxu1 %v2755_v1 }
  0x85   : > { %2673 = vmatpush3.bf16.msra.mxu0 %v2820_v2 }
  0x86   : > { %2674 = vmatprep.subr.bf16.mxu0 %v2755_v1 }
  0x89   : > { %2675 = vmatpush3.bf16.msra.mxu0 %v2843_v4 }
  0x8a   : > { %2651 = vmatmul.mubr.msk.f32.vlgmr.msra.gmra.mrb[26].mxu1 %vm455_vm2, %v1699_v32  ;;  %2676 = vmatprep.subr.bf16.mxu0 %v2755_v1 }
  0x8b   : > { %2654 = vmatpush3.bf16.msra.mxu1 %v2813_v0  ;;  %2661 = vmatprep.mubr.msk.bf16.mxu1 %vm2756_vm1, %v2755_v1  ;;  %v2729_v0 = vld [vmem:[%s2864_s20 + $0x50] sm:$0xff]  }
  0x8c   : > { %2655 = vmatprep.subr.bf16.mxu1 %v2755_v1 }
  0x8d   : > { %2677 = vmatpush3.bf16.msra.mxu0 %v2874_v11 }
  0x8f   : > { %2656 = vmatpush3.bf16.msra.mxu1 %v2820_v2 }
  0x90   : > { %2657 = vmatprep.subr.bf16.mxu1 %v2755_v1  ;;  %2679 = vmatmul.mubr.msk.bf16.vlgmr.msra.gmra.mrb[32].mxu0 %vm410_vm3, %v2730_v9 }
  0x93   : > { %2658 = vmatpush3.bf16.msra.mxu1 %v2843_v4 }
  0x94   : > { %2659 = vmatprep.subr.bf16.mxu1 %v2755_v1 }
  0x97   : > { %2660 = vmatpush3.bf16.msra.mxu1 %v2874_v11 }
  0x98   : > { %2682 = vmatprep.subr.msk.mxu1 %vm462_vm0, %v2825_v3 }
  0x9a   : > { %2662 = vmatmul.mubr.msk.bf16.vlgmr.msra.gmra.mrb[32].mxu1 %vm410_vm3, %v2729_v0 }
  0x9b   : > { %2683 = vmatpush3.msk.msra.mxu1 %vm462_vm0, %v2825_v3  ;;  %2684 = vmatprep.mubr.msk.f32.mxu1 %vm455_vm2, %v1986_v38 }
  0xa2   : > { %2685 = vmatmul.mubr.msk.f32.vlgmr.msra.gmra.mrb[36].mxu1 %vm455_vm2, %v1987_v39 }
  0xe9   : > { %v2499_v1 = vpop.f32.mrb[0].mxu1 }
  0xea   : > { %v532_v2 = vpop.f32.mrb[1].mxu1 }
  0xeb   : > { %v448_v4 = vpop.f32.mrb[0].mxu0 }
  0xec   : > { %v533_v10 = vadd.f32 %v532_v2, %v448_v4  ;;  %v2493_v11 = vpop.f32.mrb[1].mxu0 }
  0xed   : > { %v451_v12 = vpop.f32.mrb[2].mxu0 }
  0xee   : > { %541 = vst.msk [vmem:[#allocation2] sm:$0xff] %vm410_vm3, %v533_v10  ;;  %v538_v13 = vadd.f32 %v2499_v1, %v451_v12  ;;  %v2494_v3 = vpop.f32.mrb[3].mxu0 }
  0xf0   : > { %542 = vst.msk [vmem:[#allocation2 + $0x8] sm:$0xff] %vm410_vm3, %v538_v13 }
  0xf3   : > { %v2516_v5 = vpop.f32.mrb[4].mxu0 }
  0xf4   : > { %v672_v14 = vpop.f32.mrb[5].mxu0 }
  0xf5   : > { %v681_v16 = vld [vmem:[#allocation2] sm:$0xff] }
  0xf7   : > { %v682_v19 = vld [vmem:[#allocation2 + $0x8] sm:$0xff] }
  0xf9   : > { %v593_v15 = vpop.f32.mrb[4].mxu1 }
  0xfa   : > { %v2510_v17 = vpop.f32.mrb[5].mxu1  ;;  %v673_v6 = vadd.f32 %v672_v14, %v593_v15 }
  0xfb   : > { %v596_v18 = vpop.f32.mrb[6].mxu1 }
  0xfc   : > { %v683_v20 = vmax.f32 %v681_v16, %v673_v6  ;;  %v678_v21 = vadd.f32 %v2516_v5, %v596_v18  ;;  %v2511_v22 = vpop.f32.mrb[7].mxu1 }
  0xfe   : > { %685 = vst.msk [vmem:[#allocation2] sm:$0xff] %vm410_vm3, %v683_v20  ;;  %v684_v23 = vmax.f32 %v682_v19, %v678_v21 }
 0x100   : > { %686 = vst.msk [vmem:[#allocation2 + $0x8] sm:$0xff] %vm410_vm3, %v684_v23 }
 0x103   : > { %v881_v24 = vpop.f32.mrb[8].mxu0 }
 0x104   : > { %v2544_v25 = vpop.f32.mrb[9].mxu0 }
 0x105   : > { %v884_v26 = vpop.f32.mrb[10].mxu0  ;;  %v825_v40 = vld [vmem:[#allocation2] sm:$0xff] }
 0x106   : > { %v2545_v28 = vpop.f32.mrb[11].mxu0 }
 0x107   : > { %v826_v37 = vld [vmem:[#allocation2 + $0x8] sm:$0xff] }
 0x109   : > { %v737_v27 = vpop.f32.mrb[8].mxu1 }
 0x10a   : > { %v2527_v29 = vpop.f32.mrb[9].mxu1 }
 0x10b   : > { %v740_v30 = vpop.f32.mrb[10].mxu1  ;;  %v2567_v32 = vpop.f32.mrb[6].mxu0 }
 0x10c   : > { %v2528_v31 = vpop.f32.mrb[11].mxu1  ;;  %v1104_v33 = vpop.f32.mrb[7].mxu0 }
 0x111   : > { %v2533_v34 = vpop.f32.mrb[2].mxu1 }
 0x112   : > { %v822_v35 = vadd.f32 %v2533_v34, %v740_v30  ;;  %v816_v36 = vpop.f32.mrb[3].mxu1 }
 0x113   : > { %v817_v38 = vadd.f32 %v816_v36, %v737_v27 }
 0x114   : > { %v828_v39 = vmax.f32 %v826_v37, %v822_v35 }
 0x115   : > { %v827_v41 = vmax.f32 %v825_v40, %v817_v38  ;;  %v2550_v42 = vpop.f32.mrb[12].mxu1 }
 0x116   : > { %830 = vst.msk [vmem:[#allocation2 + $0x8] sm:$0xff] %vm410_vm3, %v828_v39  ;;  %v966_v43 = vadd.f32 %v2550_v42, %v884_v26  ;;  %v960_v44 = vpop.f32.mrb[13].mxu1 }
 0x117   : > { %829 = vst.msk [vmem:[#allocation2] sm:$0xff] %vm410_vm3, %v827_v41  ;;  %v961_v45 = vadd.f32 %v960_v44, %v881_v24 }
 0x11b   : > { %v1169_v49 = vpop.f32.mrb[12].mxu0 }
 0x11c   : > { %v2578_v51 = vpop.f32.mrb[13].mxu0 }
 0x11d   : > { %v970_v46 = vld [vmem:[#allocation2 + $0x8] sm:$0xff]  ;;  %v1172_v52 = vpop.f32.mrb[14].mxu0 }
 0x11e   : > { %v972_v47 = vmax.f32 %v970_v46, %v966_v43  ;;  %v969_v48 = vld [vmem:[#allocation2] sm:$0xff]  ;;  %v2579_v53 = vpop.f32.mrb[15].mxu0 }
 0x11f   : > { %v971_v50 = vmax.f32 %v969_v48, %v961_v45 }
 0x120   : > { %974 = vst.msk [vmem:[#allocation2 + $0x8] sm:$0xff] %vm410_vm3, %v972_v47 }
 0x121   : > { %973 = vst.msk [vmem:[#allocation2] sm:$0xff] %vm410_vm3, %v971_v50 }
 0x123   : > { %v2601_v59 = vpop.f32.mrb[16].mxu0 }
 0x124   : > { %v1392_v63 = vpop.f32.mrb[17].mxu0 }
 0x125   : > { %v1025_v54 = vpop.f32.mrb[16].mxu1 }
 0x126   : > { %v1105_v55 = vadd.f32 %v1104_v33, %v1025_v54  ;;  %v2561_v56 = vpop.f32.mrb[17].mxu1 }
 0x127   : > { %v1028_v57 = vpop.f32.mrb[18].mxu1  ;;  %v1114_v58 = vld [vmem:[#allocation2 + $0x8] sm:$0xff] }
 0x128   : > { %v1113_v60 = vld [vmem:[#allocation2] sm:$0xff]  ;;  %v1110_v61 = vadd.f32 %v2567_v32, %v1028_v57  ;;  %v2562_v62 = vpop.f32.mrb[19].mxu1 }
 0x129   : > { %v1115_v7 = vmax.f32 %v1113_v60, %v1105_v55 }
 0x12a   : > { %v1116_v8 = vmax.f32 %v1114_v58, %v1110_v61 }
 0x12b   : > { %1117 = vst.msk [vmem:[#allocation2] sm:$0xff] %vm410_vm3, %v1115_v7 }
 0x12c   : > { %1118 = vst.msk [vmem:[#allocation2 + $0x8] sm:$0xff] %vm410_vm3, %v1116_v8 }
 0x12d   : > { %v2584_v9 = vpop.f32.mrb[14].mxu1 }
 0x12e   : > { %v1254_v0 = vadd.f32 %v2584_v9, %v1172_v52  ;;  %v1248_v1 = vpop.f32.mrb[15].mxu1 }
 0x12f   : > { %v1249_v2 = vadd.f32 %v1248_v1, %v1169_v49 }
 0x132   : > { %v1257_v4 = vld [vmem:[#allocation2] sm:$0xff] }
 0x133   : > { %v1258_v10 = vld [vmem:[#allocation2 + $0x8] sm:$0xff]  ;;  %v1259_v11 = vmax.f32 %v1257_v4, %v1249_v2  ;;  %v1457_v13 = vpop.f32.mrb[20].mxu0 }
 0x134   : > { %v1260_v12 = vmax.f32 %v1258_v10, %v1254_v0  ;;  %v2612_v3 = vpop.f32.mrb[21].mxu0 }
 0x135   : > { %1261 = vst.msk [vmem:[#allocation2] sm:$0xff] %vm410_vm3, %v1259_v11  ;;  %v1460_v5 = vpop.f32.mrb[22].mxu0 }
 0x136   : > { %1262 = vst.msk [vmem:[#allocation2 + $0x8] sm:$0xff] %vm410_vm3, %v1260_v12  ;;  %v2613_v14 = vpop.f32.mrb[23].mxu0 }
 0x13b   : > { %v2635_v19 = vpop.f32.mrb[18].mxu0 }
 0x13c   : > { %v1401_v16 = vld [vmem:[#allocation2] sm:$0xff]  ;;  %v1680_v23 = vpop.f32.mrb[19].mxu0 }
 0x13d   : > { %v1313_v15 = vpop.f32.mrb[20].mxu1  ;;  %v1402_v24 = vld [vmem:[#allocation2 + $0x8] sm:$0xff] }
 0x13e   : > { %v1393_v17 = vadd.f32 %v1392_v63, %v1313_v15  ;;  %v2595_v6 = vpop.f32.mrb[21].mxu1 }
 0x13f   : > { %v1316_v18 = vpop.f32.mrb[22].mxu1 }
 0x140   : > { %v1403_v20 = vmax.f32 %v1401_v16, %v1393_v17  ;;  %v1398_v21 = vadd.f32 %v2601_v59, %v1316_v18  ;;  %v2596_v22 = vpop.f32.mrb[23].mxu1  ;;  %v2382_v17 = vld [vmem:[%s3237_s5] ss:$0 sm:$0xff] }
 0x142   : > { %1405 = vst.msk [vmem:[#allocation2] sm:$0xff] %vm410_vm3, %v1403_v20  ;;  %v1404_v25 = vmax.f32 %v1402_v24, %v1398_v21 }
 0x144   : > { %1406 = vst.msk [vmem:[#allocation2 + $0x8] sm:$0xff] %vm410_vm3, %v1404_v25 }
 0x145   : > { %v2618_v26 = vpop.f32.mrb[24].mxu1 }
 0x146   : > { %v1542_v27 = vadd.f32 %v2618_v26, %v1460_v5  ;;  %v1536_v28 = vpop.f32.mrb[25].mxu1 }
 0x147   : > { %v1537_v29 = vadd.f32 %v1536_v28, %v1457_v13 }
 0x149   : > { %v1545_v30 = vld [vmem:[#allocation2] sm:$0xff] }
 0x14a   : > { %v1547_v31 = vmax.f32 %v1545_v30, %v1537_v29 }
 0x14b   : > { %v1546_v32 = vld [vmem:[#allocation2 + $0x8] sm:$0xff]  ;;  %v1745_v34 = vpop.f32.mrb[24].mxu0 }
 0x14c   : > { %v1548_v33 = vmax.f32 %v1546_v32, %v1542_v27  ;;  %1549 = vst.msk [vmem:[#allocation2] sm:$0xff] %vm410_vm3, %v1547_v31  ;;  %v2646_v35 = vpop.f32.mrb[25].mxu0 }
 0x14d   : > { %v1748_v36 = vpop.f32.mrb[26].mxu0 }
 0x14e   : > { %1550 = vst.msk [vmem:[#allocation2 + $0x8] sm:$0xff] %vm410_vm3, %v1548_v33  ;;  %v2647_v37 = vpop.f32.mrb[27].mxu0 }
 0x153   : > { %v1689_v41 = vld [vmem:[#allocation2] sm:$0xff]  ;;  %v2669_v43 = vpop.f32.mrb[28].mxu0 }
 0x154   : > { %v1968_v47 = vpop.f32.mrb[29].mxu0 }
 0x155   : > { %v1601_v38 = vpop.f32.mrb[28].mxu1  ;;  %v1690_v48 = vld [vmem:[#allocation2 + $0x8] sm:$0xff] }
 0x156   : > { %v1681_v39 = vadd.f32 %v1680_v23, %v1601_v38  ;;  %v2629_v40 = vpop.f32.mrb[29].mxu1 }
 0x157   : > { %v1604_v42 = vpop.f32.mrb[30].mxu1 }
 0x158   : > { %v1691_v44 = vmax.f32 %v1689_v41, %v1681_v39  ;;  %v1686_v45 = vadd.f32 %v2635_v19, %v1604_v42  ;;  %v2630_v46 = vpop.f32.mrb[31].mxu1 }
 0x15a   : > { %1693 = vst.msk [vmem:[#allocation2] sm:$0xff] %vm410_vm3, %v1691_v44  ;;  %v1692_v49 = vmax.f32 %v1690_v48, %v1686_v45 }
 0x15c   : > { %1694 = vst.msk [vmem:[#allocation2 + $0x8] sm:$0xff] %vm410_vm3, %v1692_v49 }
 0x15d   : > { %v2652_v50 = vpop.f32.mrb[26].mxu1 }
 0x15e   : > { %v1830_v51 = vadd.f32 %v2652_v50, %v1748_v36  ;;  %v1824_v52 = vpop.f32.mrb[27].mxu1 }
 0x15f   : > { %v1825_v53 = vadd.f32 %v1824_v52, %v1745_v34 }
 0x161   : > { %v1833_v54 = vld [vmem:[#allocation2] sm:$0xff] }
 0x162   : > { %v1835_v55 = vmax.f32 %v1833_v54, %v1825_v53 }
 0x163   : > { %v1834_v56 = vld [vmem:[#allocation2 + $0x8] sm:$0xff]  ;;  %v2033_v58 = vpop.f32.mrb[32].mxu0 }
 0x164   : > { %v1836_v57 = vmax.f32 %v1834_v56, %v1830_v51  ;;  %1837 = vst.msk [vmem:[#allocation2] sm:$0xff] %vm410_vm3, %v1835_v55  ;;  %v2680_v59 = vpop.f32.mrb[33].mxu0 }
 0x165   : > { %v2036_v60 = vpop.f32.mrb[34].mxu0 }
 0x166   : > { %1838 = vst.msk [vmem:[#allocation2 + $0x8] sm:$0xff] %vm410_vm3, %v1836_v57  ;;  %v2681_v61 = vpop.f32.mrb[35].mxu0 }
 0x16b   : > { %v1977_v8 = vld [vmem:[#allocation2] sm:$0xff] }
 0x16d   : > { %v1889_v62 = vpop.f32.mrb[32].mxu1  ;;  %v1978_v4 = vld [vmem:[#allocation2 + $0x8] sm:$0xff] }
 0x16e   : > { %v1969_v63 = vadd.f32 %v1968_v47, %v1889_v62  ;;  %v2663_v7 = vpop.f32.mrb[33].mxu1 }
 0x16f   : > { %v1892_v9 = vpop.f32.mrb[34].mxu1 }
 0x170   : > { %v1979_v0 = vmax.f32 %v1977_v8, %v1969_v63  ;;  %v1974_v1 = vadd.f32 %v2669_v43, %v1892_v9  ;;  %v2664_v2 = vpop.f32.mrb[35].mxu1 }
 0x172   : > { %1981 = vst.msk [vmem:[#allocation2] sm:$0xff] %vm410_vm3, %v1979_v0  ;;  %v1980_v10 = vmax.f32 %v1978_v4, %v1974_v1 }
 0x174   : > { %1982 = vst.msk [vmem:[#allocation2 + $0x8] sm:$0xff] %vm410_vm3, %v1980_v10 }
 0x175   : > { %v2686_v11 = vpop.f32.mrb[36].mxu1 }
 0x176   : > { %v2118_v12 = vadd.f32 %v2686_v11, %v2036_v60  ;;  %v2112_v13 = vpop.f32.mrb[37].mxu1 }
 0x177   : > { %v2113_v3 = vadd.f32 %v2112_v13, %v2033_v58 }
 0x179   : > { %v2121_v5 = vld [vmem:[#allocation2] sm:$0xff] }
 0x17a   : > { %v2123_v14 = vmax.f32 %v2121_v5, %v2113_v3 }
 0x17b   : > { %v2122_v15 = vld [vmem:[#allocation2 + $0x8] sm:$0xff] }
 0x17c   : > { %v2124_v16 = vmax.f32 %v2122_v15, %v2118_v12  ;;  %2125 = vst.msk [vmem:[#allocation2] sm:$0xff] %vm410_vm3, %v2123_v14 }
 0x17e   : > { %2126 = vst.msk [vmem:[#allocation2 + $0x8] sm:$0xff] %vm410_vm3, %v2124_v16 }
 0x183   : > { %v2128_v6 = vld [vmem:[#allocation2] sm:$0xff] }
 0x184   : > { %v2136_v18 = vadd.f32 %v2382_v17, %v2128_v6 }
 0x185   : > { %v2129_v19 = vld [vmem:[#allocation2 + $0x8] sm:$0xff] }
 0x186   : > { %v2137_v20 = vadd.f32 %v2382_v17, %v2129_v19  ;;  %2138 = vst.msk [vmem:[%s361_s7] sm:$0xff] %vm410_vm3, %v2136_v18 }
 0x188   : > { %2139 = vst.msk [vmem:[%s361_s7 + $0x8] sm:$0xff] %vm410_vm3, %v2137_v20 }
 0x189 PF: > { %s16_s23 = sadd.s32 1, %s2753_s23   ;;  %s3239_s21 = smov %s2749_s22 }
 0x18a   : > { %p13_p5 = scmp.ge.s32.totalorder %s16_s23, 4   ;;  %s3240_s22 = smov %s3242_s24 }
 0x18c   :  { %15 = sbr.rel (!%p13_p5) target bundleno = 2 (0x2), region = 102 }

// kernel: point_rnn_forward.15
= control target key start
LH: loop header
LB: loop body
LE: loop exit
PB: predicated region body
PF: predicated region fallthrough
CT: control target
= control target key end

     0   :  { %s2145_s27 = smov 0   ;;  %s2147_s28 = smov 0   ;;  %s2515_s0 = inlined_call_operand.vmem [shape: f32[2,8,8,3], index: 0, kind: input, shape index: {}]   ;;  %s2516_s1 = inlined_call_operand.vmem [shape: bf16[2,8,8,128], index: 1, kind: input, shape index: {}]   ;;  %s2517_s2 = inlined_call_operand.vmem [shape: f32[2,8,3], index: 2, kind: input, shape index: {}]   ;;  %s2518_s3 = inlined_call_operand.vmem [shape: bf16[2,8,64], index: 3, kind: input, shape index: {}]   ;;  %s2519_s4 = inlined_call_operand.vmem [shape: f32[3,128], index: 4, kind: input, shape index: {}]   ;;  %s2520_s5 = inlined_call_operand.vmem [shape: bf16[64,128], index: 5, kind: input, shape index: {}]   ;;  %s2521_s6 = inlined_call_operand.vmem [shape: bf16[128,128], index: 6, kind: input, shape index: {}]   ;;  %s2522_s7 = inlined_call_operand.vmem [shape: f32[1,128], index: 7, kind: input, shape index: {}]   ;;  %s2523_s8 = inlined_call_operand.vmem [shape: f32[2,8,128], index: 8, kind: output, shape index: {}]  }
   0x1   :  { %s2149_s29 = smov 0  }
   0x2 LB: > { %s30_s30 = sadd.s32 1, %s2092_s28  ;;  %p1675_p0 = scmp.ge.s32.totalorder %s2096_s29, 1  ;;  %s2096_s29 = sphi %s2149_s29, %s18_s29   ;;  %s2092_s28 = sphi %s2147_s28, %s2525_s28   ;;  %s2088_s27 = sphi %s2145_s27, %s2524_s27  }
   0x3   : > { %p32_p1 = scmp.ge.s32.totalorder %s30_s30, 2  ;;  %p324_p2 = scmp.lt.s32.totalorder %s2096_s29, 3 }
   0x5   : > { %s2527_s30 = smov (%p32_p1, %s30_s30), 0  ;;  %p325_p3 = pnand %p1675_p0, %p324_p2 }
   0x6   : > { %v2166_v0 = vld [vmem:[%s2521_s6] sm:$0xff] (!%p325_p3)   ;;  %v2098_v1 = vmov (!%p325_p3), 0.0   ;;  %vm536_vm0 = vcmask (!%p325_p3), 1042432   ;;  %v2174_v2 = vld [vmem:[%s2521_s6 + $0x8] sm:$0xff] (!%p325_p3)   ;;  %p385_p4 = scmp.lt.s32.totalorder (!%p325_p3), %s2088_s27, 1  ;;  %vm2099_vm1 = vmmov (!%p325_p3), 0  }
   0x7   : > { %328 = sbr.rel (%p325_p3) target bundleno = 398 (0x18e), region = 52  ;;  %1824 = vmatprep.subr.bf16.mxu0 (!%p325_p3), %v2098_v1  ;;  %1844 = vmatprep.subr.mxu1 (!%p325_p3), %v2098_v1  ;;  %v2179_v3 = vld [vmem:[%s2519_s4] sm:$0x7] (!%p325_p3)  ;;  %v2197_v4 = vld [vmem:[%s2521_s6 + $0x10] sm:$0xff] (!%p325_p3)   ;;  %vm532_vm2 = vcmask (!%p325_p3), 23552   ;;  %v2218_v8 = vld [vmem:[%s2521_s6 + $0x18] sm:$0xff] (!%p325_p3)  }
   0x8   : > { %1825 = vmatpush3.bf16.msra.mxu0 (!%p325_p3), %v2166_v0  ;;  %1845 = vmatpush3.msk.msra.mxu1 (!%p325_p3), %vm536_vm0, %v2179_v3  ;;  %v2232_v11 = vld [vmem:[%s2521_s6 + $0x20] sm:$0xff] (!%p325_p3)   ;;  %v2259_v18 = vld [vmem:[%s2521_s6 + $0x28] sm:$0xff] (!%p325_p3)   ;;  %v2268_v19 = vld [vmem:[%s2521_s6 + $0x30] sm:$0xff] (!%p325_p3)   ;;  %vm1492_vm3 = vcmask (!%p325_p3), 523264  }
   0x9   : > { %1826 = vmatprep.subr.bf16.mxu0 (!%p325_p3), %v2098_v1  ;;  %1846 = vmatprep.mubr.msk.f32.mxu1 (!%p325_p3), %vm2099_vm1, %v2098_v1  ;;  %v2283_v22 = vld [vmem:[%s2521_s6 + $0x38] sm:$0xff] (!%p325_p3)   ;;  %v2070_v34 = vld [vmem:[%s2520_s5] sm:$0xff] (!%p325_p3)   ;;  %v2071_v35 = vld [vmem:[%s2520_s5 + $0x8] sm:$0xff] (!%p325_p3)  }
   0xa   : > { %1849 = vmatprep.subr.bf16.mxu1 (!%p325_p3), %v2098_v1  ;;  %1840 = vmatprep.mubr.msk.bf16.mxu0 (!%p325_p3), %vm2099_vm1, %v2098_v1  ;;  %v2072_v37 = vld [vmem:[%s2520_s5 + $0x10] sm:$0xff] (!%p325_p3)   ;;  %v2073_v38 = vld [vmem:[%s2520_s5 + $0x18] sm:$0xff] (!%p325_p3)  }
   0xc   : > { %1827 = vmatpush3.bf16.msra.mxu0 (!%p325_p3), %v2174_v2 }
   0xd   : > { %1828 = vmatprep.subr.bf16.mxu0 (!%p325_p3), %v2098_v1 }
   0xe   : > { %s2529_s27 = smov (!%p385_p4, %s2088_s27), 1 }
   0xf   : > { %s1729_s15 = sshll.u32 %s2529_s27, 6  ;;  %s1680_s16 = sshll.u32 %s2529_s27, 3 }
  0x10   : > { %s2202_s21 = scalar_lea.vmem %s2515_s0, %s1729_s15  ;;  %s407_s24 = scalar_lea.vmem %s2517_s2, %s1680_s16  ;;  %1829 = vmatpush3.bf16.msra.mxu0 %v2197_v4 }
  0x11   : > { %v2210_v5 = vld [vmem:[%s407_s24] sm:$0xff]  ;;  %1830 = vmatprep.subr.bf16.mxu0 %v2098_v1  ;;  %v2223_v9 = vld [vmem:[%s2202_s21 + $0x18] sm:$0xff]  ;;  %v2241_v14 = vld [vmem:[%s2202_s21 + $0x28] sm:$0xff]  ;;  %s1730_s15 = sshll.u32 %s2529_s27, 5  ;;  %s1681_s10 = sshll.u32 %s2529_s27, 2 }
  0x12   : > { %v441_v6 = vld [vmem:[%s2202_s21] sm:$0xff]  ;;  %v855_v12 = vsub.f32 %v2223_v9, %v2210_v5  ;;  %v1097_v15 = vsub.f32 %v2241_v14, %v2210_v5  ;;  %v2247_v16 = vld [vmem:[%s2202_s21 + $0x30] sm:$0xff]  ;;  %v2272_v20 = vld [vmem:[%s2202_s21 + $0x38] sm:$0xff]  ;;  %s2289_s22 = scalar_lea.vmem %s2516_s1, %s1730_s15  ;;  %s414_s15 = scalar_lea.vmem %s2518_s3, %s1681_s10 }
  0x13   : > { %v442_v7 = vsub.f32 %v441_v6, %v2210_v5  ;;  %v2226_v10 = vld [vmem:[%s2202_s21 + $0x20] sm:$0xff]  ;;  %v1218_v17 = vsub.f32 %v2247_v16, %v2210_v5  ;;  %v1339_v21 = vsub.f32 %v2272_v20, %v2210_v5  ;;  %v1693_v24 = vld [vmem:[%s2202_s21 + $0x8] sm:$0xff]  ;;  %v1697_v26 = vld [vmem:[%s2202_s21 + $0x10] sm:$0xff] }
  0x14   : > { %v976_v13 = vsub.f32 %v2226_v10, %v2210_v5  ;;  %1831 = vmatpush3.bf16.msra.mxu0 %v2218_v8  ;;  %v443_v23 = vld [vmem:[%s2289_s22] sm:$0xf]  ;;  %v613_v25 = vsub.f32 %v1693_v24, %v2210_v5  ;;  %v1694_v27 = vld [vmem:[%s2289_s22 + $0x4] sm:$0xf]  ;;  %v734_v28 = vsub.f32 %v1697_v26, %v2210_v5  ;;  %v1698_v29 = vld [vmem:[%s2289_s22 + $0x8] sm:$0xf] }
  0x15   : > { %1847 = vmatmul.mubr.msk.f32.vlgmr.msra.gmra.mrb[0].mxu1 %vm532_vm2, %v442_v7  ;;  %1832 = vmatprep.subr.bf16.mxu0 %v2098_v1  ;;  %v1702_v30 = vld [vmem:[%s2289_s22 + $0xc] sm:$0xf]  ;;  %v1706_v31 = vld [vmem:[%s2289_s22 + $0x10] sm:$0xf]  ;;  %v1710_v32 = vld [vmem:[%s2289_s22 + $0x14] sm:$0xf] }
  0x16   : > { %1850 = vmatpush3.bf16.msra.mxu1 %v2166_v0  ;;  %1865 = vmatprep.mubr.msk.bf16.mxu1 %vm2099_vm1, %v2098_v1  ;;  %v1714_v33 = vld [vmem:[%s2289_s22 + $0x18] sm:$0xf]  ;;  %v1718_v36 = vld [vmem:[%s2289_s22 + $0x1c] sm:$0xf]  ;;  %v1459_v39 = vld [vmem:[%s414_s15] sm:$0xf]  ;;  %s421_s22 = scalar_lea.vmem %s2523_s8, %s1680_s16 }
  0x17   : > { %1851 = vmatprep.subr.bf16.mxu1 %v2098_v1 }
  0x18   : > { %1833 = vmatpush3.bf16.msra.mxu0 %v2232_v11 }
  0x19   : > { %1834 = vmatprep.subr.bf16.mxu0 %v2098_v1 }
  0x1a   : > { %1852 = vmatpush3.bf16.msra.mxu1 %v2174_v2 }
  0x1b   : > { %1853 = vmatprep.subr.bf16.mxu1 %v2098_v1 }
  0x1c   : > { %1835 = vmatpush3.bf16.msra.mxu0 %v2259_v18 }
  0x1d   : > { %1836 = vmatprep.subr.bf16.mxu0 %v2098_v1 }
  0x1e   : > { %1854 = vmatpush3.bf16.msra.mxu1 %v2197_v4 }
  0x1f   : > { %1855 = vmatprep.subr.bf16.mxu1 %v2098_v1 }
  0x20   : > { %1837 = vmatpush3.bf16.msra.mxu0 %v2268_v19 }
  0x21   : > { %1838 = vmatprep.subr.bf16.mxu0 %v2098_v1 }
  0x22   : > { %1856 = vmatpush3.bf16.msra.mxu1 %v2218_v8 }
  0x23   : > { %1857 = vmatprep.subr.bf16.mxu1 %v2098_v1 }
  0x24   : > { %1839 = vmatpush3.bf16.msra.mxu0 %v2283_v22 }
  0x25   : > { %1869 = vmatprep.subr.mxu0 %v2098_v1 }
  0x26   : > { %1858 = vmatpush3.bf16.msra.mxu1 %v2232_v11 }
  0x27   : > { %1859 = vmatprep.subr.bf16.mxu1 %v2098_v1  ;;  %1841 = vmatmul.mubr.bf16.vlgmr.msra.gmra.mrb[0].mxu0 %v443_v23 }
  0x28   : > { %1870 = vmatpush3.msk.msra.mxu0 %vm536_vm0, %v2179_v3  ;;  %1871 = vmatprep.mubr.msk.f32.mxu0 %vm2099_vm1, %v2098_v1 }
  0x29   : > { %1894 = vmatprep.subr.mxu0 %v2098_v1 }
  0x2a   : > { %1860 = vmatpush3.bf16.msra.mxu1 %v2259_v18 }
  0x2b   : > { %1861 = vmatprep.subr.bf16.mxu1 %v2098_v1 }
  0x2e   : > { %1862 = vmatpush3.bf16.msra.mxu1 %v2268_v19 }
  0x2f   : > { %1863 = vmatprep.subr.bf16.mxu1 %v2098_v1  ;;  %1872 = vmatmul.mubr.msk.f32.vlgmr.msra.gmra.mrb[4].mxu0 %vm532_vm2, %v613_v25 }
  0x30   : > { %1895 = vmatpush3.msk.msra.mxu0 %vm536_vm0, %v2179_v3  ;;  %1896 = vmatprep.mubr.msk.f32.mxu0 %vm2099_vm1, %v2098_v1 }
  0x31   : > { %1899 = vmatprep.subr.bf16.mxu0 %v2098_v1 }
  0x32   : > { %1864 = vmatpush3.bf16.msra.mxu1 %v2283_v22 }
  0x33   : > { %1874 = vmatprep.subr.bf16.mxu1 %v2098_v1  ;;  %1897 = vmatmul.mubr.msk.f32.vlgmr.msra.gmra.mrb[6].mxu0 %vm532_vm2, %v734_v28 }
  0x34   : > { %1900 = vmatpush3.bf16.msra.mxu0 %v2166_v0  ;;  %1915 = vmatprep.mubr.msk.bf16.mxu0 %vm2099_vm1, %v2098_v1 }
  0x35   : > { %1866 = vmatmul.mubr.bf16.vlgmr.msra.gmra.mrb[4].mxu1 %v1694_v27  ;;  %1901 = vmatprep.subr.bf16.mxu0 %v2098_v1 }
  0x36   : > { %1875 = vmatpush3.bf16.msra.mxu1 %v2166_v0  ;;  %1890 = vmatprep.mubr.msk.bf16.mxu1 %vm2099_vm1, %v2098_v1 }
  0x37   : > { %1876 = vmatprep.subr.bf16.mxu1 %v2098_v1 }
  0x38   : > { %1902 = vmatpush3.bf16.msra.mxu0 %v2174_v2 }
  0x39   : > { %1903 = vmatprep.subr.bf16.mxu0 %v2098_v1 }
  0x3a   : > { %1877 = vmatpush3.bf16.msra.mxu1 %v2174_v2 }
  0x3b   : > { %1878 = vmatprep.subr.bf16.mxu1 %v2098_v1 }
  0x3c   : > { %1904 = vmatpush3.bf16.msra.mxu0 %v2197_v4 }
  0x3d   : > { %1905 = vmatprep.subr.bf16.mxu0 %v2098_v1 }
  0x3e   : > { %1879 = vmatpush3.bf16.msra.mxu1 %v2197_v4 }
  0x3f   : > { %1880 = vmatprep.subr.bf16.mxu1 %v2098_v1 }
  0x40   : > { %1906 = vmatpush3.bf16.msra.mxu0 %v2218_v8 }
  0x41   : > { %1907 = vmatprep.subr.bf16.mxu0 %v2098_v1 }
  0x42   : > { %1881 = vmatpush3.bf16.msra.mxu1 %v2218_v8 }
  0x43   : > { %1882 = vmatprep.subr.bf16.mxu1 %v2098_v1 }
  0x44   : > { %1908 = vmatpush3.bf16.msra.mxu0 %v2232_v11 }
  0x45   : > { %1909 = vmatprep.subr.bf16.mxu0 %v2098_v1 }
  0x46   : > { %1883 = vmatpush3.bf16.msra.mxu1 %v2232_v11 }
  0x47   : > { %1884 = vmatprep.subr.bf16.mxu1 %v2098_v1 }
  0x48   : > { %1910 = vmatpush3.bf16.msra.mxu0 %v2259_v18 }
  0x49   : > { %1911 = vmatprep.subr.bf16.mxu0 %v2098_v1 }
  0x4a   : > { %1885 = vmatpush3.bf16.msra.mxu1 %v2259_v18 }
  0x4b   : > { %1886 = vmatprep.subr.bf16.mxu1 %v2098_v1 }
  0x4c   : > { %1912 = vmatpush3.bf16.msra.mxu0 %v2268_v19 }
  0x4d   : > { %1913 = vmatprep.subr.bf16.mxu0 %v2098_v1 }
  0x4e   : > { %1887 = vmatpush3.bf16.msra.mxu1 %v2268_v19 }
  0x4f   : > { %1888 = vmatprep.subr.bf16.mxu1 %v2098_v1 }
  0x50   : > { %1914 = vmatpush3.bf16.msra.mxu0 %v2283_v22 }
  0x51   : > { %1919 = vmatprep.subr.mxu0 %v2098_v1 }
  0x52   : > { %1889 = vmatpush3.bf16.msra.mxu1 %v2283_v22 }
  0x53   : > { %1924 = vmatprep.subr.bf16.mxu1 %v2098_v1  ;;  %1916 = vmatmul.mubr.bf16.vlgmr.msra.gmra.mrb[8].mxu0 %v1702_v30 }
  0x54   : > { %1920 = vmatpush3.msk.msra.mxu0 %vm536_vm0, %v2179_v3  ;;  %1921 = vmatprep.mubr.msk.f32.mxu0 %vm2099_vm1, %v2098_v1 }
  0x55   : > { %1891 = vmatmul.mubr.bf16.vlgmr.msra.gmra.mrb[8].mxu1 %v1698_v29  ;;  %1944 = vmatprep.subr.mxu0 %v2098_v1 }
  0x56   : > { %1925 = vmatpush3.bf16.msra.mxu1 %v2166_v0  ;;  %1940 = vmatprep.mubr.msk.bf16.mxu1 %vm2099_vm1, %v2098_v1 }
  0x57   : > { %1926 = vmatprep.subr.bf16.mxu1 %v2098_v1 }
  0x5a   : > { %1927 = vmatpush3.bf16.msra.mxu1 %v2174_v2 }
  0x5b   : > { %1928 = vmatprep.subr.bf16.mxu1 %v2098_v1  ;;  %1922 = vmatmul.mubr.msk.f32.vlgmr.msra.gmra.mrb[12].mxu0 %vm532_vm2, %v855_v12 }
  0x5c   : > { %1945 = vmatpush3.msk.msra.mxu0 %vm536_vm0, %v2179_v3  ;;  %1946 = vmatprep.mubr.msk.f32.mxu0 %vm2099_vm1, %v2098_v1 }
  0x5d   : > { %1949 = vmatprep.subr.bf16.mxu0 %v2098_v1 }
  0x5e   : > { %1929 = vmatpush3.bf16.msra.mxu1 %v2197_v4 }
  0x5f   : > { %1930 = vmatprep.subr.bf16.mxu1 %v2098_v1  ;;  %1947 = vmatmul.mubr.msk.f32.vlgmr.msra.gmra.mrb[14].mxu0 %vm532_vm2, %v976_v13 }
  0x60   : > { %1950 = vmatpush3.bf16.msra.mxu0 %v2166_v0  ;;  %1965 = vmatprep.mubr.msk.bf16.mxu0 %vm2099_vm1, %v2098_v1 }
  0x61   : > { %1951 = vmatprep.subr.bf16.mxu0 %v2098_v1 }
  0x62   : > { %1931 = vmatpush3.bf16.msra.mxu1 %v2218_v8 }
  0x63   : > { %1932 = vmatprep.subr.bf16.mxu1 %v2098_v1 }
  0x64   : > { %1952 = vmatpush3.bf16.msra.mxu0 %v2174_v2 }
  0x65   : > { %1953 = vmatprep.subr.bf16.mxu0 %v2098_v1 }
  0x66   : > { %1933 = vmatpush3.bf16.msra.mxu1 %v2232_v11 }
  0x67   : > { %1934 = vmatprep.subr.bf16.mxu1 %v2098_v1 }
  0x68   : > { %1954 = vmatpush3.bf16.msra.mxu0 %v2197_v4 }
  0x69   : > { %1955 = vmatprep.subr.bf16.mxu0 %v2098_v1 }
  0x6a   : > { %1935 = vmatpush3.bf16.msra.mxu1 %v2259_v18 }
  0x6b   : > { %1936 = vmatprep.subr.bf16.mxu1 %v2098_v1 }
  0x6c   : > { %1956 = vmatpush3.bf16.msra.mxu0 %v2218_v8 }
  0x6d   : > { %1957 = vmatprep.subr.bf16.mxu0 %v2098_v1 }
  0x6e   : > { %1937 = vmatpush3.bf16.msra.mxu1 %v2268_v19 }
  0x6f   : > { %1938 = vmatprep.subr.bf16.mxu1 %v2098_v1 }
  0x70   : > { %1958 = vmatpush3.bf16.msra.mxu0 %v2232_v11 }
  0x71   : > { %1959 = vmatprep.subr.bf16.mxu0 %v2098_v1 }
  0x72   : > { %1939 = vmatpush3.bf16.msra.mxu1 %v2283_v22 }
  0x73   : > { %1969 = vmatprep.subr.mxu1 %v2098_v1 }
  0x74   : > { %1960 = vmatpush3.bf16.msra.mxu0 %v2259_v18 }
  0x75   : > { %1941 = vmatmul.mubr.bf16.vlgmr.msra.gmra.mrb[12].mxu1 %v1706_v31  ;;  %1961 = vmatprep.subr.bf16.mxu0 %v2098_v1 }
  0x76   : > { %1970 = vmatpush3.msk.msra.mxu1 %vm536_vm0, %v2179_v3  ;;  %1971 = vmatprep.mubr.msk.f32.mxu1 %vm2099_vm1, %v2098_v1 }
  0x77   : > { %1974 = vmatprep.subr.bf16.mxu1 %v2098_v1 }
  0x78   : > { %1962 = vmatpush3.bf16.msra.mxu0 %v2268_v19 }
  0x79   : > { %1963 = vmatprep.subr.bf16.mxu0 %v2098_v1 }
  0x7c   : > { %1964 = vmatpush3.bf16.msra.mxu0 %v2283_v22 }
  0x7d   : > { %1972 = vmatmul.mubr.msk.f32.vlgmr.msra.gmra.mrb[2].mxu1 %vm532_vm2, %v1097_v15  ;;  %1994 = vmatprep.subr.mxu0 %v2098_v1 }
  0x7e   : > { %1975 = vmatpush3.bf16.msra.mxu1 %v2166_v0  ;;  %1990 = vmatprep.mubr.msk.bf16.mxu1 %vm2099_vm1, %v2098_v1 }
  0x7f   : > { %1976 = vmatprep.subr.bf16.mxu1 %v2098_v1  ;;  %1966 = vmatmul.mubr.bf16.vlgmr.msra.gmra.mrb[16].mxu0 %v1710_v32 }
  0x80   : > { %1995 = vmatpush3.msk.msra.mxu0 %vm536_vm0, %v2179_v3  ;;  %1996 = vmatprep.mubr.msk.f32.mxu0 %vm2099_vm1, %v2098_v1 }
  0x81   : > { %1999 = vmatprep.subr.bf16.mxu0 %v2098_v1 }
  0x82   : > { %1977 = vmatpush3.bf16.msra.mxu1 %v2174_v2 }
  0x83   : > { %1978 = vmatprep.subr.bf16.mxu1 %v2098_v1 }
  0x86   : > { %1979 = vmatpush3.bf16.msra.mxu1 %v2197_v4 }
  0x87   : > { %1980 = vmatprep.subr.bf16.mxu1 %v2098_v1  ;;  %1997 = vmatmul.mubr.msk.f32.vlgmr.msra.gmra.mrb[20].mxu0 %vm532_vm2, %v1218_v17 }
  0x88   : > { %2000 = vmatpush3.bf16.msra.mxu0 %v2166_v0  ;;  %2015 = vmatprep.mubr.msk.bf16.mxu0 %vm2099_vm1, %v2098_v1 }
  0x89   : > { %2001 = vmatprep.subr.bf16.mxu0 %v2098_v1 }
  0x8a   : > { %1981 = vmatpush3.bf16.msra.mxu1 %v2218_v8 }
  0x8b   : > { %1982 = vmatprep.subr.bf16.mxu1 %v2098_v1 }
  0x8c   : > { %2002 = vmatpush3.bf16.msra.mxu0 %v2174_v2 }
  0x8d   : > { %2003 = vmatprep.subr.bf16.mxu0 %v2098_v1 }
  0x8e   : > { %1983 = vmatpush3.bf16.msra.mxu1 %v2232_v11 }
  0x8f   : > { %1984 = vmatprep.subr.bf16.mxu1 %v2098_v1 }
  0x90   : > { %2004 = vmatpush3.bf16.msra.mxu0 %v2197_v4 }
  0x91   : > { %2005 = vmatprep.subr.bf16.mxu0 %v2098_v1 }
  0x92   : > { %1985 = vmatpush3.bf16.msra.mxu1 %v2259_v18 }
  0x93   : > { %1986 = vmatprep.subr.bf16.mxu1 %v2098_v1 }
  0x94   : > { %2006 = vmatpush3.bf16.msra.mxu0 %v2218_v8 }
  0x95   : > { %2007 = vmatprep.subr.bf16.mxu0 %v2098_v1 }
  0x96   : > { %1987 = vmatpush3.bf16.msra.mxu1 %v2268_v19 }
  0x97   : > { %1988 = vmatprep.subr.bf16.mxu1 %v2098_v1 }
  0x98   : > { %2008 = vmatpush3.bf16.msra.mxu0 %v2232_v11 }
  0x99   : > { %2009 = vmatprep.subr.bf16.mxu0 %v2098_v1 }
  0x9a   : > { %1989 = vmatpush3.bf16.msra.mxu1 %v2283_v22 }
  0x9b   : > { %2019 = vmatprep.subr.mxu1 %v2098_v1 }
  0x9c   : > { %2010 = vmatpush3.bf16.msra.mxu0 %v2259_v18 }
  0x9d   : > { %1991 = vmatmul.mubr.bf16.vlgmr.msra.gmra.mrb[16].mxu1 %v1714_v33  ;;  %2011 = vmatprep.subr.bf16.mxu0 %v2098_v1 }
  0x9e   : > { %2020 = vmatpush3.msk.msra.mxu1 %vm536_vm0, %v2179_v3  ;;  %2021 = vmatprep.mubr.msk.f32.mxu1 %vm2099_vm1, %v2098_v1 }
  0x9f   : > { %2024 = vmatprep.subr.bf16.mxu1 %v2098_v1 }
  0xa0   : > { %2012 = vmatpush3.bf16.msra.mxu0 %v2268_v19 }
  0xa1   : > { %2013 = vmatprep.subr.bf16.mxu0 %v2098_v1 }
  0xa4   : > { %2014 = vmatpush3.bf16.msra.mxu0 %v2283_v22 }
  0xa5   : > { %2022 = vmatmul.mubr.msk.f32.vlgmr.msra.gmra.mrb[20].mxu1 %vm532_vm2, %v1339_v21 }
  0xa6   : > { %2025 = vmatpush3.bf16.msra.mxu1 %v2070_v34  ;;  %2032 = vmatprep.mubr.msk.bf16.mxu1 %vm2099_vm1, %v2098_v1 }
  0xa7   : > { %2026 = vmatprep.subr.bf16.mxu1 %v2098_v1  ;;  %2016 = vmatmul.mubr.bf16.vlgmr.msra.gmra.mrb[24].mxu0 %v1718_v36 }
  0xaa   : > { %2027 = vmatpush3.bf16.msra.mxu1 %v2071_v35 }
  0xab   : > { %2028 = vmatprep.subr.bf16.mxu1 %v2098_v1 }
  0xae   : > { %2029 = vmatpush3.bf16.msra.mxu1 %v2072_v37 }
  0xaf   : > { %2030 = vmatprep.subr.bf16.mxu1 %v2098_v1 }
  0xb2   : > { %2031 = vmatpush3.bf16.msra.mxu1 %v2073_v38 }
  0xb5   : > { %2033 = vmatmul.mubr.msk.bf16.vlgmr.msra.gmra.mrb[24].mxu1 %vm1492_vm3, %v1459_v39  ;;  %v1726_v39 = vld [vmem:[%s2522_s7] ss:$0 sm:$0xff] }
  0xe8   : > { %v606_v40 = vpop.f32.mrb[0].mxu1 }
  0xe9   : > { %v1848_v41 = vpop.f32.mrb[1].mxu1 }
  0xfa   : > { %v526_v42 = vpop.f32.mrb[0].mxu0 }
  0xfb   : > { %v607_v43 = vadd.f32 %v606_v40, %v526_v42  ;;  %v1842_v44 = vpop.f32.mrb[1].mxu0 }
  0xfc   : > { %v529_v45 = vpop.f32.mrb[2].mxu0 }
  0xfd   : > { %v1843_v46 = vpop.f32.mrb[3].mxu0 }
 0x102   : > { %v725_v47 = vpop.f32.mrb[4].mxu0 }
 0x103   : > { %v1873_v48 = vpop.f32.mrb[5].mxu0 }
 0x106   : > { %v846_v53 = vpop.f32.mrb[6].mxu0 }
 0x107   : > { %v1898_v56 = vpop.f32.mrb[7].mxu0 }
 0x108   : > { %v650_v49 = vpop.f32.mrb[4].mxu1 }
 0x109   : > { %v1867_v50 = vpop.f32.mrb[5].mxu1  ;;  %v726_v51 = vadd.f32 %v725_v47, %v650_v49 }
 0x10a   : > { %v653_v52 = vpop.f32.mrb[6].mxu1 }
 0x10b   : > { %v730_v54 = vmax.f32 %v607_v43, %v726_v51  ;;  %v1868_v55 = vpop.f32.mrb[7].mxu1 }
 0x126   : > { %v892_v61 = vpop.f32.mrb[8].mxu0 }
 0x127   : > { %v1917_v0 = vpop.f32.mrb[9].mxu0 }
 0x128   : > { %v771_v57 = vpop.f32.mrb[8].mxu1  ;;  %v895_v1 = vpop.f32.mrb[10].mxu0 }
 0x129   : > { %v847_v58 = vadd.f32 %v846_v53, %v771_v57  ;;  %v1892_v59 = vpop.f32.mrb[9].mxu1  ;;  %v1918_v2 = vpop.f32.mrb[11].mxu0 }
 0x12a   : > { %v774_v60 = vpop.f32.mrb[10].mxu1 }
 0x12b   : > { %v851_v62 = vmax.f32 %v730_v54, %v847_v58  ;;  %v1893_v63 = vpop.f32.mrb[11].mxu1 }
 0x12e   : > { %v967_v3 = vpop.f32.mrb[12].mxu0 }
 0x12f   : > { %v968_v4 = vadd.f32 %v967_v3, %v892_v61  ;;  %v1923_v5 = vpop.f32.mrb[13].mxu0 }
 0x131   : > { %v972_v6 = vmax.f32 %v851_v62, %v968_v4 }
 0x132   : > { %v1088_v7 = vpop.f32.mrb[14].mxu0 }
 0x133   : > { %v1948_v8 = vpop.f32.mrb[15].mxu0 }
 0x148   : > { %v1013_v9 = vpop.f32.mrb[12].mxu1 }
 0x149   : > { %v1089_v10 = vadd.f32 %v1088_v7, %v1013_v9  ;;  %v1942_v11 = vpop.f32.mrb[13].mxu1 }
 0x14a   : > { %v1016_v12 = vpop.f32.mrb[14].mxu1 }
 0x14b   : > { %v1093_v13 = vmax.f32 %v972_v6, %v1089_v10  ;;  %v1943_v14 = vpop.f32.mrb[15].mxu1 }
 0x150   : > { %v1209_v15 = vpop.f32.mrb[2].mxu1 }
 0x151   : > { %v1973_v16 = vpop.f32.mrb[3].mxu1 }
 0x152   : > { %v1134_v17 = vpop.f32.mrb[16].mxu0 }
 0x153   : > { %v1210_v18 = vadd.f32 %v1209_v15, %v1134_v17  ;;  %v1967_v19 = vpop.f32.mrb[17].mxu0 }
 0x154   : > { %v1137_v20 = vpop.f32.mrb[18].mxu0 }
 0x155   : > { %v1214_v21 = vmax.f32 %v1093_v13, %v1210_v18  ;;  %v1968_v22 = vpop.f32.mrb[19].mxu0 }
 0x15a   : > { %v1330_v23 = vpop.f32.mrb[20].mxu0 }
 0x15b   : > { %v1998_v24 = vpop.f32.mrb[21].mxu0 }
 0x170   : > { %v1255_v25 = vpop.f32.mrb[16].mxu1 }
 0x171   : > { %v1331_v26 = vadd.f32 %v1330_v23, %v1255_v25  ;;  %v1992_v27 = vpop.f32.mrb[17].mxu1 }
 0x172   : > { %v1258_v28 = vpop.f32.mrb[18].mxu1 }
 0x173   : > { %v1335_v29 = vmax.f32 %v1214_v21, %v1331_v26  ;;  %v1993_v30 = vpop.f32.mrb[19].mxu1 }
 0x178   : > { %v1451_v31 = vpop.f32.mrb[20].mxu1 }
 0x179   : > { %v2023_v32 = vpop.f32.mrb[21].mxu1 }
 0x17a   : > { %v1376_v33 = vpop.f32.mrb[24].mxu0 }
 0x17b   : > { %v1452_v34 = vadd.f32 %v1451_v31, %v1376_v33  ;;  %v2017_v35 = vpop.f32.mrb[25].mxu0 }
 0x17c   : > { %v1379_v36 = vpop.f32.mrb[26].mxu0 }
 0x17d   : > { %v1456_v37 = vmax.f32 %v1335_v29, %v1452_v34  ;;  %v2018_v38 = vpop.f32.mrb[27].mxu0 }
 0x188   : > { %v1530_v40 = vpop.f32.mrb[24].mxu1 }
 0x189   : > { %v1542_v41 = vadd.f32 %v1726_v39, %v1530_v40  ;;  %v2034_v42 = vpop.f32.mrb[25].mxu1 }
 0x18a   : > { %v1533_v43 = vpop.f32.mrb[26].mxu1 }
 0x18b   : > { %v1544_v44 = vadd.f32 %v1542_v41, %v1456_v37  ;;  %v2035_v45 = vpop.f32.mrb[27].mxu1 }
 0x18d   : > { %1545 = vst [vmem:[%s421_s22] sm:$0xff] %v1544_v44 }
 0x18e PF: > { %s18_s29 = sadd.s32 1, %s2096_s29   ;;  %s2524_s27 = smov %s2092_s28 }
 0x18f   : > { %p15_p5 = scmp.ge.s32.totalorder %s18_s29, 4   ;;  %s2525_s28 = smov %s2527_s30 }
 0x191   :  { %17 = sbr.rel (!%p15_p5) target bundleno = 2 (0x2), region = 105 }

// kernel: custom-call.117
= control target key start
LH: loop header
LB: loop body
LE: loop exit
PB: predicated region body
PF: predicated region fallthrough
CT: control target
= control target key end

     0   :  { %s6_s0 = inlined_call_operand.vmem [shape: f32[2,8], index: 0, kind: output, shape index: {}]  }

// kernel: neg.12
= control target key start
LH: loop header
LB: loop body
LE: loop exit
PB: predicated region body
PF: predicated region fallthrough
CT: control target
= control target key end

     0   :  { %s40_s0 = inlined_call_operand.vmem [shape: f32[2,8,4], index: 0, kind: input, shape index: {}]   ;;  %s41_s1 = inlined_call_operand.vmem [shape: f32[2,8,4], index: 1, kind: output, shape index: {}]  }
   0x1   :  { %v2_v0 = vld [vmem:[%s40_s0] sm:$0xf]  ;;  %v16_v1 = vld [vmem:[%s40_s0 + $0x4] sm:$0xf] }
   0x2   :  { %v5_v2 = vxor.u32 2147483648, %v2_v0  ;;  %v12_v3 = vxor.u32 2147483648, %v16_v1 }
   0x4   :  { %7 = vst [vmem:[%s41_s1] sm:$0xf] %v5_v2  ;;  %17 = vst [vmem:[%s41_s1 + $0x4] sm:$0xf] %v12_v3 }

// kernel: neg.14
= control target key start
LH: loop header
LB: loop body
LE: loop exit
PB: predicated region body
PF: predicated region fallthrough
CT: control target
= control target key end

     0   :  { %s40_s0 = inlined_call_operand.vmem [shape: f32[2,16,8], index: 0, kind: input, shape index: {}]   ;;  %s41_s1 = inlined_call_operand.vmem [shape: f32[2,16,8], index: 1, kind: output, shape index: {}]  }
   0x1   :  { %v2_v0 = vld [vmem:[%s40_s0] sm:$0xff]  ;;  %v16_v1 = vld [vmem:[%s40_s0 + $0x8] sm:$0xff] }
   0x2   :  { %v5_v2 = vxor.u32 2147483648, %v2_v0  ;;  %v12_v3 = vxor.u32 2147483648, %v16_v1 }
   0x4   :  { %7 = vst [vmem:[%s41_s1] sm:$0xff] %v5_v2  ;;  %17 = vst [vmem:[%s41_s1 + $0x8] sm:$0xff] %v12_v3 }

// kernel: point_rnn_forward.16
= control target key start
LH: loop header
LB: loop body
LE: loop exit
PB: predicated region body
PF: predicated region fallthrough
CT: control target
= control target key end

     0   :  { %s1737_s27 = smov 0   ;;  %s1739_s28 = smov 0   ;;  %s2205_s0 = inlined_call_operand.vmem [shape: f32[2,4,4,3], index: 0, kind: input, shape index: {}]   ;;  %s2206_s1 = inlined_call_operand.vmem [shape: bf16[2,4,4,256], index: 1, kind: input, shape index: {}]   ;;  %s2207_s2 = inlined_call_operand.vmem [shape: f32[2,4,3], index: 2, kind: input, shape index: {}]   ;;  %s2208_s3 = inlined_call_operand.vmem [shape: bf16[2,4,128], index: 3, kind: input, shape index: {}]   ;;  %s2209_s4 = inlined_call_operand.vmem [shape: f32[3,256], index: 4, kind: input, shape index: {}]   ;;  %s2210_s5 = inlined_call_operand.vmem [shape: bf16[128,256], index: 5, kind: input, shape index: {}]   ;;  %s2211_s6 = inlined_call_operand.vmem [shape: bf16[256,256], index: 6, kind: input, shape index: {}]   ;;  %s2212_s7 = inlined_call_operand.vmem [shape: f32[1,256], index: 7, kind: input, shape index: {}]   ;;  %s2213_s8 = inlined_call_operand.vmem [shape: f32[2,4,256], index: 8, kind: output, shape index: {}]  }
   0x1   :  { %s1741_s29 = smov 0  }
   0x2 LB: > { %s30_s30 = sadd.s32 1, %s1684_s28  ;;  %p1483_p0 = scmp.ge.s32.totalorder %s1688_s29, 1  ;;  %s1688_s29 = sphi %s1741_s29, %s18_s29   ;;  %s1684_s28 = sphi %s1739_s28, %s2215_s28   ;;  %s1680_s27 = sphi %s1737_s27, %s2214_s27  }
   0x3   : > { %p32_p1 = scmp.ge.s32.totalorder %s30_s30, 2  ;;  %p325_p2 = scmp.lt.s32.totalorder %s1688_s29, 3 }
   0x5   : > { %s2217_s30 = smov (%p32_p1, %s30_s30), 0  ;;  %p326_p3 = pnand %p1483_p0, %p325_p2 }
   0x6   : > { %v1760_v0 = vld [vmem:[%s2211_s6 + $0x4] ss:$8 sps:$4 sm:$0xff] (!%p326_p3)   ;;  %v1765_v1 = vld [vmem:[%s2211_s6] ss:$8 sps:$4 sm:$0xff] (!%p326_p3)   ;;  %v1772_v2 = vld [vmem:[%s2211_s6 + $0x14] ss:$8 sps:$4 sm:$0xff] (!%p326_p3)  }
   0x7   : > { %329 = sbr.rel (%p326_p3) target bundleno = 387 (0x183), region = 52  ;;  %638 = vmatprep.subr.bf16.mxu0 (!%p326_p3), %v1760_v0  ;;  %782 = vmatprep.subr.bf16.mxu1 (!%p326_p3), %v1760_v0  ;;  %v1779_v3 = vld [vmem:[%s2211_s6 + $0x10] ss:$8 sps:$4 sm:$0xff] (!%p326_p3)   ;;  %v1786_v4 = vld [vmem:[%s2211_s6 + $0x24] ss:$8 sps:$4 sm:$0xff] (!%p326_p3)   ;;  %p389_p4 = scmp.lt.s32.totalorder (!%p326_p3), %s1680_s27, 1 }
   0x8   : > { %639 = vmatpush1.bf16.msra.mxu0 (!%p326_p3), %v1765_v1  ;;  %783 = vmatpush1.bf16.msra.mxu1 (!%p326_p3), %v1765_v1  ;;  %v1793_v5 = vld [vmem:[%s2211_s6 + $0x20] ss:$8 sps:$4 sm:$0xff] (!%p326_p3)   ;;  %v1800_v6 = vld [vmem:[%s2211_s6 + $0x34] ss:$8 sps:$4 sm:$0xff] (!%p326_p3)   ;;  %v1808_v7 = vld [vmem:[%s2211_s6 + $0x30] ss:$8 sps:$4 sm:$0xff] (!%p326_p3)  }
   0x9   : > { %640 = vmatprep.subr.bf16.mxu0 (!%p326_p3), %v1772_v2  ;;  %784 = vmatprep.subr.bf16.mxu1 (!%p326_p3), %v1772_v2  ;;  %v1815_v8 = vld [vmem:[%s2211_s6 + $0x44] ss:$8 sps:$4 sm:$0xff] (!%p326_p3)   ;;  %v1825_v9 = vld [vmem:[%s2211_s6 + $0x40] ss:$8 sps:$4 sm:$0xff] (!%p326_p3)   ;;  %v1832_v10 = vld [vmem:[%s2211_s6 + $0x54] ss:$8 sps:$4 sm:$0xff] (!%p326_p3)  }
   0xa   : > { %v1840_v11 = vld [vmem:[%s2211_s6 + $0x50] ss:$8 sps:$4 sm:$0xff] (!%p326_p3)   ;;  %v1853_v12 = vld [vmem:[%s2211_s6 + $0x64] ss:$8 sps:$4 sm:$0xff] (!%p326_p3)   ;;  %v1858_v13 = vld [vmem:[%s2211_s6 + $0x60] ss:$8 sps:$4 sm:$0xff] (!%p326_p3)  }
   0xb   : > { %v1886_v18 = vld [vmem:[%s2211_s6 + $0x74] ss:$8 sps:$4 sm:$0xff] (!%p326_p3)   ;;  %v1899_v22 = vld [vmem:[%s2211_s6 + $0x70] ss:$8 sps:$4 sm:$0xff] (!%p326_p3)   ;;  %v1906_v23 = vld [vmem:[%s2211_s6 + $0x84] ss:$8 sps:$4 sm:$0xff] (!%p326_p3)  }
   0xc   : > { %641 = vmatpush1.bf16.msra.mxu0 (!%p326_p3), %v1779_v3  ;;  %785 = vmatpush1.bf16.msra.mxu1 (!%p326_p3), %v1779_v3  ;;  %v1913_v24 = vld [vmem:[%s2211_s6 + $0x80] ss:$8 sps:$4 sm:$0xff] (!%p326_p3)   ;;  %v1920_v25 = vld [vmem:[%s2211_s6 + $0x94] ss:$8 sps:$4 sm:$0xff] (!%p326_p3)   ;;  %v1927_v26 = vld [vmem:[%s2211_s6 + $0x90] ss:$8 sps:$4 sm:$0xff] (!%p326_p3)  }
   0xd   : > { %642 = vmatprep.subr.bf16.mxu0 (!%p326_p3), %v1786_v4  ;;  %786 = vmatprep.subr.bf16.mxu1 (!%p326_p3), %v1786_v4  ;;  %v1934_v27 = vld [vmem:[%s2211_s6 + $0xa4] ss:$8 sps:$4 sm:$0xff] (!%p326_p3)   ;;  %v1941_v28 = vld [vmem:[%s2211_s6 + $0xa0] ss:$8 sps:$4 sm:$0xff] (!%p326_p3)   ;;  %v1948_v29 = vld [vmem:[%s2211_s6 + $0xb4] ss:$8 sps:$4 sm:$0xff] (!%p326_p3)  }
   0xe   : > { %s2219_s27 = smov (!%p389_p4, %s1680_s27), 1  ;;  %v1955_v30 = vld [vmem:[%s2211_s6 + $0xb0] ss:$8 sps:$4 sm:$0xff]   ;;  %v1962_v31 = vld [vmem:[%s2211_s6 + $0xc4] ss:$8 sps:$4 sm:$0xff]   ;;  %vm685_vm0 = vcmask 1042432  }
   0xf   : > { %s1564_s13 = sshll.u32 %s2219_s27, 4  ;;  %s1488_s19 = sshll.u32 %s2219_s27, 2  ;;  %v1969_v32 = vld [vmem:[%s2211_s6 + $0xc0] ss:$8 sps:$4 sm:$0xff]   ;;  %v1976_v33 = vld [vmem:[%s2211_s6 + $0xd4] ss:$8 sps:$4 sm:$0xff]  }
  0x10   : > { %643 = vmatpush1.bf16.msra.mxu0 %v1793_v5  ;;  %787 = vmatpush1.bf16.msra.mxu1 %v1793_v5  ;;  %s1845_s18 = scalar_lea.vmem %s2206_s1, %s1564_s13  ;;  %s1863_s26 = scalar_lea.vmem %s2205_s0, %s1564_s13  ;;  %v1983_v34 = vld [vmem:[%s2211_s6 + $0xd0] ss:$8 sps:$4 sm:$0xff]   ;;  %v1990_v35 = vld [vmem:[%s2211_s6 + $0xe4] ss:$8 sps:$4 sm:$0xff]   ;;  %v1997_v36 = vld [vmem:[%s2211_s6 + $0xe0] ss:$8 sps:$4 sm:$0xff]  }
  0x11   : > { %644 = vmatprep.subr.bf16.mxu0 %v1800_v6  ;;  %788 = vmatprep.subr.bf16.mxu1 %v1800_v6  ;;  %v1866_v14 = vld.sshfl [vmem:[%s1845_s18] sm:$0x33 pattern:$0x76325410]  ;;  %s412_s11 = scalar_lea.vmem %s2207_s2, %s1488_s19  ;;  %v1876_v16 = vld [vmem:[%s1863_s26 + $0xc] sm:$0xf] }
  0x12   : > { %v475_v15 = vcombine.high %v1866_v14, %v1866_v14  ;;  %v1879_v17 = vld.sshfl [vmem:[%s1845_s18 + $0x4] sm:$0x33 pattern:$0x76325410]  ;;  %v1890_v20 = vld [vmem:[%s412_s11] sm:$0xf] }
  0x13   : > { %v779_v19 = vcombine.high %v1879_v17, %v1879_v17  ;;  %v1044_v21 = vsub.f32 %v1876_v16, %v1890_v20  ;;  %v2004_v37 = vld [vmem:[%s2211_s6 + $0xf4] ss:$8 sps:$4 sm:$0xff]   ;;  %v2009_v38 = vld [vmem:[%s2209_s4] sm:$0x77]  ;;  %v2016_v39 = vld [vmem:[%s2211_s6 + $0xf0] ss:$8 sps:$4 sm:$0xff]  }
  0x14   : > { %645 = vmatpush1.bf16.msra.mxu0 %v1808_v7  ;;  %789 = vmatpush1.bf16.msra.mxu1 %v1808_v7  ;;  %v2022_v40 = vcombine.high %v2009_v38, %v2009_v38  ;;  %v2025_v41 = vld.sshfl [vmem:[%s1845_s18 + $0x8] sm:$0x33 pattern:$0x76325410]  ;;  %v464_v43 = vld [vmem:[%s1863_s26] sm:$0xf] }
  0x15   : > { %646 = vmatprep.subr.bf16.mxu0 %v1815_v8  ;;  %790 = vmatprep.subr.bf16.mxu1 %v1815_v8  ;;  %v917_v42 = vcombine.high %v2025_v41, %v2025_v41  ;;  %v1690_v44 = vmov 0.0   ;;  %v465_v45 = vsub.f32 %v464_v43, %v1890_v20  ;;  %v1528_v46 = vld [vmem:[%s1863_s26 + $0x4] sm:$0xf]  ;;  %vm681_vm1 = vcmask 23552   ;;  %v1534_v48 = vld [vmem:[%s1863_s26 + $0x8] sm:$0xf] }
  0x16   : > { %670 = vmatprep.mubr.bf16.mxu0 %v475_v15  ;;  %814 = vmatprep.mubr.bf16.mxu1 %v779_v19  ;;  %v768_v47 = vsub.f32 %v1528_v46, %v1890_v20  ;;  %v906_v49 = vsub.f32 %v1534_v48, %v1890_v20  ;;  %v2061_v50 = vld.sshfl [vmem:[%s1845_s18 + $0xc] sm:$0x33 pattern:$0x76325410]  ;;  %v1642_v53 = vld [vmem:[%s2210_s5] ss:$8 sps:$4 sm:$0xff]  }
  0x17   : > { %v1055_v51 = vcombine.high %v2061_v50, %v2061_v50  ;;  %v1644_v52 = vld [vmem:[%s2210_s5 + $0x4] ss:$8 sps:$4 sm:$0xff]   ;;  %v1647_v54 = vld [vmem:[%s2210_s5 + $0x14] ss:$8 sps:$4 sm:$0xff]   ;;  %v1645_v55 = vld [vmem:[%s2210_s5 + $0x10] ss:$8 sps:$4 sm:$0xff]  }
  0x18   : > { %647 = vmatpush1.bf16.msra.mxu0 %v1825_v9  ;;  %791 = vmatpush1.bf16.msra.mxu1 %v1825_v9  ;;  %v1650_v56 = vld [vmem:[%s2210_s5 + $0x24] ss:$8 sps:$4 sm:$0xff]   ;;  %v1691_v57 = vmov 0   ;;  %v1648_v58 = vld [vmem:[%s2210_s5 + $0x20] ss:$8 sps:$4 sm:$0xff]   ;;  %s1489_s12 = sshll.u32 %s2219_s27, 1 }
  0x19   : > { %648 = vmatprep.subr.bf16.mxu0 %v1832_v10  ;;  %792 = vmatprep.subr.bf16.mxu1 %v1832_v10  ;;  %v1653_v59 = vld [vmem:[%s2210_s5 + $0x34] ss:$8 sps:$4 sm:$0xff]   ;;  %v1651_v60 = vld [vmem:[%s2210_s5 + $0x30] ss:$8 sps:$4 sm:$0xff]   ;;  %v1656_v61 = vld [vmem:[%s2210_s5 + $0x44] ss:$8 sps:$4 sm:$0xff]   ;;  %s419_s17 = scalar_lea.vmem %s2208_s3, %s1489_s12 }
  0x1a   : > { %v1654_v62 = vld [vmem:[%s2210_s5 + $0x40] ss:$8 sps:$4 sm:$0xff]   ;;  %v1659_v63 = vld [vmem:[%s2210_s5 + $0x54] ss:$8 sps:$4 sm:$0xff]   ;;  %s1566_s19 = sshll.u32 %s2219_s27, 3 }
  0x1b   : > { %v1180_v46 = vld [vmem:[%s2212_s7] sm:$0x3]  ;;  %s428_s22 = scalar_lea.vmem %s2213_s8, %s1566_s19 }
  0x1c   : > { %649 = vmatpush1.bf16.msra.mxu0 %v1840_v11  ;;  %793 = vmatpush1.bf16.msra.mxu1 %v1840_v11 }
  0x1d   : > { %650 = vmatprep.subr.bf16.mxu0 %v1853_v12  ;;  %794 = vmatprep.subr.bf16.mxu1 %v1853_v12 }
  0x20   : > { %651 = vmatpush1.bf16.msra.mxu0 %v1858_v13  ;;  %795 = vmatpush1.bf16.msra.mxu1 %v1858_v13 }
  0x21   : > { %652 = vmatprep.subr.bf16.mxu0 %v1886_v18  ;;  %796 = vmatprep.subr.bf16.mxu1 %v1886_v18 }
  0x24   : > { %653 = vmatpush1.bf16.msra.mxu0 %v1899_v22  ;;  %797 = vmatpush1.bf16.msra.mxu1 %v1899_v22 }
  0x25   : > { %654 = vmatprep.subr.bf16.mxu0 %v1906_v23  ;;  %798 = vmatprep.subr.bf16.mxu1 %v1906_v23 }
  0x28   : > { %655 = vmatpush1.bf16.msra.mxu0 %v1913_v24  ;;  %799 = vmatpush1.bf16.msra.mxu1 %v1913_v24 }
  0x29   : > { %656 = vmatprep.subr.bf16.mxu0 %v1920_v25  ;;  %800 = vmatprep.subr.bf16.mxu1 %v1920_v25 }
  0x2c   : > { %657 = vmatpush1.bf16.msra.mxu0 %v1927_v26  ;;  %801 = vmatpush1.bf16.msra.mxu1 %v1927_v26 }
  0x2d   : > { %658 = vmatprep.subr.bf16.mxu0 %v1934_v27  ;;  %802 = vmatprep.subr.bf16.mxu1 %v1934_v27 }
  0x30   : > { %659 = vmatpush1.bf16.msra.mxu0 %v1941_v28  ;;  %803 = vmatpush1.bf16.msra.mxu1 %v1941_v28 }
  0x31   : > { %660 = vmatprep.subr.bf16.mxu0 %v1948_v29  ;;  %804 = vmatprep.subr.bf16.mxu1 %v1948_v29 }
  0x34   : > { %661 = vmatpush1.bf16.msra.mxu0 %v1955_v30  ;;  %805 = vmatpush1.bf16.msra.mxu1 %v1955_v30 }
  0x35   : > { %662 = vmatprep.subr.bf16.mxu0 %v1962_v31  ;;  %806 = vmatprep.subr.bf16.mxu1 %v1962_v31 }
  0x38   : > { %663 = vmatpush1.bf16.msra.mxu0 %v1969_v32  ;;  %807 = vmatpush1.bf16.msra.mxu1 %v1969_v32 }
  0x39   : > { %664 = vmatprep.subr.bf16.mxu0 %v1976_v33  ;;  %808 = vmatprep.subr.bf16.mxu1 %v1976_v33 }
  0x3c   : > { %665 = vmatpush1.bf16.msra.mxu0 %v1983_v34  ;;  %809 = vmatpush1.bf16.msra.mxu1 %v1983_v34 }
  0x3d   : > { %666 = vmatprep.subr.bf16.mxu0 %v1990_v35  ;;  %810 = vmatprep.subr.bf16.mxu1 %v1990_v35 }
  0x40   : > { %667 = vmatpush1.bf16.msra.mxu0 %v1997_v36  ;;  %811 = vmatpush1.bf16.msra.mxu1 %v1997_v36 }
  0x41   : > { %668 = vmatprep.subr.bf16.mxu0 %v2004_v37  ;;  %812 = vmatprep.subr.bf16.mxu1 %v2004_v37 }
  0x44   : > { %669 = vmatpush1.bf16.msra.mxu0 %v2016_v39  ;;  %813 = vmatpush1.bf16.msra.mxu1 %v2016_v39 }
  0x45   : > { %920 = vmatprep.subr.bf16.mxu1 %v1760_v0  ;;  %1525 = vmatprep.subr.msk.mxu0 %vm685_vm0, %v2022_v40 }
  0x47   : > { %671 = vmatmul.mubr.bf16.vlgmr.msra.gmra.mrb[0].mxu0 %v1866_v14  ;;  %815 = vmatmul.mubr.bf16.vlgmr.msra.gmra.mrb[0].mxu1 %v1879_v17 }
  0x48   : > { %921 = vmatpush1.bf16.msra.mxu1 %v1765_v1  ;;  %1526 = vmatpush1.msk.msra.mxu0 %vm685_vm0, %v2009_v38 }
  0x49   : > { %922 = vmatprep.subr.bf16.mxu1 %v1772_v2  ;;  %754 = vmatprep.mubr.f32.mxu0 %v1690_v44 }
  0x4a   : > { %1531 = vmatprep.subr.msk.mxu0 %vm685_vm0, %v2022_v40  ;;  %952 = vmatprep.mubr.bf16.mxu1 %v917_v42 }
  0x4c   : > { %923 = vmatpush1.bf16.msra.mxu1 %v1779_v3 }
  0x4d   : > { %924 = vmatprep.subr.bf16.mxu1 %v1786_v4 }
  0x4f   : > { %1527 = vmatmul.mubr.msk.f32.vlgmr.msra.gmra.mrb[4].mxu0 %vm681_vm1, %v465_v45 }
  0x50   : > { %925 = vmatpush1.bf16.msra.mxu1 %v1793_v5  ;;  %1532 = vmatpush1.msk.msra.mxu0 %vm685_vm0, %v2009_v38 }
  0x51   : > { %890 = vmatprep.mubr.f32.mxu0 %v1690_v44  ;;  %926 = vmatprep.subr.bf16.mxu1 %v1800_v6 }
  0x52   : > { %1537 = vmatprep.subr.msk.mxu0 %vm685_vm0, %v2022_v40 }
  0x53   : > { %1533 = vmatmul.mubr.msk.f32.vlgmr.msra.gmra.mrb[6].mxu0 %vm681_vm1, %v768_v47 }
  0x54   : > { %927 = vmatpush1.bf16.msra.mxu1 %v1808_v7  ;;  %1538 = vmatpush1.msk.msra.mxu0 %vm685_vm0, %v2009_v38 }
  0x55   : > { %1028 = vmatprep.mubr.f32.mxu0 %v1690_v44  ;;  %1058 = vmatprep.subr.bf16.mxu0 %v1760_v0  ;;  %v1657_v0 = vld [vmem:[%s2210_s5 + $0x50] ss:$8 sps:$4 sm:$0xff]  }
  0x56   : > { %928 = vmatprep.subr.bf16.mxu1 %v1815_v8 }
  0x57   : > { %1539 = vmatmul.mubr.msk.f32.vlgmr.msra.gmra.mrb[8].mxu0 %vm681_vm1, %v906_v49 }
  0x58   : > { %1059 = vmatpush1.bf16.msra.mxu0 %v1765_v1  ;;  %929 = vmatpush1.bf16.msra.mxu1 %v1825_v9  ;;  %v1662_v1 = vld [vmem:[%s2210_s5 + $0x64] ss:$8 sps:$4 sm:$0xff]  }
  0x59   : > { %1060 = vmatprep.subr.bf16.mxu0 %v1772_v2  ;;  %930 = vmatprep.subr.bf16.mxu1 %v1832_v10  ;;  %v1660_v2 = vld [vmem:[%s2210_s5 + $0x60] ss:$8 sps:$4 sm:$0xff]  }
  0x5a   : > { %1090 = vmatprep.mubr.bf16.mxu0 %v1055_v51 }
  0x5c   : > { %1061 = vmatpush1.bf16.msra.mxu0 %v1779_v3  ;;  %931 = vmatpush1.bf16.msra.mxu1 %v1840_v11  ;;  %v1665_v3 = vld [vmem:[%s2210_s5 + $0x74] ss:$8 sps:$4 sm:$0xff]  }
  0x5d   : > { %1062 = vmatprep.subr.bf16.mxu0 %v1786_v4  ;;  %932 = vmatprep.subr.bf16.mxu1 %v1853_v12  ;;  %v1663_v4 = vld [vmem:[%s2210_s5 + $0x70] ss:$8 sps:$4 sm:$0xff]  }
  0x60   : > { %1063 = vmatpush1.bf16.msra.mxu0 %v1793_v5  ;;  %933 = vmatpush1.bf16.msra.mxu1 %v1858_v13  ;;  %v1181_v5 = vld [vmem:[%s419_s17] sm:$0x3] }
  0x61   : > { %1064 = vmatprep.subr.bf16.mxu0 %v1800_v6  ;;  %934 = vmatprep.subr.bf16.mxu1 %v1886_v18 }
  0x64   : > { %1065 = vmatpush1.bf16.msra.mxu0 %v1808_v7  ;;  %935 = vmatpush1.bf16.msra.mxu1 %v1899_v22 }
  0x65   : > { %1066 = vmatprep.subr.bf16.mxu0 %v1815_v8  ;;  %936 = vmatprep.subr.bf16.mxu1 %v1906_v23 }
  0x68   : > { %1067 = vmatpush1.bf16.msra.mxu0 %v1825_v9  ;;  %937 = vmatpush1.bf16.msra.mxu1 %v1913_v24 }
  0x69   : > { %1068 = vmatprep.subr.bf16.mxu0 %v1832_v10  ;;  %938 = vmatprep.subr.bf16.mxu1 %v1920_v25 }
  0x6c   : > { %1069 = vmatpush1.bf16.msra.mxu0 %v1840_v11  ;;  %939 = vmatpush1.bf16.msra.mxu1 %v1927_v26 }
  0x6d   : > { %1070 = vmatprep.subr.bf16.mxu0 %v1853_v12  ;;  %940 = vmatprep.subr.bf16.mxu1 %v1934_v27 }
  0x70   : > { %1071 = vmatpush1.bf16.msra.mxu0 %v1858_v13  ;;  %941 = vmatpush1.bf16.msra.mxu1 %v1941_v28 }
  0x71   : > { %1072 = vmatprep.subr.bf16.mxu0 %v1886_v18  ;;  %942 = vmatprep.subr.bf16.mxu1 %v1948_v29 }
  0x74   : > { %1073 = vmatpush1.bf16.msra.mxu0 %v1899_v22  ;;  %943 = vmatpush1.bf16.msra.mxu1 %v1955_v30 }
  0x75   : > { %1074 = vmatprep.subr.bf16.mxu0 %v1906_v23  ;;  %944 = vmatprep.subr.bf16.mxu1 %v1962_v31 }
  0x78   : > { %1075 = vmatpush1.bf16.msra.mxu0 %v1913_v24  ;;  %945 = vmatpush1.bf16.msra.mxu1 %v1969_v32 }
  0x79   : > { %1076 = vmatprep.subr.bf16.mxu0 %v1920_v25  ;;  %946 = vmatprep.subr.bf16.mxu1 %v1976_v33 }
  0x7c   : > { %1077 = vmatpush1.bf16.msra.mxu0 %v1927_v26  ;;  %947 = vmatpush1.bf16.msra.mxu1 %v1983_v34 }
  0x7d   : > { %1078 = vmatprep.subr.bf16.mxu0 %v1934_v27  ;;  %948 = vmatprep.subr.bf16.mxu1 %v1990_v35 }
  0x80   : > { %1079 = vmatpush1.bf16.msra.mxu0 %v1941_v28  ;;  %949 = vmatpush1.bf16.msra.mxu1 %v1997_v36 }
  0x81   : > { %1080 = vmatprep.subr.bf16.mxu0 %v1948_v29  ;;  %950 = vmatprep.subr.bf16.mxu1 %v2004_v37 }
  0x84   : > { %1081 = vmatpush1.bf16.msra.mxu0 %v1955_v30  ;;  %951 = vmatpush1.bf16.msra.mxu1 %v2016_v39 }
  0x85   : > { %1082 = vmatprep.subr.bf16.mxu0 %v1962_v31  ;;  %1278 = vmatprep.subr.bf16.mxu1 %v1644_v52 }
  0x87   : > { %953 = vmatmul.mubr.bf16.vlgmr.msra.gmra.mrb[4].mxu1 %v2025_v41 }
  0x88   : > { %1083 = vmatpush1.bf16.msra.mxu0 %v1969_v32  ;;  %1279 = vmatpush1.bf16.msra.mxu1 %v1642_v53 }
  0x89   : > { %1084 = vmatprep.subr.bf16.mxu0 %v1976_v33  ;;  %1280 = vmatprep.subr.bf16.mxu1 %v1647_v54 }
  0x8a   : > { %1310 = vmatprep.mubr.bf16.mxu1 %v1691_v57 }
  0x8c   : > { %1085 = vmatpush1.bf16.msra.mxu0 %v1983_v34  ;;  %1281 = vmatpush1.bf16.msra.mxu1 %v1645_v55 }
  0x8d   : > { %1086 = vmatprep.subr.bf16.mxu0 %v1990_v35  ;;  %1282 = vmatprep.subr.bf16.mxu1 %v1650_v56 }
  0x90   : > { %1087 = vmatpush1.bf16.msra.mxu0 %v1997_v36  ;;  %1283 = vmatpush1.bf16.msra.mxu1 %v1648_v58 }
  0x91   : > { %1088 = vmatprep.subr.bf16.mxu0 %v2004_v37  ;;  %1284 = vmatprep.subr.bf16.mxu1 %v1653_v59  ;;  %v1320_v37 = vlaneseq }
  0x94   : > { %1089 = vmatpush1.bf16.msra.mxu0 %v2016_v39  ;;  %1285 = vmatpush1.bf16.msra.mxu1 %v1651_v60 }
  0x95   : > { %1286 = vmatprep.subr.bf16.mxu1 %v1656_v61  ;;  %1543 = vmatprep.subr.msk.mxu0 %vm685_vm0, %v2022_v40  ;;  %v1321_v40 = vshrl.u32 %v1320_v37, 7 }
  0x97   : > { %1091 = vmatmul.mubr.bf16.vlgmr.msra.gmra.mrb[12].mxu0 %v2061_v50  ;;  %v1326_v47 = vsub.s32 1, %v1321_v40 }
  0x98   : > { %1287 = vmatpush1.bf16.msra.mxu1 %v1654_v62  ;;  %1544 = vmatpush1.msk.msra.mxu0 %vm685_vm0, %v2009_v38 }
  0x99   : > { %1288 = vmatprep.subr.bf16.mxu1 %v1659_v63  ;;  %1166 = vmatprep.mubr.f32.mxu0 %v1690_v44  ;;  %v1322_v44 = vsub.s32 0, %v1321_v40  ;;  %v1327_v51 = vrot.slane %v1180_v46, %v1326_v47 }
  0x9b   : > { %v1323_v49 = vrot.slane %v1180_v46, %v1322_v44 }
  0x9c   : > { %1289 = vmatpush1.bf16.msra.mxu1 %v1657_v0 }
  0x9d   : > { %1290 = vmatprep.subr.bf16.mxu1 %v1662_v1 }
  0x9f   : > { %1545 = vmatmul.mubr.msk.f32.vlgmr.msra.gmra.mrb[10].mxu0 %vm681_vm1, %v1044_v21 }
  0xa0   : > { %1291 = vmatpush1.bf16.msra.mxu1 %v1660_v2 }
  0xa1   : > { %1292 = vmatprep.subr.bf16.mxu1 %v1665_v3 }
  0xa4   : > { %1293 = vmatpush1.bf16.msra.mxu1 %v1663_v4 }
  0xa7   : > { %1311 = vmatmul.mubr.bf16.vlgmr.msra.gmra.mrb[8].mxu1 %v1181_v5 }
 0x11a   : > { %v816_v6 = vpop.f32.mrb[0].mxu1  ;;  %v672_v7 = vpop.f32.mrb[0].mxu0 }
 0x11b   : > { %v818_v8 = vpop.f32.mrb[1].mxu1  ;;  %v674_v9 = vpop.f32.mrb[1].mxu0 }
 0x11c   : > { %v820_v10 = vpop.f32.mrb[2].mxu1  ;;  %v676_v11 = vpop.f32.mrb[2].mxu0 }
 0x11d   : > { %v821_v12 = vpop.f32.mrb[3].mxu1  ;;  %v677_v13 = vpop.f32.mrb[3].mxu0 }
 0x122   : > { %v756_v14 = vpop.f32.mrb[4].mxu0 }
 0x123   : > { %v757_v15 = vadd.f32 %v756_v14, %v672_v7  ;;  %v758_v16 = vpop.f32.mrb[5].mxu0 }
 0x124   : > { %v759_v17 = vadd.f32 %v758_v16, %v674_v9 }
 0x126   : > { %v763_v18 = vcombine.low %v757_v15, %v759_v17  ;;  %v892_v19 = vpop.f32.mrb[6].mxu0 }
 0x127   : > { %v893_v20 = vadd.f32 %v892_v19, %v816_v6  ;;  %v894_v21 = vpop.f32.mrb[7].mxu0 }
 0x128   : > { %v895_v22 = vadd.f32 %v894_v21, %v818_v8 }
 0x12a   : > { %v900_v23 = vcombine.low %v893_v20, %v895_v22  ;;  %v1030_v24 = vpop.f32.mrb[8].mxu0 }
 0x12b   : > { %v1032_v25 = vpop.f32.mrb[9].mxu0 }
 0x12c   : > { %v902_v26 = vmax.f32 %v763_v18, %v900_v23 }
 0x15a   : > { %v954_v27 = vpop.f32.mrb[4].mxu1 }
 0x15b   : > { %v1031_v28 = vadd.f32 %v1030_v24, %v954_v27  ;;  %v956_v29 = vpop.f32.mrb[5].mxu1 }
 0x15c   : > { %v1033_v30 = vadd.f32 %v1032_v25, %v956_v29  ;;  %v958_v31 = vpop.f32.mrb[6].mxu1 }
 0x15d   : > { %v959_v32 = vpop.f32.mrb[7].mxu1 }
 0x15e   : > { %v1038_v33 = vcombine.low %v1031_v28, %v1033_v30 }
 0x160   : > { %v1040_v34 = vmax.f32 %v902_v26, %v1038_v33 }
 0x16a   : > { %v1092_v35 = vpop.f32.mrb[12].mxu0 }
 0x16b   : > { %v1094_v36 = vpop.f32.mrb[13].mxu0 }
 0x16c   : > { %v1096_v38 = vpop.f32.mrb[14].mxu0 }
 0x16d   : > { %v1097_v39 = vpop.f32.mrb[15].mxu0 }
 0x172   : > { %v1168_v41 = vpop.f32.mrb[10].mxu0 }
 0x173   : > { %v1169_v42 = vadd.f32 %v1168_v41, %v1092_v35  ;;  %v1170_v43 = vpop.f32.mrb[11].mxu0 }
 0x174   : > { %v1171_v45 = vadd.f32 %v1170_v43, %v1094_v36 }
 0x176   : > { %v1176_v48 = vcombine.low %v1169_v42, %v1171_v45 }
 0x178   : > { %v1178_v50 = vmax.f32 %v1040_v34, %v1176_v48 }
 0x17a   : > { %v1312_v52 = vpop.f32.mrb[8].mxu1 }
 0x17b   : > { %v1330_v53 = vadd.f32 %v1323_v49, %v1312_v52  ;;  %v1314_v54 = vpop.f32.mrb[9].mxu1 }
 0x17c   : > { %v1331_v55 = vadd.f32 %v1327_v51, %v1314_v54  ;;  %v1316_v56 = vpop.f32.mrb[10].mxu1 }
 0x17d   : > { %v1317_v57 = vpop.f32.mrb[11].mxu1 }
 0x17e   : > { %v1335_v58 = vcombine.low %v1330_v53, %v1331_v55 }
 0x180   : > { %v1337_v59 = vadd.f32 %v1335_v58, %v1178_v50 }
 0x182   : > { %1338 = vst [vmem:[%s428_s22] sm:$0xff] %v1337_v59 }
 0x183 PF: > { %s18_s29 = sadd.s32 1, %s1688_s29   ;;  %s2214_s27 = smov %s1684_s28 }
 0x184   : > { %p15_p5 = scmp.ge.s32.totalorder %s18_s29, 4   ;;  %s2215_s28 = smov %s2217_s30 }
 0x186   :  { %17 = sbr.rel (!%p15_p5) target bundleno = 2 (0x2), region = 97 }

// kernel: neg.16
= control target key start
LH: loop header
LB: loop body
LE: loop exit
PB: predicated region body
PF: predicated region fallthrough
CT: control target
= control target key end

     0   :  { %s72_s0 = inlined_call_operand.vmem [shape: f32[2,32,16], index: 0, kind: input, shape index: {}]   ;;  %s73_s1 = inlined_call_operand.vmem [shape: f32[2,32,16], index: 1, kind: output, shape index: {}]  }
   0x1   :  { %v2_v0 = vld [vmem:[%s72_s0] sm:$0xff]  ;;  %v32_v1 = vld [vmem:[%s72_s0 + $0x10] sm:$0xff]  ;;  %v34_v2 = vld [vmem:[%s72_s0 + $0x8] sm:$0xff] }
   0x2   :  { %v5_v3 = vxor.u32 2147483648, %v2_v0  ;;  %v12_v4 = vxor.u32 2147483648, %v32_v1  ;;  %v20_v5 = vxor.u32 2147483648, %v34_v2  ;;  %v36_v6 = vld [vmem:[%s72_s0 + $0x18] sm:$0xff] }
   0x3   :  { %v28_v7 = vxor.u32 2147483648, %v36_v6 }
   0x4   :  { %7 = vst [vmem:[%s73_s1] sm:$0xff] %v5_v3  ;;  %33 = vst [vmem:[%s73_s1 + $0x10] sm:$0xff] %v12_v4 }
   0x5   :  { %35 = vst [vmem:[%s73_s1 + $0x8] sm:$0xff] %v20_v5  ;;  %37 = vst [vmem:[%s73_s1 + $0x18] sm:$0xff] %v28_v7 }

// kernel: point_rnn_forward.23
= control target key start
LH: loop header
LB: loop body
LE: loop exit
PB: predicated region body
PF: predicated region fallthrough
CT: control target
= control target key end

     0   :  { %v723_v0 = vmov 0   ;;  %vm300_vm0 = vcmask 523264   ;;  %vm571_vm1 = vcmask 23552   ;;  %s1004_s1 = inlined_call_operand.vmem [shape: bf16[448,64], index: 1, kind: input, shape index: {}]   ;;  %s1005_s0 = inlined_call_operand.vmem [shape: f32[64,448], index: 0, kind: input, shape index: {}]   ;;  %s1006_s3 = inlined_call_operand.vmem [shape: bf16[64,3], index: 3, kind: input, shape index: {}]   ;;  %s1007_s2 = inlined_call_operand.vmem [shape: f32[1,64], index: 2, kind: input, shape index: {}]   ;;  %s1008_s4 = inlined_call_operand.vmem [shape: f32[1,3], index: 4, kind: input, shape index: {}]   ;;  %s1009_s5 = inlined_call_operand.vmem [shape: f32[64,3], index: 5, kind: output, shape index: {}]  }
   0x1   :  { %378 = vmatprep.subr.bf16.mxu1 %v723_v0  ;;  %v691_v1 = vld [vmem:[%s1004_s1 + $0x80] sm:$0xff]   ;;  %v692_v2 = vld [vmem:[%s1004_s1 + $0x88] sm:$0xff]   ;;  %v695_v5 = vld [vmem:[%s1004_s1 + $0x90] sm:$0xff]  }
   0x2   :  { %379 = vmatpush1.bf16.msra.mxu1 %v691_v1  ;;  %v693_v3 = vld [vmem:[%s1004_s1 + $0x40] sm:$0xff]   ;;  %v696_v6 = vld [vmem:[%s1004_s1 + $0x48] sm:$0xff]   ;;  %v699_v8 = vld [vmem:[%s1004_s1 + $0x50] sm:$0xff]  }
   0x3   :  { %380 = vmatprep.subr.bf16.mxu1 %v723_v0  ;;  %v694_v4 = vld [vmem:[%s1004_s1] sm:$0xff]   ;;  %626 = vmatprep.subr.bf16.mxu0 %v693_v3  ;;  %v697_v7 = vld [vmem:[%s1004_s1 + $0x8] sm:$0xff]   ;;  %v700_v9 = vld [vmem:[%s1004_s1 + $0x10] sm:$0xff]  }
   0x4   :  { %627 = vmatpush3.bf16.msra.mxu0 %v694_v4  ;;  %v698_v10 = vld [vmem:[%s1004_s1 + $0x98] sm:$0xff]   ;;  %v701_v12 = vld [vmem:[%s1004_s1 + $0xa0] sm:$0xff]   ;;  %v704_v15 = vld [vmem:[%s1004_s1 + $0xa8] sm:$0xff]  }
   0x5   :  { %628 = vmatprep.subr.bf16.mxu0 %v696_v6  ;;  %v702_v11 = vld [vmem:[%s1004_s1 + $0x58] sm:$0xff]   ;;  %v705_v14 = vld [vmem:[%s1004_s1 + $0x60] sm:$0xff]   ;;  %v708_v17 = vld [vmem:[%s1004_s1 + $0x68] sm:$0xff]  }
   0x6   :  { %381 = vmatpush1.bf16.msra.mxu1 %v692_v2  ;;  %v703_v13 = vld [vmem:[%s1004_s1 + $0x18] sm:$0xff]   ;;  %v706_v16 = vld [vmem:[%s1004_s1 + $0x20] sm:$0xff]   ;;  %v707_v18 = vld [vmem:[%s1004_s1 + $0xb0] sm:$0xff]  }
   0x7   :  { %382 = vmatprep.subr.bf16.mxu1 %v723_v0  ;;  %v709_v19 = vld [vmem:[%s1004_s1 + $0x28] sm:$0xff]   ;;  %v711_v20 = vld [vmem:[%s1004_s1 + $0x70] sm:$0xff]   ;;  %v710_v21 = vld [vmem:[%s1004_s1 + $0xb8] sm:$0xff]  }
   0x8   :  { %629 = vmatpush3.bf16.msra.mxu0 %v697_v7  ;;  %v712_v22 = vld [vmem:[%s1004_s1 + $0x30] sm:$0xff]   ;;  %v714_v23 = vld [vmem:[%s1004_s1 + $0x78] sm:$0xff]   ;;  %v22_v24 = vld [vmem:[%s1005_s0 + $0x8] sm:$0xff] }
   0x9   :  { %630 = vmatprep.subr.bf16.mxu0 %v699_v8  ;;  %v26_v25 = vld [vmem:[%s1005_s0 + $0x28] sm:$0xff]  ;;  %v713_v27 = vld [vmem:[%s1004_s1 + $0xc0] sm:$0xff]   ;;  %v715_v28 = vld [vmem:[%s1004_s1 + $0x38] sm:$0xff]  }
   0xa   :  { %383 = vmatpush1.bf16.msra.mxu1 %v695_v5  ;;  %v54_v26 = vpack.c.bf16 %v26_v25, %v22_v24  ;;  %v21_v29 = vld [vmem:[%s1005_s0] sm:$0xff]  ;;  %v30_v31 = vld [vmem:[%s1005_s0 + $0x48] sm:$0xff]  ;;  %v24_v33 = vld [vmem:[%s1005_s0 + $0x18] sm:$0xff] }
   0xb   :  { %384 = vmatprep.subr.bf16.mxu1 %v723_v0  ;;  %v25_v30 = vld [vmem:[%s1005_s0 + $0x20] sm:$0xff]  ;;  %v34_v32 = vld [vmem:[%s1005_s0 + $0x68] sm:$0xff]  ;;  %v28_v34 = vld [vmem:[%s1005_s0 + $0x38] sm:$0xff] }
   0xc   :  { %631 = vmatpush3.bf16.msra.mxu0 %v700_v9  ;;  %345 = vmatprep.mubr.bf16.mxu0 %v54_v26  ;;  %v56_v35 = vpack.c.bf16 %v28_v34, %v24_v33  ;;  %v53_v36 = vpack.c.bf16 %v25_v30, %v21_v29  ;;  %v58_v37 = vpack.c.bf16 %v34_v32, %v30_v31  ;;  %v716_v38 = vld [vmem:[%s1004_s1 + $0xc8] sm:$0xff]   ;;  %v29_v39 = vld [vmem:[%s1005_s0 + $0x40] sm:$0xff]  ;;  %v717_v41 = vld [vmem:[%s1004_s1 + $0xd0] sm:$0xff]  }
   0xd   :  { %632 = vmatprep.subr.bf16.mxu0 %v702_v11  ;;  %v33_v40 = vld [vmem:[%s1005_s0 + $0x60] sm:$0xff]  ;;  %v38_v42 = vld [vmem:[%s1005_s0 + $0x88] sm:$0xff]  ;;  %v718_v46 = vld [vmem:[%s1004_s1 + $0xd8] sm:$0xff]  }
   0xe   :  { %385 = vmatpush1.bf16.msra.mxu1 %v698_v10  ;;  %613 = vmatprep.mubr.msk.bf16.mxu1 %vm300_vm0, %v56_v35  ;;  %v42_v43 = vld [vmem:[%s1005_s0 + $0xa8] sm:$0xff]  ;;  %v57_v44 = vpack.c.bf16 %v33_v40, %v29_v39  ;;  %v23_v47 = vld [vmem:[%s1005_s0 + $0x10] sm:$0xff]  ;;  %v32_v49 = vld [vmem:[%s1005_s0 + $0x58] sm:$0xff] }
   0xf   :  { %386 = vmatprep.subr.bf16.mxu1 %v723_v0  ;;  %v62_v45 = vpack.c.bf16 %v42_v43, %v38_v42  ;;  %v27_v48 = vld [vmem:[%s1005_s0 + $0x30] sm:$0xff]  ;;  %v36_v50 = vld [vmem:[%s1005_s0 + $0x78] sm:$0xff]  ;;  %v37_v52 = vld [vmem:[%s1005_s0 + $0x80] sm:$0xff] }
  0x10   :  { %633 = vmatpush3.bf16.msra.mxu0 %v703_v13  ;;  %v55_v51 = vpack.c.bf16 %v27_v48, %v23_v47  ;;  %v41_v53 = vld [vmem:[%s1005_s0 + $0xa0] sm:$0xff]  ;;  %v60_v54 = vpack.c.bf16 %v36_v50, %v32_v49  ;;  %v46_v55 = vld [vmem:[%s1005_s0 + $0xc8] sm:$0xff]  ;;  %v31_v59 = vld [vmem:[%s1005_s0 + $0x50] sm:$0xff] }
  0x11   :  { %634 = vmatprep.subr.bf16.mxu0 %v705_v14  ;;  %v50_v56 = vld [vmem:[%s1005_s0 + $0xe8] sm:$0xff]  ;;  %v61_v57 = vpack.c.bf16 %v41_v53, %v37_v52  ;;  %v35_v60 = vld [vmem:[%s1005_s0 + $0x70] sm:$0xff]  ;;  %v40_v61 = vld [vmem:[%s1005_s0 + $0x98] sm:$0xff] }
  0x12   :  { %387 = vmatpush1.bf16.msra.mxu1 %v701_v12  ;;  %v66_v58 = vpack.c.bf16 %v50_v56, %v46_v55  ;;  %v44_v62 = vld [vmem:[%s1005_s0 + $0xb8] sm:$0xff]  ;;  %v59_v63 = vpack.c.bf16 %v35_v60, %v31_v59  ;;  %v49_v1 = vld [vmem:[%s1005_s0 + $0xe0] sm:$0xff]  ;;  %v39_v4 = vld [vmem:[%s1005_s0 + $0x90] sm:$0xff] }
  0x13   :  { %388 = vmatprep.subr.bf16.mxu1 %v723_v0  ;;  %v64_v2 = vpack.c.bf16 %v44_v62, %v40_v61  ;;  %v43_v5 = vld [vmem:[%s1005_s0 + $0xb0] sm:$0xff]  ;;  %v48_v6 = vld [vmem:[%s1005_s0 + $0xd8] sm:$0xff]  ;;  %v719_v13 = vld [vmem:[%s1006_s3] sm:$0xff]  }
  0x14   :  { %635 = vmatpush3.bf16.msra.mxu0 %v706_v16  ;;  %v52_v7 = vld [vmem:[%s1005_s0 + $0xf8] sm:$0xff]  ;;  %v63_v8 = vpack.c.bf16 %v43_v5, %v39_v4  ;;  %v47_v10 = vld [vmem:[%s1005_s0 + $0xd0] sm:$0xff]  ;;  %v720_v14 = vld [vmem:[%s1006_s3 + $0x8] sm:$0xff]  }
  0x15   :  { %636 = vmatprep.subr.bf16.mxu0 %v708_v17  ;;  %v68_v9 = vpack.c.bf16 %v52_v7, %v48_v6  ;;  %v51_v11 = vld [vmem:[%s1005_s0 + $0xf0] sm:$0xff]  ;;  %v722_v16 = vld [vmem:[%s1006_s3 + $0x18] sm:$0xff]  }
  0x16   :  { %389 = vmatpush1.bf16.msra.mxu1 %v704_v15  ;;  %v67_v12 = vpack.c.bf16 %v51_v11, %v47_v10  ;;  %v721_v15 = vld [vmem:[%s1006_s3 + $0x10] sm:$0xff]  }
  0x17   :  { %390 = vmatprep.subr.bf16.mxu1 %v723_v0 }
  0x18   :  { %637 = vmatpush3.bf16.msra.mxu0 %v709_v19 }
  0x19   :  { %638 = vmatprep.subr.bf16.mxu0 %v711_v20 }
  0x1a   :  { %391 = vmatpush1.bf16.msra.mxu1 %v707_v18 }
  0x1b   :  { %392 = vmatprep.subr.bf16.mxu1 %v723_v0 }
  0x1c   :  { %639 = vmatpush3.bf16.msra.mxu0 %v712_v22 }
  0x1d   :  { %640 = vmatprep.subr.bf16.mxu0 %v714_v23  ;;  %v584_v23 = vld [vmem:[%s1007_s2] ss:$0 sm:$0xff] }
  0x1e   :  { %393 = vmatpush1.bf16.msra.mxu1 %v710_v21 }
  0x1f   :  { %394 = vmatprep.subr.bf16.mxu1 %v723_v0 }
  0x20   :  { %641 = vmatpush3.bf16.msra.mxu0 %v715_v28 }
  0x21   :  { %674 = vmatprep.subr.bf16.mxu0 %v719_v13 }
  0x22   :  { %395 = vmatpush1.bf16.msra.mxu1 %v713_v27 }
  0x23   :  { %396 = vmatprep.subr.bf16.mxu1 %v723_v0  ;;  %346 = vmatmul.mubr.bf16.vlgmr.msra.gmra.mrb[0].mxu0 %v53_v36 }
  0x24   :  { %353 = vmatprep.mubr.bf16.mxu0 %v58_v37  ;;  %675 = vmatpush3.bf16.msra.mxu0 %v719_v13 }
  0x25   :  { %676 = vmatprep.subr.bf16.mxu0 %v720_v14 }
  0x26   :  { %397 = vmatpush1.bf16.msra.mxu1 %v716_v38 }
  0x27   :  { %398 = vmatprep.subr.bf16.mxu1 %v723_v0 }
  0x28   :  { %677 = vmatpush3.bf16.msra.mxu0 %v720_v14 }
  0x29   :  { %678 = vmatprep.subr.bf16.mxu0 %v721_v15 }
  0x2a   :  { %399 = vmatpush1.bf16.msra.mxu1 %v717_v41 }
  0x2b   :  { %400 = vmatprep.subr.bf16.mxu1 %v723_v0  ;;  %354 = vmatmul.mubr.bf16.gmra.mrb[4].mxu0 %v57_v44  ;;  %v45_v0 = vld [vmem:[%s1005_s0 + $0xc0] sm:$0xff] }
  0x2c   :  { %361 = vmatprep.mubr.bf16.mxu0 %v62_v45  ;;  %v65_v3 = vpack.c.bf16 %v49_v1, %v45_v0  ;;  %679 = vmatpush3.bf16.msra.mxu0 %v721_v15 }
  0x2d   :  { %680 = vmatprep.subr.bf16.mxu0 %v722_v16 }
  0x2e   :  { %401 = vmatpush1.bf16.msra.mxu1 %v718_v46 }
  0x30   :  { %681 = vmatpush3.bf16.msra.mxu0 %v722_v16 }
  0x31   :  { %411 = vmatmul.mubr.bf16.vlgmr.msra.gmra.mrb[0].mxu1 %v55_v51 }
  0x32   :  { %614 = vmatprep.mubr.msk.bf16.mxu1 %vm300_vm0, %v60_v54 }
  0x33   :  { %362 = vmatmul.mubr.bf16.gmra.mrb[8].mxu0 %v61_v57 }
  0x34   :  { %369 = vmatprep.mubr.bf16.mxu0 %v66_v58 }
  0x39   :  { %419 = vmatmul.mubr.bf16.gmra.mrb[4].mxu1 %v59_v63 }
  0x3a   :  { %615 = vmatprep.mubr.msk.bf16.mxu1 %vm300_vm0, %v64_v2 }
  0x3b   :  { %370 = vmatmul.mubr.bf16.gmra.mrb[12].mxu0 %v65_v3 }
  0x41   :  { %427 = vmatmul.mubr.bf16.gmra.mrb[8].mxu1 %v63_v8 }
  0x42   :  { %616 = vmatprep.mubr.msk.bf16.mxu1 %vm300_vm0, %v68_v9 }
  0x49   :  { %435 = vmatmul.mubr.bf16.gmra.mrb[12].mxu1 %v67_v12 }
  0xf6   :  { %v642_v17 = vpop.f32.mrb[0].mxu0 }
  0xf7   :  { %v643_v18 = vpop.f32.mrb[1].mxu0 }
  0xf8   :  { %v644_v19 = vadd.f32 %v643_v18, %v642_v17  ;;  %v645_v20 = vpop.f32.mrb[2].mxu0 }
  0xf9   :  { %v646_v21 = vpop.f32.mrb[3].mxu0 }
  0xfa   :  { %v647_v22 = vadd.f32 %v646_v21, %v645_v20  ;;  %v348_v26 = vadd.f32 %v644_v19, %v584_v23 }
  0xfc   :  { %v351_v34 = vadd.f32 %v647_v22, %v584_v23  ;;  %v617_v22 = vld [vmem:[%s1008_s4] ss:$0 sm:$0xff] }
  0xfe   :  { %v648_v24 = vpop.f32.mrb[4].mxu0 }
  0xff   :  { %v649_v25 = vpop.f32.mrb[5].mxu0 }
 0x100   :  { %v650_v27 = vadd.f32 %v649_v25, %v648_v24  ;;  %v651_v28 = vpop.f32.mrb[6].mxu0 }
 0x101   :  { %v652_v29 = vpop.f32.mrb[7].mxu0 }
 0x102   :  { %v653_v30 = vadd.f32 %v652_v29, %v651_v28  ;;  %v356_v42 = vadd.f32 %v650_v27, %v584_v23 }
 0x104   :  { %v412_v31 = vpop.f32.mrb[0].mxu1  ;;  %v359_v51 = vadd.f32 %v653_v30, %v584_v23 }
 0x105   :  { %v413_v32 = vadd.f32 %v412_v31, %v348_v26  ;;  %v414_v33 = vpop.f32.mrb[1].mxu1 }
 0x106   :  { %v415_v35 = vpop.f32.mrb[2].mxu1  ;;  %v654_v38 = vpop.f32.mrb[8].mxu0 }
 0x107   :  { %v416_v36 = vadd.f32 %v415_v35, %v351_v34  ;;  %v417_v37 = vpop.f32.mrb[3].mxu1  ;;  %v655_v39 = vpop.f32.mrb[9].mxu0  ;;  %v443_v40 = vmax.f32 %v413_v32, 0.0 }
 0x108   :  { %v656_v43 = vadd.f32 %v655_v39, %v654_v38  ;;  %v657_v44 = vpop.f32.mrb[10].mxu0 }
 0x109   :  { %v444_v41 = vmax.f32 %v416_v36, 0.0  ;;  %v658_v45 = vpop.f32.mrb[11].mxu0 }
 0x10a   :  { %v659_v47 = vadd.f32 %v658_v45, %v657_v44  ;;  %v364_v59 = vadd.f32 %v656_v43, %v584_v23 }
 0x10b   :  { %v451_v46 = vpack.c.bf16 %v444_v41, %v443_v40 }
 0x10c   :  { %v420_v48 = vpop.f32.mrb[4].mxu1  ;;  %v367_v4 = vadd.f32 %v659_v47, %v584_v23 }
 0x10d   :  { %v421_v49 = vadd.f32 %v420_v48, %v356_v42  ;;  %v422_v50 = vpop.f32.mrb[5].mxu1  ;;  %682 = vmatprep.mubr.msk.bf16.mxu0 %vm300_vm0, %v451_v46 }
 0x10e   :  { %v423_v52 = vpop.f32.mrb[6].mxu1  ;;  %v660_v55 = vpop.f32.mrb[12].mxu0 }
 0x10f   :  { %v424_v53 = vadd.f32 %v423_v52, %v359_v51  ;;  %v425_v54 = vpop.f32.mrb[7].mxu1  ;;  %v661_v56 = vpop.f32.mrb[13].mxu0  ;;  %v445_v57 = vmax.f32 %v421_v49, 0.0 }
 0x110   :  { %v662_v60 = vadd.f32 %v661_v56, %v660_v55  ;;  %v663_v61 = vpop.f32.mrb[14].mxu0 }
 0x111   :  { %v446_v58 = vmax.f32 %v424_v53, 0.0  ;;  %v664_v62 = vpop.f32.mrb[15].mxu0 }
 0x112   :  { %v665_v0 = vadd.f32 %v664_v62, %v663_v61  ;;  %v372_v10 = vadd.f32 %v662_v60, %v584_v23 }
 0x113   :  { %v452_v63 = vpack.c.bf16 %v446_v58, %v445_v57 }
 0x114   :  { %v428_v1 = vpop.f32.mrb[8].mxu1  ;;  %v375_v15 = vadd.f32 %v665_v0, %v584_v23 }
 0x115   :  { %v429_v2 = vadd.f32 %v428_v1, %v364_v59  ;;  %v430_v3 = vpop.f32.mrb[9].mxu1  ;;  %683 = vmatmul.mubr.msk.bf16.vlgmr.msra.gmra.mrb[16].mxu0 %vm300_vm0, %v452_v63 }
 0x116   :  { %v431_v5 = vpop.f32.mrb[10].mxu1 }
 0x117   :  { %v432_v6 = vadd.f32 %v431_v5, %v367_v4  ;;  %v433_v7 = vpop.f32.mrb[11].mxu1  ;;  %v447_v8 = vmax.f32 %v429_v2, 0.0 }
 0x119   :  { %v448_v9 = vmax.f32 %v432_v6, 0.0 }
 0x11b   :  { %v453_v11 = vpack.c.bf16 %v448_v9, %v447_v8 }
 0x11c   :  { %v436_v12 = vpop.f32.mrb[12].mxu1 }
 0x11d   :  { %v437_v13 = vadd.f32 %v436_v12, %v372_v10  ;;  %v438_v14 = vpop.f32.mrb[13].mxu1  ;;  %686 = vmatprep.mubr.msk.bf16.mxu0 %vm300_vm0, %v453_v11 }
 0x11e   :  { %v439_v16 = vpop.f32.mrb[14].mxu1 }
 0x11f   :  { %v440_v17 = vadd.f32 %v439_v16, %v375_v15  ;;  %v441_v18 = vpop.f32.mrb[15].mxu1  ;;  %v449_v19 = vmax.f32 %v437_v13, 0.0 }
 0x121   :  { %v450_v20 = vmax.f32 %v440_v17, 0.0 }
 0x123   :  { %v454_v21 = vpack.c.bf16 %v450_v20, %v449_v19 }
 0x125   :  { %687 = vmatmul.mubr.msk.bf16.gmra.mrb[20].mxu0 %vm300_vm0, %v454_v21 }
 0x1e8   :  { %v684_v24 = vpop.f32.mrb[16].mxu0 }
 0x1e9   :  { %v549_v25 = vadd.f32 %v684_v24, %v617_v22  ;;  %v540_v26 = vpop.f32.mrb[17].mxu0 }
 0x1ea   :  { %v541_v27 = vadd.f32 %v617_v22, %v540_v26  ;;  %v685_v28 = vpop.f32.mrb[18].mxu0 }
 0x1eb   :  { %574 = vst.msk [vmem:[%s1009_s5 + $0x10] sm:$0xff] %vm571_vm1, %v549_v25  ;;  %v552_v23 = vadd.f32 %v685_v28, %v617_v22  ;;  %v543_v29 = vpop.f32.mrb[19].mxu0 }
 0x1ec   :  { %572 = vst.msk [vmem:[%s1009_s5] sm:$0xff] %vm571_vm1, %v541_v27  ;;  %v544_v30 = vadd.f32 %v617_v22, %v543_v29 }
 0x1ed   :  { %575 = vst.msk [vmem:[%s1009_s5 + $0x18] sm:$0xff] %vm571_vm1, %v552_v23 }
 0x1ee   :  { %573 = vst.msk [vmem:[%s1009_s5 + $0x8] sm:$0xff] %vm571_vm1, %v544_v30 }
 0x1f8   :  { %v688_v31 = vpop.f32.mrb[20].mxu0 }
 0x1f9   :  { %v565_v32 = vadd.f32 %v688_v31, %v617_v22  ;;  %v556_v33 = vpop.f32.mrb[21].mxu0 }
 0x1fa   :  { %v557_v34 = vadd.f32 %v617_v22, %v556_v33  ;;  %v689_v35 = vpop.f32.mrb[22].mxu0 }
 0x1fb   :  { %578 = vst.msk [vmem:[%s1009_s5 + $0x30] sm:$0xff] %vm571_vm1, %v565_v32  ;;  %v568_v36 = vadd.f32 %v689_v35, %v617_v22  ;;  %v559_v37 = vpop.f32.mrb[23].mxu0 }
 0x1fc   :  { %576 = vst.msk [vmem:[%s1009_s5 + $0x20] sm:$0xff] %vm571_vm1, %v557_v34  ;;  %v560_v38 = vadd.f32 %v617_v22, %v559_v37 }
 0x1fd   :  { %579 = vst.msk [vmem:[%s1009_s5 + $0x38] sm:$0xff] %vm571_vm1, %v568_v36 }
 0x1fe   :  { %577 = vst.msk [vmem:[%s1009_s5 + $0x28] sm:$0xff] %vm571_vm1, %v560_v38 }

</bundles_post_ra>
